<compile_context>
chip_gen: v6e
topology: v6e:2x2x1
jax: 0.10.0
libtpu: 0.0.40
codegen_flags: <defaults>
</compile_context>

<pallas_src>
import functools
import math
import numpy as np
import jax
import jax.numpy as jnp
from jax.experimental import pallas as pl
from jax.experimental.pallas import tpu as pltpu

DEFAULT_SR = 44100
FCHUNK = 128    # frequency-chunk width (lanes); cos|sin concat -> N = 256 per MXU push
TILE_BF = 256   # (batch*frame) rows per tile on the matmul M axis


# ----------------------- parameter construction (glue, host-side) -----------------------

def hann_window(n_fft):
    n = np.arange(n_fft, dtype=np.float64)
    return (0.5 * (1.0 - np.cos(2.0 * np.pi * n / n_fft))).astype(np.float32)


def dft_basis(n_fft, n_freqs, window):
    # Windowed real-DFT basis.  real = sum w*x*cos(2pi n k / N), imag = -sum w*x*sin(...)
    # (sign of imag irrelevant: we only use real^2 + imag^2).
    n = np.arange(n_fft, dtype=np.int64)[:, None]
    k = np.arange(n_freqs, dtype=np.int64)[None, :]
    phase = 2.0 * np.pi * ((n * k) % n_fft).astype(np.float64) / n_fft
    cos_m = (window[:, None].astype(np.float64) * np.cos(phase)).astype(np.float32)
    sin_m = (window[:, None].astype(np.float64) * np.sin(phase)).astype(np.float32)
    return cos_m, sin_m


def melscale_fbanks(n_freqs, f_min, f_max, n_mels, sample_rate):
    # torchaudio.functional.melscale_fbanks, mel_scale='htk', norm=None
    all_freqs = np.linspace(0.0, sample_rate // 2, n_freqs)

    def hz_to_mel(f):
        return 2595.0 * np.log10(1.0 + f / 700.0)

    def mel_to_hz(m):
        return 700.0 * (10.0 ** (m / 2595.0) - 1.0)

    m_pts = np.linspace(hz_to_mel(f_min), hz_to_mel(f_max), n_mels + 2)
    f_pts = mel_to_hz(m_pts)
    f_diff = f_pts[1:] - f_pts[:-1]                       # (n_mels+1,)
    slopes = f_pts[None, :] - all_freqs[:, None]          # (n_freqs, n_mels+2)
    down = (-1.0 * slopes[:, :-2]) / f_diff[:-1]
    up = slopes[:, 2:] / f_diff[1:]
    fb = np.maximum(0.0, np.minimum(down, up))            # (n_freqs, n_mels)
    return fb.astype(np.float32)


def create_dct(n_mfcc, n_mels):
    # torchaudio.functional.create_dct, norm='ortho'
    n = np.arange(n_mels, dtype=np.float64)
    k = np.arange(n_mfcc, dtype=np.float64)[:, None]
    dct = np.cos(np.pi / n_mels * (n + 0.5) * k)          # (n_mfcc, n_mels)
    dct[0] *= 1.0 / np.sqrt(2.0)
    dct *= np.sqrt(2.0 / n_mels)
    return np.ascontiguousarray(dct.T).astype(np.float32)  # (n_mels, n_mfcc)


# ------------------------------------ Pallas kernels ------------------------------------

def mel_power_kernel(frames_ref, cossin_ref, fb_ref, mel_ref):
    """Grid (bf_tile 'parallel', freq_chunk 'arbitrary'); mel_ref accumulates over k."""
    k = pl.program_id(1)

    @pl.when(k == 0)
    def _():
        mel_ref[...] = jnp.zeros_like(mel_ref)

    fr = frames_ref[...]                                     # (TILE_BF, n_fft) bf16
    # One MXU push with N=256: [cos chunk | sin chunk], f32 accumulation.
    reim = jnp.dot(fr, cossin_ref[...],
                   preferred_element_type=jnp.float32)       # (TILE_BF, 2*FCHUNK)
    re = reim[:, :FCHUNK]
    im = reim[:, FCHUNK:]
    power = re * re + im * im                                # (TILE_BF, FCHUNK) f32
    mel_ref[...] += jnp.dot(power, fb_ref[...],
                            preferred_element_type=jnp.float32)


def finalize_kernel(mel_ref, avg_ref, dct_ref, out_ref, *, n_valid_rows):
    AMIN = 1e-10
    TOP_DB = 80.0
    MULT = 10.0            # power spectrogram
    # db_multiplier = log10(max(amin, ref=1.0)) == 0
    mel = mel_ref[...]                                       # (BF_pad, n_mels)
    x_db = MULT * jnp.log10(jnp.maximum(mel, AMIN))
    # Global top_db max over VALID rows only (padded zero-frames carry -100 dB junk).
    row = jax.lax.broadcasted_iota(jnp.int32, mel.shape, 0)
    x_db_valid = jnp.where(row < n_valid_rows, x_db, jnp.float32(-3.0e38))
    gmax = jnp.max(jnp.max(x_db_valid, axis=1, keepdims=True), axis=0, keepdims=True)
    x_db = jnp.maximum(x_db, gmax - TOP_DB)
    # Per-batch time-average first (N = n_mels = 128, lane-filled; padded rows have
    # zero weight), then DCT-II (ortho).  DCT and time-mean commute (DCT is linear).
    mel_avg = jnp.dot(avg_ref[...], x_db, preferred_element_type=jnp.float32)   # (B, n_mels)
    out_ref[...] = jnp.dot(mel_avg, dct_ref[...], preferred_element_type=jnp.float32)


# --------------------------------------- wrapper ---------------------------------------

def mfcc_time_avg(x, *, sample_rate=DEFAULT_SR, n_fft=2048, hop_length=512,
                  n_mels=128, n_mfcc=40):
    B, T = x.shape
    n_freqs = n_fft // 2 + 1
    pad = n_fft // 2

    # torch.stft(center=True, pad_mode='reflect') framing (host/XLA glue).
    # TODO(synk): for long audio, frame in-kernel from the padded waveform with
    # hop-strided pl.ds DMA instead of materializing the 4x-expanded frames array.
    xp = jnp.pad(x.astype(jnp.float32), ((0, 0), (pad, pad)), mode="reflect")
    n_frames = 1 + (T + 2 * pad - n_fft) // hop_length
    idx = np.arange(n_frames)[:, None] * hop_length + np.arange(n_fft)[None, :]
    frames = xp[:, idx].reshape(B * n_frames, n_fft)         # (BF, n_fft)

    BF = B * n_frames
    n_bf_tiles = (BF + TILE_BF - 1) // TILE_BF
    BF_pad = n_bf_tiles * TILE_BF
    frames = jnp.pad(frames, ((0, BF_pad - BF), (0, 0))).astype(jnp.bfloat16)

    window = hann_window(n_fft)
    cos_m, sin_m = dft_basis(n_fft, n_freqs, window)
    fb = melscale_fbanks(n_freqs, 0.0, float(sample_rate // 2), n_mels, sample_rate)
    dct_m = create_dct(n_mfcc, n_mels)

    # Pad frequency axis to a multiple of FCHUNK; padded freqs have zero mel weight.
    n_chunks = int(math.ceil(n_freqs / FCHUNK))
    n_freqs_pad = n_chunks * FCHUNK
    fpad = n_freqs_pad - n_freqs
    cos_m = np.pad(cos_m, ((0, 0), (0, fpad)))
    sin_m = np.pad(sin_m, ((0, 0), (0, fpad)))
    fb = np.pad(fb, ((0, fpad), (0, 0)))

    # Interleave per-chunk so block k = [cos chunk k | sin chunk k] -> (n_fft, 256).
    cos_c = cos_m.reshape(n_fft, n_chunks, FCHUNK)
    sin_c = sin_m.reshape(n_fft, n_chunks, FCHUNK)
    cossin = np.concatenate([cos_c, sin_c], axis=2).reshape(n_fft, 2 * FCHUNK * n_chunks)

    # Per-batch time-average weights over the zero-padded flat (batch*frame) axis.
    avg = np.zeros((B, BF_pad), np.float32)
    for b in range(B):
        avg[b, b * n_frames:(b + 1) * n_frames] = 1.0 / n_frames

    cossin = jnp.asarray(cossin, dtype=jnp.bfloat16)
    fb = jnp.asarray(fb)
    dct_m = jnp.asarray(dct_m)
    avg = jnp.asarray(avg)

    # ---- kernel 1: mel power spectrogram ----
    mel_power = pl.pallas_call(
        mel_power_kernel,
        out_shape=jax.ShapeDtypeStruct((BF_pad, n_mels), jnp.float32),
        grid_spec=pltpu.PrefetchScalarGridSpec(
            num_scalar_prefetch=0,
            grid=(n_bf_tiles, n_chunks),
            in_specs=[
                pl.BlockSpec((TILE_BF, n_fft), lambda i, k: (i, 0)),      # frames tile (resident over k)
                pl.BlockSpec((n_fft, 2 * FCHUNK), lambda i, k: (0, k)),   # cos|sin basis chunk (bf16)
                pl.BlockSpec((FCHUNK, n_mels), lambda i, k: (k, 0)),      # mel fbank chunk
            ],
            out_specs=pl.BlockSpec((TILE_BF, n_mels), lambda i, k: (i, 0)),
        ),
        compiler_params=pltpu.CompilerParams(
            dimension_semantics=("parallel", "arbitrary")),
    )(frames, cossin, fb)

    # ---- kernel 2: dB (global top_db), time-average, DCT ----
    out = pl.pallas_call(
        functools.partial(finalize_kernel, n_valid_rows=BF),
        out_shape=jax.ShapeDtypeStruct((B, n_mfcc), jnp.float32),
        grid_spec=pltpu.PrefetchScalarGridSpec(
            num_scalar_prefetch=0,
            grid=(1,),
            in_specs=[
                pl.BlockSpec((BF_pad, n_mels), lambda i: (0, 0)),
                pl.BlockSpec((B, BF_pad), lambda i: (0, 0)),
                pl.BlockSpec((n_mels, n_mfcc), lambda i: (0, 0)),
            ],
            out_specs=pl.BlockSpec((B, n_mfcc), lambda i: (0, 0)),
        ),
        compiler_params=pltpu.CompilerParams(dimension_semantics=("arbitrary",)),
    )(mel_power, avg, dct_m)
    return out


if __name__ == "__main__":
    key = jax.random.PRNGKey(0)
    B, T = 2, 4096                     # small waveform batch: (batch, samples)
    x = jax.random.normal(key, (B, T), dtype=jnp.float32)

    out = mfcc_time_avg(x)             # time-averaged MFCC: (B, n_mfcc=40)
    jax.block_until_ready(out)

    assert out.shape == (B, 40), out.shape
    assert out.dtype == jnp.float32
    assert bool(jnp.all(jnp.isfinite(out)))
    print("KERNEL_OK")
</pallas_src>

<mosaic_0001>
module attributes {stable_mosaic.version = 11 : i64} {
  func.func @mel_power_kernel(%arg0: i32, %arg1: i32, %arg2: memref<256x2048xbf16, #tpu.memory_space<vmem>>, %arg3: memref<2048x256xbf16, #tpu.memory_space<vmem>>, %arg4: memref<128x128xf32, #tpu.memory_space<vmem>>, %arg5: memref<256x128xf32, #tpu.memory_space<vmem>>) attributes {dimension_semantics = [#tpu.dimension_semantics<parallel>, #tpu.dimension_semantics<arbitrary>], iteration_bounds = array<i64: 1, 9>, scalar_prefetch = 0 : i64, scratch_operands = 0 : i64, tpu.core_type = #tpu.core_type<tc>, window_params = [{transform_indices = @transform_0, window_bounds = array<i64: 256, 2048>}, {transform_indices = @transform_1, window_bounds = array<i64: 2048, 256>}, {transform_indices = @transform_2, window_bounds = array<i64: 128, 128>}, {transform_indices = @transform_3, window_bounds = array<i64: 256, 128>}]} {
    %c0_i32 = arith.constant 0 : i32
    %0 = arith.cmpi eq, %arg1, %c0_i32 : i32
    %1 = arith.extui %0 : i1 to i32
    %c0_i32_0 = arith.constant 0 : i32
    %2 = arith.cmpi ne, %1, %c0_i32_0 : i32
    scf.if %2 {
      %cst_11 = arith.constant 0.000000e+00 : f32
      %16 = vector.broadcast %cst_11 : f32 to vector<256x128xf32>
      %c0_12 = arith.constant 0 : index
      %c0_13 = arith.constant 0 : index
      %17 = vector.load %arg5[%c0_12, %c0_13] : memref<256x128xf32, #tpu.memory_space<vmem>>, vector<256x128xf32>
      tpu.vector_store %arg5[%c0_12, %c0_13], %16 {strides = array<i32>} : memref<256x128xf32, #tpu.memory_space<vmem>>, vector<256x128xf32>,
    } else {
    }
    %c0 = arith.constant 0 : index
    %c0_1 = arith.constant 0 : index
    %3 = vector.load %arg2[%c0, %c0_1] : memref<256x2048xbf16, #tpu.memory_space<vmem>>, vector<256x2048xbf16>
    %c0_2 = arith.constant 0 : index
    %c0_3 = arith.constant 0 : index
    %4 = vector.load %arg3[%c0_2, %c0_3] : memref<2048x256xbf16, #tpu.memory_space<vmem>>, vector<2048x256xbf16>
    %cst = arith.constant dense<0.000000e+00> : vector<256x256xf32>
    %5 = tpu.matmul %3, %4, %cst {dimension_numbers = #tpu.dot_dimension_numbers<[1], [0], [0], [1], [0, 0, 1, 1], [], []>} : vector<256x2048xbf16>, vector<2048x256xbf16>, vector<256x256xf32> -> vector<256x256xf32>
    %6 = vector.extract_strided_slice %5 {offsets = [0, 0], sizes = [256, 128], strides = [1, 1]} : vector<256x256xf32> to vector<256x128xf32>
    %7 = vector.extract_strided_slice %5 {offsets = [0, 128], sizes = [256, 128], strides = [1, 1]} : vector<256x256xf32> to vector<256x128xf32>
    %8 = arith.mulf %6, %6 : vector<256x128xf32>
    %9 = arith.mulf %7, %7 : vector<256x128xf32>
    %10 = arith.addf %8, %9 : vector<256x128xf32>
    %c0_4 = arith.constant 0 : index
    %c0_5 = arith.constant 0 : index
    %11 = vector.load %arg5[%c0_4, %c0_5] : memref<256x128xf32, #tpu.memory_space<vmem>>, vector<256x128xf32>
    %c0_6 = arith.constant 0 : index
    %c0_7 = arith.constant 0 : index
    %12 = vector.load %arg4[%c0_6, %c0_7] : memref<128x128xf32, #tpu.memory_space<vmem>>, vector<128x128xf32>
    %cst_8 = arith.constant dense<0.000000e+00> : vector<256x128xf32>
    %13 = tpu.matmul %10, %12, %cst_8 {dimension_numbers = #tpu.dot_dimension_numbers<[1], [0], [0], [1], [0, 0, 1, 1], [], []>} : vector<256x128xf32>, vector<128x128xf32>, vector<256x128xf32> -> vector<256x128xf32>
    %14 = arith.addf %11, %13 : vector<256x128xf32>
    %c0_9 = arith.constant 0 : index
    %c0_10 = arith.constant 0 : index
    %15 = vector.load %arg5[%c0_9, %c0_10] : memref<256x128xf32, #tpu.memory_space<vmem>>, vector<256x128xf32>
    tpu.vector_store %arg5[%c0_9, %c0_10], %14 {strides = array<i32>} : memref<256x128xf32, #tpu.memory_space<vmem>>, vector<256x128xf32>,
    return
  }
  func.func @transform_0(%arg0: i32, %arg1: i32) -> (i32, i32) {
    %c0_i32 = arith.constant 0 : i32
    %c0_i32_0 = arith.constant 0 : i32
    return %arg0, %c0_i32 : i32, i32
  }
  func.func @transform_1(%arg0: i32, %arg1: i32) -> (i32, i32) {
    %c0_i32 = arith.constant 0 : i32
    %c0_i32_0 = arith.constant 0 : i32
    return %c0_i32, %arg1 : i32, i32
  }
  func.func @transform_2(%arg0: i32, %arg1: i32) -> (i32, i32) {
    %c0_i32 = arith.constant 0 : i32
    %c0_i32_0 = arith.constant 0 : i32
    return %arg1, %c0_i32 : i32, i32
  }
  func.func @transform_3(%arg0: i32, %arg1: i32) -> (i32, i32) {
    %c0_i32 = arith.constant 0 : i32
    %c0_i32_0 = arith.constant 0 : i32
    return %arg0, %c0_i32 : i32, i32
  }
}

</mosaic_0001>

<bundles_post_ra>
// kernel: tpu_custom_call.1
= control target key start
LH: loop header
LB: loop body
LE: loop exit
PB: predicated region body
PF: predicated region fallthrough
CT: control target
= control target key end

     0   :  { %8 = vsyncpa [#allocation3], 0  ;;  %s8067_s0 = inlined_call_operand.hbm [shape: bf16[256,2048], index: 0, kind: input, shape index: {}]   ;;  %s8068_s1 = inlined_call_operand.hbm [shape: bf16[2048,2304], index: 1, kind: input, shape index: {}]   ;;  %s8069_s2 = inlined_call_operand.hbm [shape: f32[1152,128], index: 2, kind: input, shape index: {}]   ;;  %s8070_s3 = inlined_call_operand.hbm [shape: f32[256,128], index: 3, kind: output, shape index: {}]  }
   0x1   :  { %9 = vsyncpa [#allocation6], 0 }
   0x2   :  { %11 = vsyncpa [#allocation6 + $0x1], 0 }
   0x3   :  { %12 = vsyncpa [#allocation4], 0  ;;  %s6812_s12 = smov 0   ;;  %s6814_s13 = smov 0  }
   0x4   :  { %s6816_s14 = smov 0   ;;  %s6818_s15 = smov 0  }
   0x5   :  { %s6820_s16 = smov 0   ;;  %s6822_s17 = smov 0  }
   0x6 LB: > { %s27_s18 = sadd.s32 1, %s6774_s16  ;;  %s63_s19 = sadd.s32 1, %s6766_s14  ;;  %s6778_s17 = sphi %s6822_s17, %s18_s17   ;;  %s6774_s16 = sphi %s6820_s16, %s8227_s16   ;;  %s6770_s15 = sphi %s6818_s15, %s8226_s15   ;;  %s6766_s14 = sphi %s6816_s14, %s8225_s14   ;;  %s6762_s13 = sphi %s6814_s13, %s8224_s13   ;;  %s6758_s12 = sphi %s6812_s12, %s8223_s12  }
   0x7   : > { %p28_p0 = scmp.ge.s32.totalorder %s27_s18, 9  ;;  %p70_p1 = scmp.ne.s32.totalorder %s6766_s14, %s6762_s13 }
   0x8   : > { %p71_p2 = scmp.eq.s32.totalorder %s6778_s17, 0  ;;  %p6168_p4 = scmp.lt.s32.totalorder %s6778_s17, 9 }
   0x9   : > { %s8229_s18 = smov (%p28_p0, %s27_s18), 0  ;;  %s169_s21 = sand.u32 1, %s6778_s17  }
   0xa   : > { %p72_p3 = por %p71_p2, %p70_p1  ;;  %s60_s20 = ssub.s32 %s6774_s16, %s8229_s18 }
   0xb   : > { %p61_p5 = scmp.eq.s32.totalorder %s60_s20, 0  ;;  %s171_s22 = sand.u32 1, %s6766_s14  }
   0xc   : > { %s5982_s23 = sshll.u32 %s6774_s16, 7  ;;  %s5455_s25 = sshll.u32 %s171_s22, 11 }
   0xd   : > { %s6856_s24 = scalar_select %p61_p5, %s6766_s14, %s63_s19  }
   0xe   : > { %s179_s28 = scalar_lea.hbm %s8068_s1, %s5982_s23  ;;  %p6863_p6 = pnand %p6168_p4, %p72_p3 }
   0xf   : > { %s173_s30 = scalar_lea.vmem [#allocation5], %s5455_s25  ;;  %s6867_s5 = scalar_lea.sflag [#allocation6], %s169_s21 }
  0x10   : > { %s180_s4 = sshll.u32 %s173_s30, 4  ;;  %p6616_p7 = pneg %p6863_p6  ;;  %s181_s4 = int_to_ptr.vmem [resolvable:$true] %s180_s4 }
  0x11   : > { %s6627_s6 = scalar_lea.vmem %s181_s4, 32768  ;;  %s6780_s7 = smov [#allocation5]  }
  0x12   : > { %p6628_p8 = scmp.ne.s32.totalorder %s181_s4, %s6627_s6  ;;  %s6632_s8 = sshll.u32 %s6780_s7, 4  ;;  %s6633_s8 = int_to_ptr.vmem [resolvable:$false] %s6632_s8 }
  0x13   : > { %s6634_s9 = scalar_lea.vmem %s6633_s8, 65536  ;;  %p6635_p11 = scmp.lt.s32.totalorder %s181_s4, %s6633_s8 }
  0x14   : > { %p6630_p9 = pnand %p6628_p8, %p6616_p7  ;;  %p6636_p12 = scmp.lt.s32.totalorder %s6634_s9, %s6627_s6 }
  0x16   : > { %p6631_p10 = pneg %p6630_p9  ;;  %p6637_p13 = por %p6636_p12, %p6635_p11 }
  0x18   : > { %p6638_p0 = pnand %p6637_p13, %p6631_p10 }
  0x1a   : > { %6641 = shalt.err (!%p6638_p0)
}
  0x1b   : > { %s6781_s10 = smov 1152   ;;  %s6782_s11 = smov 128  }
  0x1c   : > { %s6783_s19 = smov 8   ;;  %s6880_s20 = sadd.s32 4294967295, %s6778_s17  }
  0x1d   : > { %6163 = dma.hbm_to_vmem [thread:$0]  (!%p6863_p6), %s179_s28, 32768, %s181_s4, %s6867_s5, %s6781_s10, %s6782_s11, %s6783_s19  }
  0x1e   : > { %p76_p1 = scmp.ne.s32.totalorder %s6762_s13, %s6758_s12  ;;  %p77_p2 = scmp.eq.s32.totalorder %s6880_s20, 0 }
  0x1f   : > { %p5452_p3 = scmp.ge.s32.totalorder %s6778_s17, 1  ;;  %p139_p4 = scmp.lt.s32.totalorder %s6778_s17, 10 }
  0x20   : > { %p6889_p5 = por %p77_p2, %p76_p1  ;;  %s6784_s25 = smov [#allocation2]  }
  0x21   : > { %p6893_p8 = pnand %p5452_p3, %p139_p4  ;;  %s155_s26 = sshll.u32 %s6784_s25, 4  ;;  %s156_s26 = int_to_ptr.vmem [resolvable:$true] %s155_s26 }
  0x22   : > { %s5458_s12 = sshll.u32 %s171_s22, 7  ;;  %s5983_s27 = sshll.u32 %s6774_s16, 11 }
  0x23   : > { %p6156_p9 = pneg %p6893_p8  ;;  %s6911_s6 = scalar_lea.hbm %s8069_s2, %s5983_s27 }
  0x24   : > { %s194_s7 = scalar_lea.vmem [#allocation7], %s5458_s12  ;;  %s6653_s9 = scalar_lea.vmem %s156_s26, 32768 }
  0x25   : > { %p6904_p10 = pnand %p6156_p9, %p77_p2  ;;  %s201_s8 = sshll.u32 %s194_s7, 4  ;;  %s6913_s8 = int_to_ptr.vmem [resolvable:$true] %s201_s8 }
  0x26   : > { %p6654_p12 = scmp.ne.s32.totalorder %s156_s26, %s6653_s9  ;;  %p6661_p1 = scmp.lt.s32.totalorder %s156_s26, %s156_s26 }
  0x27   : > { %p6644_p11 = pneg %p6904_p10  ;;  %p6662_p3 = scmp.lt.s32.totalorder %s6653_s9, %s6653_s9 }
  0x29   : > { %p6656_p13 = pnand %p6654_p12, %p6644_p11  ;;  %p6663_p4 = por %p6662_p3, %p6661_p1 }
  0x2b   : > { %p6657_p0 = pneg %p6656_p13 }
  0x2d   : > { %p6664_p9 = pnand %p6663_p4, %p6657_p0 }
  0x2f   : > { %6667 = shalt.err (!%p6664_p9)
}
  0x30   : > { %s6785_s22 = smov 1024   ;;  %s6786_s10 = smov 64  }
  0x31   : > { %6159 = dma.hbm_to_vmem [thread:$0]  (!%p6904_p10), %s8067_s0, 32768, %s156_s26, [#allocation3], %s6785_s22, %s6785_s22, %s6786_s10  }
  0x32   : > { %s6681_s27 = scalar_lea.vmem %s6913_s8, 2048  ;;  %s6787_s30 = smov [#allocation7]  }
  0x33   : > { %p6682_p11 = scmp.ne.s32.totalorder %s6913_s8, %s6681_s27  ;;  %s6686_s4 = sshll.u32 %s6787_s30, 4  ;;  %s6687_s4 = int_to_ptr.vmem [resolvable:$false] %s6686_s4 }
  0x34   : > { %s6688_s7 = scalar_lea.vmem %s6687_s4, 4096  ;;  %p6689_p0 = scmp.lt.s32.totalorder %s6913_s8, %s6687_s4 }
  0x35   : > { %p6684_p12 = pnand %p6682_p11, %p6616_p7  ;;  %p6690_p1 = scmp.lt.s32.totalorder %s6688_s7, %s6681_s27 }
  0x37   : > { %p6685_p13 = pneg %p6684_p12  ;;  %p6691_p3 = por %p6690_p1, %p6689_p0 }
  0x39   : > { %p6692_p4 = pnand %p6691_p3, %p6685_p13 }
  0x3b   : > { %6695 = shalt.err (!%p6692_p4)
}
  0x3c   : > { %6166 = dma.hbm_to_vmem [thread:$0]  (!%p6863_p6), %s6911_s6, 2048, %s6913_s8, %s6867_s5, %s6782_s11, %s6782_s11, %s6783_s19  }
  0x3d   : > { %213 = sbr.rel (%p6893_p8) target bundleno = 1074 (0x432), region = 32 }
  0x42   : > { %6745 = dma.done.wait (%p77_p2), [#allocation3], 32768  }
  0x43   : > { %6747 = vsyncadd (%p77_p2), [#allocation3], 4294934528  ;;  %s219_s29 = sand.u32 1, %s6880_s20   ;;  %s221_s26 = sand.u32 1, %s6762_s13  }
  0x44   : > { %s5463_s28 = sshll.u32 %s221_s26, 11  ;;  %s220_s9 = scalar_lea.sflag [#allocation6], %s219_s29 }
  0x45   : > { %s6944_s22 = scalar_lea.vmem [#allocation5], %s5463_s28 }
  0x46   : > { %6749 = dma.done.wait (%p6889_p5), %s220_s9, 34816  }
  0x47   : > { %6751 = vsyncadd (%p6889_p5), %s220_s9, 4294932480  ;;  %s5464_s5 = sshll.u32 %s221_s26, 7  ;;  %p5465_p6 = scmp.ne.s32.totalorder %s6770_s15, 0 }
  0x48   : > { %s6950_s11 = scalar_lea.vmem [#allocation7], %s5464_s5 }
  0x49   : > { %262 = sbr.rel (%p5465_p6) target bundleno = 95 (0x5f), region = 48 }
  0x4e   : > { %v6788_v0 = vmov 0.0  }
  0x4f   : > { %263 = vst [vmem:[#allocation8] sm:$0xff] %v6788_v0  ;;  %264 = vst [vmem:[#allocation8 + $0x8] sm:$0xff] %v6788_v0 }
  0x50   : > { %265 = vst [vmem:[#allocation8 + $0x10] sm:$0xff] %v6788_v0  ;;  %266 = vst [vmem:[#allocation8 + $0x18] sm:$0xff] %v6788_v0 }
  0x51   : > { %267 = vst [vmem:[#allocation8 + $0x20] sm:$0xff] %v6788_v0  ;;  %268 = vst [vmem:[#allocation8 + $0x28] sm:$0xff] %v6788_v0 }
  0x52   : > { %269 = vst [vmem:[#allocation8 + $0x30] sm:$0xff] %v6788_v0  ;;  %270 = vst [vmem:[#allocation8 + $0x38] sm:$0xff] %v6788_v0 }
  0x53   : > { %271 = vst [vmem:[#allocation8 + $0x40] sm:$0xff] %v6788_v0  ;;  %272 = vst [vmem:[#allocation8 + $0x48] sm:$0xff] %v6788_v0 }
  0x54   : > { %273 = vst [vmem:[#allocation8 + $0x50] sm:$0xff] %v6788_v0  ;;  %274 = vst [vmem:[#allocation8 + $0x58] sm:$0xff] %v6788_v0 }
  0x55   : > { %275 = vst [vmem:[#allocation8 + $0x60] sm:$0xff] %v6788_v0  ;;  %276 = vst [vmem:[#allocation8 + $0x68] sm:$0xff] %v6788_v0 }
  0x56   : > { %277 = vst [vmem:[#allocation8 + $0x70] sm:$0xff] %v6788_v0  ;;  %278 = vst [vmem:[#allocation8 + $0x78] sm:$0xff] %v6788_v0 }
  0x57   : > { %279 = vst [vmem:[#allocation8 + $0x80] sm:$0xff] %v6788_v0  ;;  %280 = vst [vmem:[#allocation8 + $0x88] sm:$0xff] %v6788_v0 }
  0x58   : > { %281 = vst [vmem:[#allocation8 + $0x90] sm:$0xff] %v6788_v0  ;;  %282 = vst [vmem:[#allocation8 + $0x98] sm:$0xff] %v6788_v0 }
  0x59   : > { %283 = vst [vmem:[#allocation8 + $0xa0] sm:$0xff] %v6788_v0  ;;  %284 = vst [vmem:[#allocation8 + $0xa8] sm:$0xff] %v6788_v0 }
  0x5a   : > { %285 = vst [vmem:[#allocation8 + $0xb0] sm:$0xff] %v6788_v0  ;;  %286 = vst [vmem:[#allocation8 + $0xb8] sm:$0xff] %v6788_v0 }
  0x5b   : > { %287 = vst [vmem:[#allocation8 + $0xc0] sm:$0xff] %v6788_v0  ;;  %288 = vst [vmem:[#allocation8 + $0xc8] sm:$0xff] %v6788_v0 }
  0x5c   : > { %289 = vst [vmem:[#allocation8 + $0xd0] sm:$0xff] %v6788_v0  ;;  %290 = vst [vmem:[#allocation8 + $0xd8] sm:$0xff] %v6788_v0 }
  0x5d   : > { %291 = vst [vmem:[#allocation8 + $0xe0] sm:$0xff] %v6788_v0  ;;  %292 = vst [vmem:[#allocation8 + $0xe8] sm:$0xff] %v6788_v0 }
  0x5e   : > { %293 = vst [vmem:[#allocation8 + $0xf0] sm:$0xff] %v6788_v0  ;;  %294 = vst [vmem:[#allocation8 + $0xf8] sm:$0xff] %v6788_v0 }
  0x5f PF: > { %v6230_v1 = vld [vmem:[%s6944_s22 + $0x74] ss:$8 sps:$4 sm:$0xff]   ;;  %v6234_v3 = vld [vmem:[%s6944_s22 + $0x70] ss:$8 sps:$4 sm:$0xff]   ;;  %v6236_v5 = vld [vmem:[%s6944_s22 + $0x64] ss:$8 sps:$4 sm:$0xff]  }
  0x60   : > { %v6232_v2 = vld [vmem:[%s6944_s22 + $0x174] ss:$8 sps:$4 sm:$0xff]   ;;  %3367 = vmatprep.subr.bf16.mxu0 %v6230_v1  ;;  %v6235_v4 = vld [vmem:[%s6944_s22 + $0x170] ss:$8 sps:$4 sm:$0xff]   ;;  %v6238_v6 = vld [vmem:[%s6944_s22 + $0x164] ss:$8 sps:$4 sm:$0xff]  }
  0x61   : > { %3560 = vmatprep.subr.bf16.mxu1 %v6232_v2  ;;  %3368 = vmatpush1.bf16.msra.mxu0 %v6234_v3  ;;  %v6240_v7 = vld [vmem:[%s6944_s22 + $0x60] ss:$8 sps:$4 sm:$0xff]   ;;  %v6242_v9 = vld [vmem:[%s6944_s22 + $0x54] ss:$8 sps:$4 sm:$0xff]   ;;  %v6246_v11 = vld [vmem:[%s6944_s22 + $0x50] ss:$8 sps:$4 sm:$0xff]  }
  0x62   : > { %3561 = vmatpush1.bf16.msra.mxu1 %v6235_v4  ;;  %3369 = vmatprep.subr.bf16.mxu0 %v6236_v5  ;;  %v6241_v8 = vld [vmem:[%s6944_s22 + $0x160] ss:$8 sps:$4 sm:$0xff]   ;;  %v6244_v10 = vld [vmem:[%s6944_s22 + $0x154] ss:$8 sps:$4 sm:$0xff]   ;;  %v6247_v12 = vld [vmem:[%s6944_s22 + $0x150] ss:$8 sps:$4 sm:$0xff]  }
  0x63   : > { %3562 = vmatprep.subr.bf16.mxu1 %v6238_v6  ;;  %v6248_v13 = vld [vmem:[%s6944_s22 + $0x44] ss:$8 sps:$4 sm:$0xff]   ;;  %v6252_v15 = vld [vmem:[%s6944_s22 + $0x40] ss:$8 sps:$4 sm:$0xff]   ;;  %v6254_v17 = vld [vmem:[%s6944_s22 + $0x34] ss:$8 sps:$4 sm:$0xff]  }
  0x64   : > { %v6250_v14 = vld [vmem:[%s6944_s22 + $0x144] ss:$8 sps:$4 sm:$0xff]   ;;  %v6253_v16 = vld [vmem:[%s6944_s22 + $0x140] ss:$8 sps:$4 sm:$0xff]   ;;  %v6256_v18 = vld [vmem:[%s6944_s22 + $0x134] ss:$8 sps:$4 sm:$0xff]  }
  0x65   : > { %3370 = vmatpush1.bf16.msra.mxu0 %v6240_v7  ;;  %v6258_v19 = vld [vmem:[%s6944_s22 + $0x30] ss:$8 sps:$4 sm:$0xff]   ;;  %v6260_v21 = vld [vmem:[%s6944_s22 + $0x24] ss:$8 sps:$4 sm:$0xff]   ;;  %v6264_v23 = vld [vmem:[%s6944_s22 + $0x20] ss:$8 sps:$4 sm:$0xff]  }
  0x66   : > { %3563 = vmatpush1.bf16.msra.mxu1 %v6241_v8  ;;  %3371 = vmatprep.subr.bf16.mxu0 %v6242_v9  ;;  %v6259_v20 = vld [vmem:[%s6944_s22 + $0x130] ss:$8 sps:$4 sm:$0xff]   ;;  %v6262_v22 = vld [vmem:[%s6944_s22 + $0x124] ss:$8 sps:$4 sm:$0xff]   ;;  %v6265_v24 = vld [vmem:[%s6944_s22 + $0x120] ss:$8 sps:$4 sm:$0xff]  }
  0x67   : > { %3564 = vmatprep.subr.bf16.mxu1 %v6244_v10  ;;  %v6266_v25 = vld [vmem:[%s6944_s22 + $0x14] ss:$8 sps:$4 sm:$0xff]   ;;  %v6270_v27 = vld [vmem:[%s6944_s22 + $0x10] ss:$8 sps:$4 sm:$0xff]   ;;  %v6272_v29 = vld [vmem:[%s6944_s22 + $0x4] ss:$8 sps:$4 sm:$0xff]  }
  0x68   : > { %v6268_v26 = vld [vmem:[%s6944_s22 + $0x114] ss:$8 sps:$4 sm:$0xff]   ;;  %v6271_v28 = vld [vmem:[%s6944_s22 + $0x110] ss:$8 sps:$4 sm:$0xff]   ;;  %v6274_v30 = vld [vmem:[%s6944_s22 + $0x104] ss:$8 sps:$4 sm:$0xff]  }
  0x69   : > { %3372 = vmatpush1.bf16.msra.mxu0 %v6246_v11  ;;  %v6276_v31 = vld [vmem:[%s6944_s22] ss:$8 sps:$4 sm:$0xff]   ;;  %v6278_v33 = vld [vmem:[%s6944_s22 + $0xf4] ss:$8 sps:$4 sm:$0xff]   ;;  %v6282_v35 = vld [vmem:[%s6944_s22 + $0xf0] ss:$8 sps:$4 sm:$0xff]  }
  0x6a   : > { %3565 = vmatpush1.bf16.msra.mxu1 %v6247_v12  ;;  %3373 = vmatprep.subr.bf16.mxu0 %v6248_v13  ;;  %v6277_v32 = vld [vmem:[%s6944_s22 + $0x100] ss:$8 sps:$4 sm:$0xff]   ;;  %v6280_v34 = vld [vmem:[%s6944_s22 + $0x1f4] ss:$8 sps:$4 sm:$0xff]   ;;  %v6283_v36 = vld [vmem:[%s6944_s22 + $0x1f0] ss:$8 sps:$4 sm:$0xff]  }
  0x6b   : > { %3566 = vmatprep.subr.bf16.mxu1 %v6250_v14  ;;  %v6284_v37 = vld [vmem:[%s6944_s22 + $0xe4] ss:$8 sps:$4 sm:$0xff]   ;;  %v6288_v39 = vld [vmem:[%s6944_s22 + $0xe0] ss:$8 sps:$4 sm:$0xff]   ;;  %v6290_v41 = vld [vmem:[%s6944_s22 + $0xd4] ss:$8 sps:$4 sm:$0xff]  }
  0x6c   : > { %v6286_v38 = vld [vmem:[%s6944_s22 + $0x1e4] ss:$8 sps:$4 sm:$0xff]   ;;  %v6289_v40 = vld [vmem:[%s6944_s22 + $0x1e0] ss:$8 sps:$4 sm:$0xff]   ;;  %v6292_v42 = vld [vmem:[%s6944_s22 + $0x1d4] ss:$8 sps:$4 sm:$0xff]  }
  0x6d   : > { %3374 = vmatpush1.bf16.msra.mxu0 %v6252_v15  ;;  %v6294_v43 = vld [vmem:[%s6944_s22 + $0xd0] ss:$8 sps:$4 sm:$0xff]   ;;  %v6296_v45 = vld [vmem:[%s6944_s22 + $0xc4] ss:$8 sps:$4 sm:$0xff]   ;;  %v6300_v47 = vld [vmem:[%s6944_s22 + $0xc0] ss:$8 sps:$4 sm:$0xff]  }
  0x6e   : > { %3567 = vmatpush1.bf16.msra.mxu1 %v6253_v16  ;;  %3375 = vmatprep.subr.bf16.mxu0 %v6254_v17  ;;  %v6295_v44 = vld [vmem:[%s6944_s22 + $0x1d0] ss:$8 sps:$4 sm:$0xff]   ;;  %v6298_v46 = vld [vmem:[%s6944_s22 + $0x1c4] ss:$8 sps:$4 sm:$0xff]   ;;  %v6301_v48 = vld [vmem:[%s6944_s22 + $0x1c0] ss:$8 sps:$4 sm:$0xff]  }
  0x6f   : > { %3568 = vmatprep.subr.bf16.mxu1 %v6256_v18  ;;  %v7001_v49 = vld [vmem:[#allocation2] sm:$0xff]  ;;  %v7005_v51 = vld [vmem:[#allocation2 + $0x8] sm:$0xff]  ;;  %v6302_v53 = vld [vmem:[%s6944_s22 + $0xb4] ss:$8 sps:$4 sm:$0xff]   ;;  %s6789_s15 = smov [#allocation8]   ;;  %p6170_p7 = scmp.eq.s32.totalorder %s6880_s20, 8 }
  0x70   : > { %v7003_v50 = vld [vmem:[#allocation2 + $0x40] sm:$0xff]  ;;  %v304_v52 = vld [vmem:[#allocation2 + $0x48] sm:$0xff]  ;;  %v6304_v55 = vld [vmem:[%s6944_s22 + $0x1b4] ss:$8 sps:$4 sm:$0xff]   ;;  %s5353_s19 = sshll.u32 %s6789_s15, 4  ;;  %s5354_s19 = int_to_ptr.vmem [resolvable:$true] %s5353_s19 }
  0x71   : > { %3376 = vmatpush1.bf16.msra.mxu0 %v6258_v19  ;;  %v5467_v54 = vcombine.high %v7001_v49, %v7003_v50  ;;  %v5469_v56 = vcombine.high %v7005_v51, %v304_v52  ;;  %v6306_v57 = vld [vmem:[%s6944_s22 + $0xb0] ss:$8 sps:$4 sm:$0xff]   ;;  %v6308_v59 = vld [vmem:[%s6944_s22 + $0xa4] ss:$8 sps:$4 sm:$0xff]   ;;  %v6312_v61 = vld [vmem:[%s6944_s22 + $0xa0] ss:$8 sps:$4 sm:$0xff]   ;;  %v5466_v13 = vcombine.low %v7001_v49, %v7003_v50  ;;  %v5468_v14 = vcombine.low %v7005_v51, %v304_v52  ;;  %p6703_p10 = scmp.lt.s32.totalorder %s5354_s19, %s5354_s19 }
  0x72   : > { %3569 = vmatpush1.bf16.msra.mxu1 %v6259_v20  ;;  %3377 = vmatprep.subr.bf16.mxu0 %v6260_v21  ;;  %v6307_v58 = vld [vmem:[%s6944_s22 + $0x1b0] ss:$8 sps:$4 sm:$0xff]   ;;  %v6310_v60 = vld [vmem:[%s6944_s22 + $0x1a4] ss:$8 sps:$4 sm:$0xff]   ;;  %v6313_v62 = vld [vmem:[%s6944_s22 + $0x1a0] ss:$8 sps:$4 sm:$0xff]  }
  0x73   : > { %3570 = vmatprep.subr.bf16.mxu1 %v6262_v22  ;;  %3399 = vmatprep.mubr.bf16.mxu0 %v5467_v54  ;;  %v6314_v63 = vld [vmem:[%s6944_s22 + $0x94] ss:$8 sps:$4 sm:$0xff]   ;;  %v6318_v1 = vld [vmem:[%s6944_s22 + $0x90] ss:$8 sps:$4 sm:$0xff]   ;;  %v6320_v3 = vld [vmem:[%s6944_s22 + $0x84] ss:$8 sps:$4 sm:$0xff]  }
  0x74   : > { %3592 = vmatprep.mubr.bf16.mxu1 %v5469_v56  ;;  %v6316_v0 = vld [vmem:[%s6944_s22 + $0x194] ss:$8 sps:$4 sm:$0xff]   ;;  %v6319_v2 = vld [vmem:[%s6944_s22 + $0x190] ss:$8 sps:$4 sm:$0xff]   ;;  %v6322_v4 = vld [vmem:[%s6944_s22 + $0x184] ss:$8 sps:$4 sm:$0xff]  }
  0x75   : > { %3378 = vmatpush1.bf16.msra.mxu0 %v6264_v23  ;;  %v6324_v5 = vld [vmem:[%s6944_s22 + $0x80] ss:$8 sps:$4 sm:$0xff]   ;;  %v6328_v7 = vld [vmem:[%s6944_s22 + $0x274] ss:$8 sps:$4 sm:$0xff]   ;;  %v6326_v15 = vld [vmem:[%s6944_s22 + $0x270] ss:$8 sps:$4 sm:$0xff]  }
  0x76   : > { %3571 = vmatpush1.bf16.msra.mxu1 %v6265_v24  ;;  %3379 = vmatprep.subr.bf16.mxu0 %v6266_v25  ;;  %v6325_v6 = vld [vmem:[%s6944_s22 + $0x180] ss:$8 sps:$4 sm:$0xff]   ;;  %v6331_v8 = vld [vmem:[%s6944_s22 + $0x374] ss:$8 sps:$4 sm:$0xff]   ;;  %v6329_v16 = vld [vmem:[%s6944_s22 + $0x370] ss:$8 sps:$4 sm:$0xff]  }
  0x77   : > { %3572 = vmatprep.subr.bf16.mxu1 %v6268_v26  ;;  %v311_v9 = vld [vmem:[#allocation2 + $0x80] sm:$0xff]  ;;  %v312_v11 = vld [vmem:[#allocation2 + $0x88] sm:$0xff]  ;;  %v6350_v49 = vld [vmem:[%s6944_s22 + $0x230] ss:$8 sps:$4 sm:$0xff]   ;;  %s6696_s21 = scalar_lea.vmem %s5354_s19, 4096 }
  0x78   : > { %v319_v10 = vld [vmem:[#allocation2 + $0xc0] sm:$0xff]  ;;  %v320_v12 = vld [vmem:[#allocation2 + $0xc8] sm:$0xff]  ;;  %v6353_v50 = vld [vmem:[%s6944_s22 + $0x330] ss:$8 sps:$4 sm:$0xff]   ;;  %p6697_p2 = scmp.ne.s32.totalorder %s5354_s19, %s6696_s21  ;;  %p6704_p9 = scmp.lt.s32.totalorder %s6696_s21, %s6696_s21 }
  0x79   : > { %3380 = vmatpush1.bf16.msra.mxu0 %v6270_v27  ;;  %v5483_v17 = vcombine.high %v311_v9, %v319_v10  ;;  %v5485_v18 = vcombine.high %v312_v11, %v320_v12  ;;  %v6332_v19 = vld [vmem:[%s6944_s22 + $0x260] ss:$8 sps:$4 sm:$0xff]   ;;  %v6334_v20 = vld [vmem:[%s6944_s22 + $0x264] ss:$8 sps:$4 sm:$0xff]   ;;  %v6340_v27 = vld [vmem:[%s6944_s22 + $0x254] ss:$8 sps:$4 sm:$0xff]  }
  0x7a   : > { %3573 = vmatpush1.bf16.msra.mxu1 %v6271_v28  ;;  %3381 = vmatprep.subr.bf16.mxu0 %v6272_v29  ;;  %v6335_v21 = vld [vmem:[%s6944_s22 + $0x360] ss:$8 sps:$4 sm:$0xff]   ;;  %v6337_v22 = vld [vmem:[%s6944_s22 + $0x364] ss:$8 sps:$4 sm:$0xff]   ;;  %v6343_v28 = vld [vmem:[%s6944_s22 + $0x354] ss:$8 sps:$4 sm:$0xff]   ;;  %v5482_v29 = vcombine.low %v311_v9, %v319_v10  ;;  %p6698_p5 = pnand %p6697_p2, %p6170_p7  ;;  %p6705_p11 = por %p6704_p9, %p6703_p10 }
  0x7b   : > { %3574 = vmatprep.subr.bf16.mxu1 %v6274_v30  ;;  %v327_v23 = vld [vmem:[#allocation2 + $0x100] sm:$0xff]  ;;  %v328_v25 = vld [vmem:[#allocation2 + $0x108] sm:$0xff]  ;;  %v5484_v30 = vcombine.low %v312_v11, %v320_v12  ;;  %v6376_v11 = vld [vmem:[%s6944_s22 + $0x2f4] ss:$8 sps:$4 sm:$0xff]  }
  0x7c   : > { %v335_v24 = vld [vmem:[#allocation2 + $0x140] sm:$0xff]  ;;  %v336_v26 = vld [vmem:[#allocation2 + $0x148] sm:$0xff]  ;;  %v6379_v12 = vld [vmem:[%s6944_s22 + $0x3f4] ss:$8 sps:$4 sm:$0xff]   ;;  %p6699_p8 = pneg %p6698_p5 }
  0x7d   : > { %3382 = vmatpush1.bf16.msra.mxu0 %v6276_v31  ;;  %v5499_v31 = vcombine.high %v327_v23, %v335_v24  ;;  %v6358_v51 = vld [vmem:[%s6944_s22 + $0x224] ss:$8 sps:$4 sm:$0xff]   ;;  %v6368_v9 = vld [vmem:[%s6944_s22 + $0x200] ss:$8 sps:$4 sm:$0xff]  }
  0x7e   : > { %3575 = vmatpush1.bf16.msra.mxu1 %v6277_v32  ;;  %3383 = vmatprep.subr.bf16.mxu0 %v6278_v33  ;;  %v5501_v32 = vcombine.high %v328_v25, %v336_v26  ;;  %v6338_v33 = vld [vmem:[%s6944_s22 + $0x250] ss:$8 sps:$4 sm:$0xff]   ;;  %v6361_v52 = vld [vmem:[%s6944_s22 + $0x324] ss:$8 sps:$4 sm:$0xff]   ;;  %v6371_v10 = vld [vmem:[%s6944_s22 + $0x300] ss:$8 sps:$4 sm:$0xff]   ;;  %p6706_p12 = pnand %p6705_p11, %p6699_p8 }
  0x7f   : > { %3576 = vmatprep.subr.bf16.mxu1 %v6280_v34  ;;  %v6341_v34 = vld [vmem:[%s6944_s22 + $0x350] ss:$8 sps:$4 sm:$0xff]   ;;  %v367_v54 = vld [vmem:[#allocation2 + $0x240] sm:$0xff]  ;;  %v368_v56 = vld [vmem:[#allocation2 + $0x248] sm:$0xff] }
  0x81   : > { %3384 = vmatpush2.bf16.msra.mxu0 %v6282_v35  ;;  %v6346_v35 = vld [vmem:[%s6944_s22 + $0x244] ss:$8 sps:$4 sm:$0xff]  }
  0x82   : > { %3577 = vmatpush2.bf16.msra.mxu1 %v6283_v36  ;;  %3385 = vmatprep.subr.bf16.mxu0 %v6284_v37  ;;  %v6349_v36 = vld [vmem:[%s6944_s22 + $0x344] ss:$8 sps:$4 sm:$0xff]  }
  0x83   : > { %3578 = vmatprep.subr.bf16.mxu1 %v6286_v38  ;;  %v343_v37 = vld [vmem:[#allocation2 + $0x180] sm:$0xff] }
  0x84   : > { %v351_v38 = vld [vmem:[#allocation2 + $0x1c0] sm:$0xff] }
  0x85   : > { %3386 = vmatpush2.bf16.msra.mxu0 %v6288_v39  ;;  %v344_v39 = vld [vmem:[#allocation2 + $0x188] sm:$0xff] }
  0x86   : > { %3579 = vmatpush2.bf16.msra.mxu1 %v6289_v40  ;;  %3387 = vmatprep.subr.bf16.mxu0 %v6290_v41  ;;  %v352_v40 = vld [vmem:[#allocation2 + $0x1c8] sm:$0xff] }
  0x87   : > { %3580 = vmatprep.subr.bf16.mxu1 %v6292_v42  ;;  %v6344_v41 = vld [vmem:[%s6944_s22 + $0x240] ss:$8 sps:$4 sm:$0xff]  }
  0x88   : > { %v6347_v42 = vld [vmem:[%s6944_s22 + $0x340] ss:$8 sps:$4 sm:$0xff]  }
  0x89   : > { %3388 = vmatpush2.bf16.msra.mxu0 %v6294_v43  ;;  %v6352_v43 = vld [vmem:[%s6944_s22 + $0x234] ss:$8 sps:$4 sm:$0xff]  }
  0x8a   : > { %3581 = vmatpush2.bf16.msra.mxu1 %v6295_v44  ;;  %3389 = vmatprep.subr.bf16.mxu0 %v6296_v45  ;;  %v6355_v44 = vld [vmem:[%s6944_s22 + $0x334] ss:$8 sps:$4 sm:$0xff]   ;;  %v5498_v45 = vcombine.low %v327_v23, %v335_v24  ;;  %v392_v23 = vld [vmem:[#allocation2 + $0x308] sm:$0xff] }
  0x8b   : > { %3582 = vmatprep.subr.bf16.mxu1 %v6298_v46  ;;  %v5500_v46 = vcombine.low %v328_v25, %v336_v26  ;;  %v400_v24 = vld [vmem:[#allocation2 + $0x348] sm:$0xff] }
  0x8c   : > { %v6380_v25 = vld [vmem:[%s6944_s22 + $0x2e0] ss:$8 sps:$4 sm:$0xff]  }
  0x8d   : > { %3390 = vmatpush2.bf16.msra.mxu0 %v6300_v47  ;;  %v5515_v47 = vcombine.high %v343_v37, %v351_v38  ;;  %v6383_v26 = vld [vmem:[%s6944_s22 + $0x3e0] ss:$8 sps:$4 sm:$0xff]  }
  0x8e   : > { %3583 = vmatpush2.bf16.msra.mxu1 %v6301_v48  ;;  %3391 = vmatprep.subr.bf16.mxu0 %v6302_v53  ;;  %v5517_v48 = vcombine.high %v344_v39, %v352_v40  ;;  %v359_v53 = vld [vmem:[#allocation2 + $0x200] sm:$0xff] }
  0x8f   : > { %3584 = vmatprep.subr.bf16.mxu1 %v6304_v55  ;;  %v360_v55 = vld [vmem:[#allocation2 + $0x208] sm:$0xff] }
  0x91   : > { %3392 = vmatpush2.bf16.msra.mxu0 %v6306_v57  ;;  %v6356_v57 = vld [vmem:[%s6944_s22 + $0x220] ss:$8 sps:$4 sm:$0xff]  }
  0x92   : > { %3585 = vmatpush2.bf16.msra.mxu1 %v6307_v58  ;;  %3393 = vmatprep.subr.bf16.mxu0 %v6308_v59  ;;  %v6359_v58 = vld [vmem:[%s6944_s22 + $0x320] ss:$8 sps:$4 sm:$0xff]   ;;  %v6364_v59 = vld [vmem:[%s6944_s22 + $0x214] ss:$8 sps:$4 sm:$0xff]  }
  0x93   : > { %3586 = vmatprep.subr.bf16.mxu1 %v6310_v60  ;;  %v6367_v60 = vld [vmem:[%s6944_s22 + $0x314] ss:$8 sps:$4 sm:$0xff]  }
  0x95   : > { %3394 = vmatpush2.bf16.msra.mxu0 %v6312_v61  ;;  %v5514_v61 = vcombine.low %v343_v37, %v351_v38  ;;  %v407_v37 = vld [vmem:[#allocation2 + $0x380] sm:$0xff] }
  0x96   : > { %3587 = vmatpush2.bf16.msra.mxu1 %v6313_v62  ;;  %3395 = vmatprep.subr.bf16.mxu0 %v6314_v63  ;;  %v5516_v62 = vcombine.low %v344_v39, %v352_v40  ;;  %v5531_v63 = vcombine.high %v359_v53, %v367_v54  ;;  %v415_v38 = vld [vmem:[#allocation2 + $0x3c0] sm:$0xff]  ;;  %v408_v39 = vld [vmem:[#allocation2 + $0x388] sm:$0xff] }
  0x97   : > { %3588 = vmatprep.subr.bf16.mxu1 %v6316_v0  ;;  %v5533_v0 = vcombine.high %v360_v55, %v368_v56  ;;  %v416_v40 = vld [vmem:[#allocation2 + $0x3c8] sm:$0xff] }
  0x99   : > { %3396 = vmatpush2.bf16.msra.mxu0 %v6318_v1  ;;  %v6362_v1 = vld [vmem:[%s6944_s22 + $0x210] ss:$8 sps:$4 sm:$0xff]  }
  0x9a   : > { %3589 = vmatpush2.bf16.msra.mxu1 %v6319_v2  ;;  %3397 = vmatprep.subr.bf16.mxu0 %v6320_v3  ;;  %v6365_v2 = vld [vmem:[%s6944_s22 + $0x310] ss:$8 sps:$4 sm:$0xff]   ;;  %v6370_v3 = vld [vmem:[%s6944_s22 + $0x204] ss:$8 sps:$4 sm:$0xff]  }
  0x9b   : > { %3590 = vmatprep.subr.bf16.mxu1 %v6322_v4  ;;  %v6373_v4 = vld [vmem:[%s6944_s22 + $0x304] ss:$8 sps:$4 sm:$0xff]  }
  0x9d   : > { %3398 = vmatpush2.bf16.msra.mxu0 %v6324_v5  ;;  %v375_v5 = vld [vmem:[#allocation2 + $0x280] sm:$0xff] }
  0x9e   : > { %3591 = vmatpush2.bf16.msra.mxu1 %v6325_v6  ;;  %3753 = vmatprep.subr.bf16.mxu0 %v6328_v7  ;;  %v383_v6 = vld [vmem:[#allocation2 + $0x2c0] sm:$0xff]  ;;  %v376_v7 = vld [vmem:[#allocation2 + $0x288] sm:$0xff] }
  0x9f   : > { %3946 = vmatprep.subr.bf16.mxu1 %v6331_v8  ;;  %v384_v8 = vld [vmem:[#allocation2 + $0x2c8] sm:$0xff] }
  0xa0   : > { %3400 = vmatmul.mubr.bf16.vlgmr.msra.gmra.mxu0 %v5466_v13  ;;  %v5530_v13 = vcombine.low %v359_v53, %v367_v54  ;;  %v423_v53 = vld [vmem:[#allocation2 + $0x400] sm:$0xff] }
  0xa1   : > { %3593 = vmatmul.mubr.bf16.vlgmr.msra.gmra.mxu1 %v5468_v14  ;;  %3754 = vmatpush1.bf16.msra.mxu0 %v6326_v15  ;;  %v5532_v14 = vcombine.low %v360_v55, %v368_v56  ;;  %v5547_v15 = vcombine.high %v375_v5, %v383_v6  ;;  %v431_v54 = vld [vmem:[#allocation2 + $0x440] sm:$0xff]  ;;  %v424_v55 = vld [vmem:[#allocation2 + $0x408] sm:$0xff] }
  0xa2   : > { %3947 = vmatpush1.bf16.msra.mxu1 %v6329_v16  ;;  %3409 = vmatprep.mubr.bf16.mxu0 %v5483_v17  ;;  %v5549_v16 = vcombine.high %v376_v7, %v384_v8  ;;  %v6374_v17 = vld [vmem:[%s6944_s22 + $0x2f0] ss:$8 sps:$4 sm:$0xff]   ;;  %v432_v56 = vld [vmem:[#allocation2 + $0x448] sm:$0xff] }
  0xa3   : > { %3602 = vmatprep.mubr.bf16.mxu1 %v5485_v18  ;;  %3755 = vmatprep.subr.bf16.mxu0 %v6334_v20  ;;  %v6377_v18 = vld [vmem:[%s6944_s22 + $0x3f0] ss:$8 sps:$4 sm:$0xff]   ;;  %v6385_v20 = vld [vmem:[%s6944_s22 + $0x3e4] ss:$8 sps:$4 sm:$0xff]  }
  0xa4   : > { %3948 = vmatprep.subr.bf16.mxu1 %v6337_v22  ;;  %v399_v22 = vld [vmem:[#allocation2 + $0x340] sm:$0xff] }
  0xa5   : > { %3756 = vmatpush1.bf16.msra.mxu0 %v6332_v19  ;;  %v6382_v19 = vld [vmem:[%s6944_s22 + $0x2e4] ss:$8 sps:$4 sm:$0xff]  }
  0xa6   : > { %3949 = vmatpush1.bf16.msra.mxu1 %v6335_v21  ;;  %3757 = vmatprep.subr.bf16.mxu0 %v6340_v27  ;;  %v391_v21 = vld [vmem:[#allocation2 + $0x300] sm:$0xff]  ;;  %v6388_v27 = vld [vmem:[%s6944_s22 + $0x2d4] ss:$8 sps:$4 sm:$0xff]  }
  0xa7   : > { %3950 = vmatprep.subr.bf16.mxu1 %v6343_v28  ;;  %v6391_v28 = vld [vmem:[%s6944_s22 + $0x3d4] ss:$8 sps:$4 sm:$0xff]  }
  0xa8   : > { %3410 = vmatmul.mubr.bf16.gmra.mxu0 %v5482_v29  ;;  %v5546_v29 = vcombine.low %v375_v5, %v383_v6  ;;  %v439_v5 = vld [vmem:[#allocation2 + $0x480] sm:$0xff] }
  0xa9   : > { %3603 = vmatmul.mubr.bf16.gmra.mxu1 %v5484_v30  ;;  %3419 = vmatprep.mubr.bf16.mxu0 %v5499_v31  ;;  %v5548_v30 = vcombine.low %v376_v7, %v384_v8  ;;  %v5563_v31 = vcombine.high %v391_v21, %v399_v22  ;;  %v447_v6 = vld [vmem:[#allocation2 + $0x4c0] sm:$0xff]  ;;  %v440_v7 = vld [vmem:[#allocation2 + $0x488] sm:$0xff] }
  0xaa   : > { %3612 = vmatprep.mubr.bf16.mxu1 %v5501_v32  ;;  %3758 = vmatpush1.bf16.msra.mxu0 %v6338_v33  ;;  %v5565_v32 = vcombine.high %v392_v23, %v400_v24  ;;  %v6386_v33 = vld [vmem:[%s6944_s22 + $0x2d0] ss:$8 sps:$4 sm:$0xff]   ;;  %v448_v8 = vld [vmem:[#allocation2 + $0x4c8] sm:$0xff] }
  0xab   : > { %3951 = vmatpush1.bf16.msra.mxu1 %v6341_v34  ;;  %3759 = vmatprep.subr.bf16.mxu0 %v6346_v35  ;;  %v6389_v34 = vld [vmem:[%s6944_s22 + $0x3d0] ss:$8 sps:$4 sm:$0xff]   ;;  %v6394_v35 = vld [vmem:[%s6944_s22 + $0x2c4] ss:$8 sps:$4 sm:$0xff]  }
  0xac   : > { %3952 = vmatprep.subr.bf16.mxu1 %v6349_v36  ;;  %v6397_v36 = vld [vmem:[%s6944_s22 + $0x3c4] ss:$8 sps:$4 sm:$0xff]  }
  0xae   : > { %3760 = vmatpush1.bf16.msra.mxu0 %v6344_v41  ;;  %v6392_v41 = vld [vmem:[%s6944_s22 + $0x2c0] ss:$8 sps:$4 sm:$0xff]  }
  0xaf   : > { %3953 = vmatpush1.bf16.msra.mxu1 %v6347_v42  ;;  %3761 = vmatprep.subr.bf16.mxu0 %v6352_v43  ;;  %v6395_v42 = vld [vmem:[%s6944_s22 + $0x3c0] ss:$8 sps:$4 sm:$0xff]   ;;  %v6400_v43 = vld [vmem:[%s6944_s22 + $0x2b4] ss:$8 sps:$4 sm:$0xff]  }
  0xb0   : > { %3954 = vmatprep.subr.bf16.mxu1 %v6355_v44  ;;  %3420 = vmatmul.mubr.bf16.gmra.mxu0 %v5498_v45  ;;  %v6403_v44 = vld [vmem:[%s6944_s22 + $0x3b4] ss:$8 sps:$4 sm:$0xff]   ;;  %v5562_v45 = vcombine.low %v391_v21, %v399_v22  ;;  %v5610_v21 = vcombine.low %v439_v5, %v447_v6  ;;  %v5612_v22 = vcombine.low %v440_v7, %v448_v8 }
  0xb1   : > { %3613 = vmatmul.mubr.bf16.gmra.mxu1 %v5500_v46  ;;  %3429 = vmatprep.mubr.bf16.mxu0 %v5515_v47  ;;  %v5564_v46 = vcombine.low %v392_v23, %v400_v24  ;;  %v5579_v47 = vcombine.high %v407_v37, %v415_v38 }
  0xb2   : > { %3622 = vmatprep.mubr.bf16.mxu1 %v5517_v48  ;;  %3762 = vmatpush1.bf16.msra.mxu0 %v6350_v49  ;;  %v5581_v48 = vcombine.high %v408_v39, %v416_v40  ;;  %v6398_v49 = vld [vmem:[%s6944_s22 + $0x2b0] ss:$8 sps:$4 sm:$0xff]  }
  0xb3   : > { %3955 = vmatpush1.bf16.msra.mxu1 %v6353_v50  ;;  %3763 = vmatprep.subr.bf16.mxu0 %v6358_v51  ;;  %v6401_v50 = vld [vmem:[%s6944_s22 + $0x3b0] ss:$8 sps:$4 sm:$0xff]   ;;  %v6406_v51 = vld [vmem:[%s6944_s22 + $0x2a4] ss:$8 sps:$4 sm:$0xff]  }
  0xb4   : > { %3956 = vmatprep.subr.bf16.mxu1 %v6361_v52  ;;  %v6409_v52 = vld [vmem:[%s6944_s22 + $0x3a4] ss:$8 sps:$4 sm:$0xff]  }
  0xb6   : > { %3764 = vmatpush1.bf16.msra.mxu0 %v6356_v57  ;;  %v6404_v57 = vld [vmem:[%s6944_s22 + $0x2a0] ss:$8 sps:$4 sm:$0xff]  }
  0xb7   : > { %3957 = vmatpush1.bf16.msra.mxu1 %v6359_v58  ;;  %3765 = vmatprep.subr.bf16.mxu0 %v6364_v59  ;;  %v6407_v58 = vld [vmem:[%s6944_s22 + $0x3a0] ss:$8 sps:$4 sm:$0xff]   ;;  %v6412_v59 = vld [vmem:[%s6944_s22 + $0x294] ss:$8 sps:$4 sm:$0xff]  }
  0xb8   : > { %3958 = vmatprep.subr.bf16.mxu1 %v6367_v60  ;;  %3430 = vmatmul.mubr.bf16.gmra.mxu0 %v5514_v61  ;;  %v6415_v60 = vld [vmem:[%s6944_s22 + $0x394] ss:$8 sps:$4 sm:$0xff]   ;;  %v5578_v61 = vcombine.low %v407_v37, %v415_v38 }
  0xb9   : > { %3623 = vmatmul.mubr.bf16.gmra.mxu1 %v5516_v62  ;;  %3439 = vmatprep.mubr.bf16.mxu0 %v5531_v63  ;;  %v5580_v62 = vcombine.low %v408_v39, %v416_v40  ;;  %v5595_v63 = vcombine.high %v423_v53, %v431_v54 }
  0xba   : > { %3632 = vmatprep.mubr.bf16.mxu1 %v5533_v0  ;;  %3766 = vmatpush1.bf16.msra.mxu0 %v6362_v1  ;;  %v5597_v0 = vcombine.high %v424_v55, %v432_v56  ;;  %v6410_v1 = vld [vmem:[%s6944_s22 + $0x290] ss:$8 sps:$4 sm:$0xff]  }
  0xbb   : > { %3959 = vmatpush1.bf16.msra.mxu1 %v6365_v2  ;;  %3767 = vmatprep.subr.bf16.mxu0 %v6370_v3  ;;  %v6413_v2 = vld [vmem:[%s6944_s22 + $0x390] ss:$8 sps:$4 sm:$0xff]   ;;  %v6418_v3 = vld [vmem:[%s6944_s22 + $0x284] ss:$8 sps:$4 sm:$0xff]  }
  0xbc   : > { %3960 = vmatprep.subr.bf16.mxu1 %v6373_v4  ;;  %v6421_v4 = vld [vmem:[%s6944_s22 + $0x384] ss:$8 sps:$4 sm:$0xff]  }
  0xbe   : > { %3768 = vmatpush1.bf16.msra.mxu0 %v6368_v9  ;;  %v6416_v9 = vld [vmem:[%s6944_s22 + $0x280] ss:$8 sps:$4 sm:$0xff]  }
  0xbf   : > { %3961 = vmatpush1.bf16.msra.mxu1 %v6371_v10  ;;  %3769 = vmatprep.subr.bf16.mxu0 %v6376_v11  ;;  %v6419_v10 = vld [vmem:[%s6944_s22 + $0x380] ss:$8 sps:$4 sm:$0xff]   ;;  %v6424_v11 = vld [vmem:[%s6944_s22 + $0x474] ss:$8 sps:$4 sm:$0xff]  }
  0xc0   : > { %3962 = vmatprep.subr.bf16.mxu1 %v6379_v12  ;;  %3440 = vmatmul.mubr.bf16.gmra.mxu0 %v5530_v13  ;;  %v6427_v12 = vld [vmem:[%s6944_s22 + $0x574] ss:$8 sps:$4 sm:$0xff]   ;;  %v5594_v13 = vcombine.low %v423_v53, %v431_v54 }
  0xc1   : > { %3633 = vmatmul.mubr.bf16.gmra.mxu1 %v5532_v14  ;;  %3449 = vmatprep.mubr.bf16.mxu0 %v5547_v15  ;;  %v5596_v14 = vcombine.low %v424_v55, %v432_v56  ;;  %v5611_v15 = vcombine.high %v439_v5, %v447_v6 }
  0xc2   : > { %3642 = vmatprep.mubr.bf16.mxu1 %v5549_v16  ;;  %3770 = vmatpush2.bf16.msra.mxu0 %v6374_v17  ;;  %v5613_v16 = vcombine.high %v440_v7, %v448_v8  ;;  %v455_v17 = vld [vmem:[#allocation2 + $0x500] sm:$0xff] }
  0xc3   : > { %3963 = vmatpush2.bf16.msra.mxu1 %v6377_v18  ;;  %3771 = vmatprep.subr.bf16.mxu0 %v6382_v19  ;;  %v463_v18 = vld [vmem:[#allocation2 + $0x540] sm:$0xff]  ;;  %v456_v19 = vld [vmem:[#allocation2 + $0x508] sm:$0xff] }
  0xc4   : > { %3964 = vmatprep.subr.bf16.mxu1 %v6385_v20  ;;  %v464_v20 = vld [vmem:[#allocation2 + $0x548] sm:$0xff]  ;;  %v5627_v23 = vcombine.high %v455_v17, %v463_v18 }
  0xc5   : > { %v5629_v24 = vcombine.high %v456_v19, %v464_v20 }
  0xc6   : > { %3772 = vmatpush2.bf16.msra.mxu0 %v6380_v25  ;;  %v471_v25 = vld [vmem:[#allocation2 + $0x580] sm:$0xff] }
  0xc7   : > { %3965 = vmatpush2.bf16.msra.mxu1 %v6383_v26  ;;  %3773 = vmatprep.subr.bf16.mxu0 %v6388_v27  ;;  %v479_v26 = vld [vmem:[#allocation2 + $0x5c0] sm:$0xff]  ;;  %v472_v27 = vld [vmem:[#allocation2 + $0x588] sm:$0xff] }
  0xc8   : > { %3966 = vmatprep.subr.bf16.mxu1 %v6391_v28  ;;  %3450 = vmatmul.mubr.bf16.gmra.mxu0 %v5546_v29  ;;  %v480_v28 = vld [vmem:[#allocation2 + $0x5c8] sm:$0xff]  ;;  %v5626_v29 = vcombine.low %v455_v17, %v463_v18  ;;  %v5642_v37 = vcombine.low %v471_v25, %v479_v26 }
  0xc9   : > { %3643 = vmatmul.mubr.bf16.gmra.mxu1 %v5548_v30  ;;  %3459 = vmatprep.mubr.bf16.mxu0 %v5563_v31  ;;  %v5628_v30 = vcombine.low %v456_v19, %v464_v20  ;;  %v5643_v31 = vcombine.high %v471_v25, %v479_v26  ;;  %v5644_v38 = vcombine.low %v472_v27, %v480_v28  ;;  %v6430_v19 = vld [vmem:[%s6944_s22 + $0x464] ss:$8 sps:$4 sm:$0xff]   ;;  %v330_v25 = vld [vmem:[#allocation2 + $0x118] sm:$0xff] }
  0xca   : > { %3652 = vmatprep.mubr.bf16.mxu1 %v5565_v32  ;;  %3774 = vmatpush2.bf16.msra.mxu0 %v6386_v33  ;;  %v5645_v32 = vcombine.high %v472_v27, %v480_v28  ;;  %v487_v33 = vld [vmem:[#allocation2 + $0x600] sm:$0xff]  ;;  %v338_v26 = vld [vmem:[#allocation2 + $0x158] sm:$0xff] }
  0xcb   : > { %3967 = vmatpush2.bf16.msra.mxu1 %v6389_v34  ;;  %3775 = vmatprep.subr.bf16.mxu0 %v6394_v35  ;;  %v495_v34 = vld [vmem:[#allocation2 + $0x640] sm:$0xff]  ;;  %v488_v35 = vld [vmem:[#allocation2 + $0x608] sm:$0xff]  ;;  %v6436_v27 = vld [vmem:[%s6944_s22 + $0x454] ss:$8 sps:$4 sm:$0xff]  }
  0xcc   : > { %3968 = vmatprep.subr.bf16.mxu1 %v6397_v36  ;;  %v496_v36 = vld [vmem:[#allocation2 + $0x648] sm:$0xff]  ;;  %v5659_v39 = vcombine.high %v487_v33, %v495_v34  ;;  %v6439_v28 = vld [vmem:[%s6944_s22 + $0x554] ss:$8 sps:$4 sm:$0xff]  }
  0xcd   : > { %v5661_v40 = vcombine.high %v488_v35, %v496_v36  ;;  %v6433_v20 = vld [vmem:[%s6944_s22 + $0x564] ss:$8 sps:$4 sm:$0xff]  }
  0xce   : > { %3776 = vmatpush2.bf16.msra.mxu0 %v6392_v41  ;;  %v503_v41 = vld [vmem:[#allocation2 + $0x680] sm:$0xff] }
  0xcf   : > { %3969 = vmatpush2.bf16.msra.mxu1 %v6395_v42  ;;  %3777 = vmatprep.subr.bf16.mxu0 %v6400_v43  ;;  %v511_v42 = vld [vmem:[#allocation2 + $0x6c0] sm:$0xff]  ;;  %v504_v43 = vld [vmem:[#allocation2 + $0x688] sm:$0xff] }
  0xd0   : > { %3970 = vmatprep.subr.bf16.mxu1 %v6403_v44  ;;  %3460 = vmatmul.mubr.bf16.gmra.mxu0 %v5562_v45  ;;  %v512_v44 = vld [vmem:[#allocation2 + $0x6c8] sm:$0xff]  ;;  %v5658_v45 = vcombine.low %v487_v33, %v495_v34  ;;  %v5674_v53 = vcombine.low %v503_v41, %v511_v42  ;;  %v6434_v33 = vld [vmem:[%s6944_s22 + $0x450] ss:$8 sps:$4 sm:$0xff]  }
  0xd1   : > { %3653 = vmatmul.mubr.bf16.gmra.mxu1 %v5564_v46  ;;  %3469 = vmatprep.mubr.bf16.mxu0 %v5579_v47  ;;  %v5660_v46 = vcombine.low %v488_v35, %v496_v36  ;;  %v5675_v47 = vcombine.high %v503_v41, %v511_v42  ;;  %v5676_v54 = vcombine.low %v504_v43, %v512_v44  ;;  %v6437_v34 = vld [vmem:[%s6944_s22 + $0x550] ss:$8 sps:$4 sm:$0xff]   ;;  %v6442_v35 = vld [vmem:[%s6944_s22 + $0x444] ss:$8 sps:$4 sm:$0xff]   ;;  %v6440_v41 = vld [vmem:[%s6944_s22 + $0x440] ss:$8 sps:$4 sm:$0xff]  }
  0xd2   : > { %3662 = vmatprep.mubr.bf16.mxu1 %v5581_v48  ;;  %3778 = vmatpush2.bf16.msra.mxu0 %v6398_v49  ;;  %v5677_v48 = vcombine.high %v504_v43, %v512_v44  ;;  %v519_v49 = vld [vmem:[#allocation2 + $0x700] sm:$0xff]  ;;  %v6448_v43 = vld [vmem:[%s6944_s22 + $0x434] ss:$8 sps:$4 sm:$0xff]  }
  0xd3   : > { %3971 = vmatpush2.bf16.msra.mxu1 %v6401_v50  ;;  %3779 = vmatprep.subr.bf16.mxu0 %v6406_v51  ;;  %v527_v50 = vld [vmem:[#allocation2 + $0x740] sm:$0xff]  ;;  %v520_v51 = vld [vmem:[#allocation2 + $0x708] sm:$0xff]  ;;  %v6451_v44 = vld [vmem:[%s6944_s22 + $0x534] ss:$8 sps:$4 sm:$0xff]  }
  0xd4   : > { %3972 = vmatprep.subr.bf16.mxu1 %v6409_v52  ;;  %v528_v52 = vld [vmem:[#allocation2 + $0x748] sm:$0xff]  ;;  %v5691_v55 = vcombine.high %v519_v49, %v527_v50 }
  0xd5   : > { %v5693_v56 = vcombine.high %v520_v51, %v528_v52  ;;  %v6445_v36 = vld [vmem:[%s6944_s22 + $0x544] ss:$8 sps:$4 sm:$0xff]   ;;  %v6443_v42 = vld [vmem:[%s6944_s22 + $0x540] ss:$8 sps:$4 sm:$0xff]  }
  0xd6   : > { %3780 = vmatpush2.bf16.msra.mxu0 %v6404_v57  ;;  %v535_v57 = vld [vmem:[#allocation2 + $0x780] sm:$0xff] }
  0xd7   : > { %3973 = vmatpush2.bf16.msra.mxu1 %v6407_v58  ;;  %3781 = vmatprep.subr.bf16.mxu0 %v6412_v59  ;;  %v543_v58 = vld [vmem:[#allocation2 + $0x7c0] sm:$0xff]  ;;  %v536_v59 = vld [vmem:[#allocation2 + $0x788] sm:$0xff] }
  0xd8   : > { %3974 = vmatprep.subr.bf16.mxu1 %v6415_v60  ;;  %3470 = vmatmul.mubr.bf16.gmra.mxu0 %v5578_v61  ;;  %v544_v60 = vld [vmem:[#allocation2 + $0x7c8] sm:$0xff]  ;;  %v5690_v61 = vcombine.low %v519_v49, %v527_v50  ;;  %v5706_v5 = vcombine.low %v535_v57, %v543_v58  ;;  %v6446_v49 = vld [vmem:[%s6944_s22 + $0x430] ss:$8 sps:$4 sm:$0xff]  }
  0xd9   : > { %3663 = vmatmul.mubr.bf16.gmra.mxu1 %v5580_v62  ;;  %3479 = vmatprep.mubr.bf16.mxu0 %v5595_v63  ;;  %v5692_v62 = vcombine.low %v520_v51, %v528_v52  ;;  %v5707_v63 = vcombine.high %v535_v57, %v543_v58  ;;  %v5708_v6 = vcombine.low %v536_v59, %v544_v60  ;;  %v6449_v50 = vld [vmem:[%s6944_s22 + $0x530] ss:$8 sps:$4 sm:$0xff]   ;;  %v6454_v51 = vld [vmem:[%s6944_s22 + $0x424] ss:$8 sps:$4 sm:$0xff]   ;;  %v6452_v57 = vld [vmem:[%s6944_s22 + $0x420] ss:$8 sps:$4 sm:$0xff]  }
  0xda   : > { %3672 = vmatprep.mubr.bf16.mxu1 %v5597_v0  ;;  %3782 = vmatpush2.bf16.msra.mxu0 %v6410_v1  ;;  %v5709_v0 = vcombine.high %v536_v59, %v544_v60  ;;  %v297_v1 = vld [vmem:[#allocation2 + $0x10] sm:$0xff]  ;;  %v6457_v52 = vld [vmem:[%s6944_s22 + $0x524] ss:$8 sps:$4 sm:$0xff]   ;;  %v6455_v58 = vld [vmem:[%s6944_s22 + $0x520] ss:$8 sps:$4 sm:$0xff]  }
  0xdb   : > { %3975 = vmatpush2.bf16.msra.mxu1 %v6413_v2  ;;  %3783 = vmatprep.subr.bf16.mxu0 %v6418_v3  ;;  %v305_v2 = vld [vmem:[#allocation2 + $0x50] sm:$0xff]  ;;  %v298_v3 = vld [vmem:[#allocation2 + $0x18] sm:$0xff] }
  0xdc   : > { %3976 = vmatprep.subr.bf16.mxu1 %v6421_v4  ;;  %v306_v4 = vld [vmem:[#allocation2 + $0x58] sm:$0xff]  ;;  %v5471_v7 = vcombine.high %v297_v1, %v305_v2 }
  0xdd   : > { %v5473_v8 = vcombine.high %v298_v3, %v306_v4  ;;  %v6460_v59 = vld [vmem:[%s6944_s22 + $0x414] ss:$8 sps:$4 sm:$0xff]  }
  0xde   : > { %3784 = vmatpush2.bf16.msra.mxu0 %v6416_v9  ;;  %v313_v9 = vld [vmem:[#allocation2 + $0x90] sm:$0xff] }
  0xdf   : > { %3977 = vmatpush2.bf16.msra.mxu1 %v6419_v10  ;;  %4139 = vmatprep.subr.bf16.mxu0 %v6424_v11  ;;  %v321_v10 = vld [vmem:[#allocation2 + $0xd0] sm:$0xff]  ;;  %v314_v11 = vld [vmem:[#allocation2 + $0x98] sm:$0xff] }
  0xe0   : > { %4332 = vmatprep.subr.bf16.mxu1 %v6427_v12  ;;  %3480 = vmatmul.mubr.bf16.gmra.mxu0 %v5594_v13  ;;  %v322_v12 = vld [vmem:[#allocation2 + $0xd8] sm:$0xff]  ;;  %v5470_v13 = vcombine.low %v297_v1, %v305_v2  ;;  %v5487_v17 = vcombine.high %v313_v9, %v321_v10 }
  0xe1   : > { %3673 = vmatmul.mubr.bf16.gmra.mxu1 %v5596_v14  ;;  %3489 = vmatprep.mubr.bf16.mxu0 %v5611_v15  ;;  %v5472_v14 = vcombine.low %v298_v3, %v306_v4  ;;  %v6422_v15 = vld [vmem:[%s6944_s22 + $0x470] ss:$8 sps:$4 sm:$0xff]   ;;  %v5489_v18 = vcombine.high %v314_v11, %v322_v12  ;;  %v6463_v60 = vld [vmem:[%s6944_s22 + $0x514] ss:$8 sps:$4 sm:$0xff]   ;;  %v6466_v3 = vld [vmem:[%s6944_s22 + $0x404] ss:$8 sps:$4 sm:$0xff]  }
  0xe2   : > { %3682 = vmatprep.mubr.bf16.mxu1 %v5613_v16  ;;  %v6425_v16 = vld [vmem:[%s6944_s22 + $0x570] ss:$8 sps:$4 sm:$0xff]   ;;  %v6469_v4 = vld [vmem:[%s6944_s22 + $0x504] ss:$8 sps:$4 sm:$0xff]  }
  0xe3   : > { %v6458_v1 = vld [vmem:[%s6944_s22 + $0x410] ss:$8 sps:$4 sm:$0xff]  }
  0xe4   : > { %v6461_v2 = vld [vmem:[%s6944_s22 + $0x510] ss:$8 sps:$4 sm:$0xff]  }
  0xe8   : > { %3490 = vmatmul.mubr.bf16.gmra.mxu0 %v5610_v21  ;;  %v6428_v21 = vld [vmem:[%s6944_s22 + $0x460] ss:$8 sps:$4 sm:$0xff]  }
  0xe9   : > { %3683 = vmatmul.mubr.bf16.gmra.mxu1 %v5612_v22  ;;  %3499 = vmatprep.mubr.bf16.mxu0 %v5627_v23  ;;  %v6431_v22 = vld [vmem:[%s6944_s22 + $0x560] ss:$8 sps:$4 sm:$0xff]   ;;  %v329_v23 = vld [vmem:[#allocation2 + $0x110] sm:$0xff] }
  0xea   : > { %3692 = vmatprep.mubr.bf16.mxu1 %v5629_v24  ;;  %v337_v24 = vld [vmem:[#allocation2 + $0x150] sm:$0xff] }
  0xf0   : > { %3500 = vmatmul.mubr.bf16.gmra.mxu0 %v5626_v29  ;;  %v5486_v29 = vcombine.low %v313_v9, %v321_v10  ;;  %v6464_v9 = vld [vmem:[%s6944_s22 + $0x400] ss:$8 sps:$4 sm:$0xff]  }
  0xf1   : > { %3693 = vmatmul.mubr.bf16.gmra.mxu1 %v5628_v30  ;;  %3509 = vmatprep.mubr.bf16.mxu0 %v5643_v31  ;;  %v5488_v30 = vcombine.low %v314_v11, %v322_v12  ;;  %v5503_v31 = vcombine.high %v329_v23, %v337_v24  ;;  %v6467_v10 = vld [vmem:[%s6944_s22 + $0x500] ss:$8 sps:$4 sm:$0xff]   ;;  %v6472_v11 = vld [vmem:[%s6944_s22 + $0x4f4] ss:$8 sps:$4 sm:$0xff]  }
  0xf2   : > { %3702 = vmatprep.mubr.bf16.mxu1 %v5645_v32  ;;  %v5505_v32 = vcombine.high %v330_v25, %v338_v26  ;;  %v6475_v12 = vld [vmem:[%s6944_s22 + $0x5f4] ss:$8 sps:$4 sm:$0xff]  }
  0xf8   : > { %3510 = vmatmul.mubr.bf16.gmra.mxu0 %v5642_v37  ;;  %v345_v37 = vld [vmem:[#allocation2 + $0x190] sm:$0xff] }
  0xf9   : > { %3703 = vmatmul.mubr.bf16.gmra.mxu1 %v5644_v38  ;;  %3519 = vmatprep.mubr.bf16.mxu0 %v5659_v39  ;;  %v353_v38 = vld [vmem:[#allocation2 + $0x1d0] sm:$0xff]  ;;  %v346_v39 = vld [vmem:[#allocation2 + $0x198] sm:$0xff] }
  0xfa   : > { %3712 = vmatprep.mubr.bf16.mxu1 %v5661_v40  ;;  %v354_v40 = vld [vmem:[#allocation2 + $0x1d8] sm:$0xff] }
 0x100   : > { %3520 = vmatmul.mubr.bf16.gmra.mxu0 %v5658_v45  ;;  %v5502_v45 = vcombine.low %v329_v23, %v337_v24  ;;  %v394_v23 = vld [vmem:[#allocation2 + $0x318] sm:$0xff] }
 0x101   : > { %3713 = vmatmul.mubr.bf16.gmra.mxu1 %v5660_v46  ;;  %3529 = vmatprep.mubr.bf16.mxu0 %v5675_v47  ;;  %v5504_v46 = vcombine.low %v330_v25, %v338_v26  ;;  %v5519_v47 = vcombine.high %v345_v37, %v353_v38  ;;  %v402_v24 = vld [vmem:[#allocation2 + $0x358] sm:$0xff]  ;;  %v6476_v25 = vld [vmem:[%s6944_s22 + $0x4e0] ss:$8 sps:$4 sm:$0xff]  }
 0x102   : > { %3722 = vmatprep.mubr.bf16.mxu1 %v5677_v48  ;;  %v5521_v48 = vcombine.high %v346_v39, %v354_v40  ;;  %v6479_v26 = vld [vmem:[%s6944_s22 + $0x5e0] ss:$8 sps:$4 sm:$0xff]  }
 0x108   : > { %3530 = vmatmul.mubr.bf16.gmra.mxu0 %v5674_v53  ;;  %v361_v53 = vld [vmem:[#allocation2 + $0x210] sm:$0xff] }
 0x109   : > { %3723 = vmatmul.mubr.bf16.gmra.mxu1 %v5676_v54  ;;  %3539 = vmatprep.mubr.bf16.mxu0 %v5691_v55  ;;  %v369_v54 = vld [vmem:[#allocation2 + $0x250] sm:$0xff]  ;;  %v362_v55 = vld [vmem:[#allocation2 + $0x218] sm:$0xff] }
 0x10a   : > { %3732 = vmatprep.mubr.bf16.mxu1 %v5693_v56  ;;  %v370_v56 = vld [vmem:[#allocation2 + $0x258] sm:$0xff] }
 0x110   : > { %3540 = vmatmul.mubr.bf16.gmra.mxu0 %v5690_v61  ;;  %v5518_v61 = vcombine.low %v345_v37, %v353_v38  ;;  %v409_v37 = vld [vmem:[#allocation2 + $0x390] sm:$0xff] }
 0x111   : > { %3733 = vmatmul.mubr.bf16.gmra.mxu1 %v5692_v62  ;;  %3549 = vmatprep.mubr.bf16.mxu0 %v5707_v63  ;;  %v5520_v62 = vcombine.low %v346_v39, %v354_v40  ;;  %v5535_v63 = vcombine.high %v361_v53, %v369_v54  ;;  %v417_v38 = vld [vmem:[#allocation2 + $0x3d0] sm:$0xff]  ;;  %v410_v39 = vld [vmem:[#allocation2 + $0x398] sm:$0xff] }
 0x112   : > { %3742 = vmatprep.mubr.bf16.mxu1 %v5709_v0  ;;  %v5537_v0 = vcombine.high %v362_v55, %v370_v56  ;;  %v418_v40 = vld [vmem:[#allocation2 + $0x3d8] sm:$0xff] }
 0x118   : > { %3550 = vmatmul.mubr.bf16.gmra.mxu0 %v5706_v5  ;;  %v377_v5 = vld [vmem:[#allocation2 + $0x290] sm:$0xff] }
 0x119   : > { %3743 = vmatmul.mubr.bf16.gmra.mxu1 %v5708_v6  ;;  %3785 = vmatprep.mubr.bf16.mxu0 %v5471_v7  ;;  %v385_v6 = vld [vmem:[#allocation2 + $0x2d0] sm:$0xff]  ;;  %v378_v7 = vld [vmem:[#allocation2 + $0x298] sm:$0xff] }
 0x11a   : > { %3978 = vmatprep.mubr.bf16.mxu1 %v5473_v8  ;;  %v386_v8 = vld [vmem:[#allocation2 + $0x2d8] sm:$0xff] }
 0x120   : > { %3786 = vmatmul.mubr.bf16.vlgmr.msra.gmra.mxu0 %v5470_v13  ;;  %v5534_v13 = vcombine.low %v361_v53, %v369_v54  ;;  %v425_v53 = vld [vmem:[#allocation2 + $0x410] sm:$0xff] }
 0x121   : > { %3979 = vmatmul.mubr.bf16.vlgmr.msra.gmra.mxu1 %v5472_v14  ;;  %4140 = vmatpush1.bf16.msra.mxu0 %v6422_v15  ;;  %v5536_v14 = vcombine.low %v362_v55, %v370_v56  ;;  %v5551_v15 = vcombine.high %v377_v5, %v385_v6  ;;  %v433_v54 = vld [vmem:[#allocation2 + $0x450] sm:$0xff]  ;;  %v426_v55 = vld [vmem:[#allocation2 + $0x418] sm:$0xff] }
 0x122   : > { %4333 = vmatpush1.bf16.msra.mxu1 %v6425_v16  ;;  %3795 = vmatprep.mubr.bf16.mxu0 %v5487_v17  ;;  %v5553_v16 = vcombine.high %v378_v7, %v386_v8  ;;  %v6470_v17 = vld [vmem:[%s6944_s22 + $0x4f0] ss:$8 sps:$4 sm:$0xff]  }
 0x123   : > { %3988 = vmatprep.mubr.bf16.mxu1 %v5489_v18  ;;  %4141 = vmatprep.subr.bf16.mxu0 %v6430_v19  ;;  %v6473_v18 = vld [vmem:[%s6944_s22 + $0x5f0] ss:$8 sps:$4 sm:$0xff]   ;;  %v6478_v19 = vld [vmem:[%s6944_s22 + $0x4e4] ss:$8 sps:$4 sm:$0xff]  }
 0x124   : > { %4334 = vmatprep.subr.bf16.mxu1 %v6433_v20  ;;  %v6481_v20 = vld [vmem:[%s6944_s22 + $0x5e4] ss:$8 sps:$4 sm:$0xff]   ;;  %v434_v56 = vld [vmem:[#allocation2 + $0x458] sm:$0xff] }
 0x125   : > { %4142 = vmatpush1.bf16.msra.mxu0 %v6428_v21  ;;  %v393_v21 = vld [vmem:[#allocation2 + $0x310] sm:$0xff] }
 0x126   : > { %4335 = vmatpush1.bf16.msra.mxu1 %v6431_v22  ;;  %4143 = vmatprep.subr.bf16.mxu0 %v6436_v27  ;;  %v401_v22 = vld [vmem:[#allocation2 + $0x350] sm:$0xff] }
 0x127   : > { %4336 = vmatprep.subr.bf16.mxu1 %v6439_v28  ;;  %v6484_v27 = vld [vmem:[%s6944_s22 + $0x4d4] ss:$8 sps:$4 sm:$0xff]  }
 0x128   : > { %3796 = vmatmul.mubr.bf16.gmra.mxu0 %v5486_v29  ;;  %v6487_v28 = vld [vmem:[%s6944_s22 + $0x5d4] ss:$8 sps:$4 sm:$0xff]   ;;  %v5550_v29 = vcombine.low %v377_v5, %v385_v6 }
 0x129   : > { %3989 = vmatmul.mubr.bf16.gmra.mxu1 %v5488_v30  ;;  %3805 = vmatprep.mubr.bf16.mxu0 %v5503_v31  ;;  %v5552_v30 = vcombine.low %v378_v7, %v386_v8  ;;  %v5567_v31 = vcombine.high %v393_v21, %v401_v22  ;;  %v441_v5 = vld [vmem:[#allocation2 + $0x490] sm:$0xff]  ;;  %v442_v7 = vld [vmem:[#allocation2 + $0x498] sm:$0xff] }
 0x12a   : > { %3998 = vmatprep.mubr.bf16.mxu1 %v5505_v32  ;;  %4144 = vmatpush1.bf16.msra.mxu0 %v6434_v33  ;;  %v5569_v32 = vcombine.high %v394_v23, %v402_v24  ;;  %v6482_v33 = vld [vmem:[%s6944_s22 + $0x4d0] ss:$8 sps:$4 sm:$0xff]  }
 0x12b   : > { %4337 = vmatpush1.bf16.msra.mxu1 %v6437_v34  ;;  %4145 = vmatprep.subr.bf16.mxu0 %v6442_v35  ;;  %v6485_v34 = vld [vmem:[%s6944_s22 + $0x5d0] ss:$8 sps:$4 sm:$0xff]   ;;  %v6490_v35 = vld [vmem:[%s6944_s22 + $0x4c4] ss:$8 sps:$4 sm:$0xff]  }
 0x12c   : > { %4338 = vmatprep.subr.bf16.mxu1 %v6445_v36  ;;  %v6493_v36 = vld [vmem:[%s6944_s22 + $0x5c4] ss:$8 sps:$4 sm:$0xff]   ;;  %v449_v6 = vld [vmem:[#allocation2 + $0x4d0] sm:$0xff]  ;;  %v450_v8 = vld [vmem:[#allocation2 + $0x4d8] sm:$0xff] }
 0x12e   : > { %4146 = vmatpush1.bf16.msra.mxu0 %v6440_v41  ;;  %v6488_v41 = vld [vmem:[%s6944_s22 + $0x4c0] ss:$8 sps:$4 sm:$0xff]  }
 0x12f   : > { %4339 = vmatpush1.bf16.msra.mxu1 %v6443_v42  ;;  %4147 = vmatprep.subr.bf16.mxu0 %v6448_v43  ;;  %v6491_v42 = vld [vmem:[%s6944_s22 + $0x5c0] ss:$8 sps:$4 sm:$0xff]   ;;  %v6496_v43 = vld [vmem:[%s6944_s22 + $0x4b4] ss:$8 sps:$4 sm:$0xff]  }
 0x130   : > { %4340 = vmatprep.subr.bf16.mxu1 %v6451_v44  ;;  %3806 = vmatmul.mubr.bf16.gmra.mxu0 %v5502_v45  ;;  %v6499_v44 = vld [vmem:[%s6944_s22 + $0x5b4] ss:$8 sps:$4 sm:$0xff]   ;;  %v5566_v45 = vcombine.low %v393_v21, %v401_v22 }
 0x131   : > { %3999 = vmatmul.mubr.bf16.gmra.mxu1 %v5504_v46  ;;  %3815 = vmatprep.mubr.bf16.mxu0 %v5519_v47  ;;  %v5568_v46 = vcombine.low %v394_v23, %v402_v24  ;;  %v5583_v47 = vcombine.high %v409_v37, %v417_v38  ;;  %v465_v23 = vld [vmem:[#allocation2 + $0x550] sm:$0xff]  ;;  %v458_v24 = vld [vmem:[#allocation2 + $0x518] sm:$0xff] }
 0x132   : > { %4008 = vmatprep.mubr.bf16.mxu1 %v5521_v48  ;;  %4148 = vmatpush1.bf16.msra.mxu0 %v6446_v49  ;;  %v5585_v48 = vcombine.high %v410_v39, %v418_v40  ;;  %v6494_v49 = vld [vmem:[%s6944_s22 + $0x4b0] ss:$8 sps:$4 sm:$0xff]  }
 0x133   : > { %4341 = vmatpush1.bf16.msra.mxu1 %v6449_v50  ;;  %4149 = vmatprep.subr.bf16.mxu0 %v6454_v51  ;;  %v6497_v50 = vld [vmem:[%s6944_s22 + $0x5b0] ss:$8 sps:$4 sm:$0xff]   ;;  %v6502_v51 = vld [vmem:[%s6944_s22 + $0x4a4] ss:$8 sps:$4 sm:$0xff]  }
 0x134   : > { %4342 = vmatprep.subr.bf16.mxu1 %v6457_v52  ;;  %v6505_v52 = vld [vmem:[%s6944_s22 + $0x5a4] ss:$8 sps:$4 sm:$0xff]  }
 0x136   : > { %4150 = vmatpush1.bf16.msra.mxu0 %v6452_v57  ;;  %v6500_v57 = vld [vmem:[%s6944_s22 + $0x4a0] ss:$8 sps:$4 sm:$0xff]  }
 0x137   : > { %4343 = vmatpush1.bf16.msra.mxu1 %v6455_v58  ;;  %4151 = vmatprep.subr.bf16.mxu0 %v6460_v59  ;;  %v6503_v58 = vld [vmem:[%s6944_s22 + $0x5a0] ss:$8 sps:$4 sm:$0xff]   ;;  %v6508_v59 = vld [vmem:[%s6944_s22 + $0x494] ss:$8 sps:$4 sm:$0xff]  }
 0x138   : > { %4344 = vmatprep.subr.bf16.mxu1 %v6463_v60  ;;  %3816 = vmatmul.mubr.bf16.gmra.mxu0 %v5518_v61  ;;  %v6511_v60 = vld [vmem:[%s6944_s22 + $0x594] ss:$8 sps:$4 sm:$0xff]   ;;  %v5582_v61 = vcombine.low %v409_v37, %v417_v38 }
 0x139   : > { %4009 = vmatmul.mubr.bf16.gmra.mxu1 %v5520_v62  ;;  %3825 = vmatprep.mubr.bf16.mxu0 %v5535_v63  ;;  %v5584_v62 = vcombine.low %v410_v39, %v418_v40  ;;  %v5599_v63 = vcombine.high %v425_v53, %v433_v54  ;;  %v473_v40 = vld [vmem:[#allocation2 + $0x590] sm:$0xff] }
 0x13a   : > { %4018 = vmatprep.mubr.bf16.mxu1 %v5537_v0  ;;  %4152 = vmatpush1.bf16.msra.mxu0 %v6458_v1  ;;  %v5601_v0 = vcombine.high %v426_v55, %v434_v56  ;;  %v6506_v1 = vld [vmem:[%s6944_s22 + $0x490] ss:$8 sps:$4 sm:$0xff]  }
 0x13b   : > { %4345 = vmatpush1.bf16.msra.mxu1 %v6461_v2  ;;  %4153 = vmatprep.subr.bf16.mxu0 %v6466_v3  ;;  %v6509_v2 = vld [vmem:[%s6944_s22 + $0x590] ss:$8 sps:$4 sm:$0xff]   ;;  %v6514_v3 = vld [vmem:[%s6944_s22 + $0x484] ss:$8 sps:$4 sm:$0xff]  }
 0x13c   : > { %4346 = vmatprep.subr.bf16.mxu1 %v6469_v4  ;;  %v6517_v4 = vld [vmem:[%s6944_s22 + $0x584] ss:$8 sps:$4 sm:$0xff]  }
 0x13e   : > { %4154 = vmatpush1.bf16.msra.mxu0 %v6464_v9  ;;  %v6512_v9 = vld [vmem:[%s6944_s22 + $0x480] ss:$8 sps:$4 sm:$0xff]  }
 0x13f   : > { %4347 = vmatpush1.bf16.msra.mxu1 %v6467_v10  ;;  %4155 = vmatprep.subr.bf16.mxu0 %v6472_v11  ;;  %v6515_v10 = vld [vmem:[%s6944_s22 + $0x580] ss:$8 sps:$4 sm:$0xff]   ;;  %v6520_v11 = vld [vmem:[%s6944_s22 + $0x674] ss:$8 sps:$4 sm:$0xff]  }
 0x140   : > { %4348 = vmatprep.subr.bf16.mxu1 %v6475_v12  ;;  %3826 = vmatmul.mubr.bf16.gmra.mxu0 %v5534_v13  ;;  %v6523_v12 = vld [vmem:[%s6944_s22 + $0x774] ss:$8 sps:$4 sm:$0xff]   ;;  %v5598_v13 = vcombine.low %v425_v53, %v433_v54 }
 0x141   : > { %4019 = vmatmul.mubr.bf16.gmra.mxu1 %v5536_v14  ;;  %3835 = vmatprep.mubr.bf16.mxu0 %v5551_v15  ;;  %v5600_v14 = vcombine.low %v426_v55, %v434_v56  ;;  %v5615_v15 = vcombine.high %v441_v5, %v449_v6 }
 0x142   : > { %4028 = vmatprep.mubr.bf16.mxu1 %v5553_v16  ;;  %4156 = vmatpush2.bf16.msra.mxu0 %v6470_v17  ;;  %v5617_v16 = vcombine.high %v442_v7, %v450_v8 }
 0x143   : > { %4349 = vmatpush2.bf16.msra.mxu1 %v6473_v18  ;;  %4157 = vmatprep.subr.bf16.mxu0 %v6478_v19 }
 0x144   : > { %4350 = vmatprep.subr.bf16.mxu1 %v6481_v20  ;;  %v457_v20 = vld [vmem:[#allocation2 + $0x510] sm:$0xff] }
 0x146   : > { %4158 = vmatpush2.bf16.msra.mxu0 %v6476_v25  ;;  %v466_v25 = vld [vmem:[#allocation2 + $0x558] sm:$0xff] }
 0x147   : > { %4351 = vmatpush2.bf16.msra.mxu1 %v6479_v26  ;;  %4159 = vmatprep.subr.bf16.mxu0 %v6484_v27 }
 0x148   : > { %4352 = vmatprep.subr.bf16.mxu1 %v6487_v28  ;;  %3836 = vmatmul.mubr.bf16.gmra.mxu0 %v5550_v29  ;;  %v5614_v29 = vcombine.low %v441_v5, %v449_v6 }
 0x149   : > { %4029 = vmatmul.mubr.bf16.gmra.mxu1 %v5552_v30  ;;  %3845 = vmatprep.mubr.bf16.mxu0 %v5567_v31  ;;  %v5616_v30 = vcombine.low %v442_v7, %v450_v8 }
 0x14a   : > { %4038 = vmatprep.mubr.bf16.mxu1 %v5569_v32  ;;  %4160 = vmatpush2.bf16.msra.mxu0 %v6482_v33  ;;  %v5631_v32 = vcombine.high %v457_v20, %v465_v23  ;;  %v5633_v33 = vcombine.high %v458_v24, %v466_v25 }
 0x14b   : > { %4353 = vmatpush2.bf16.msra.mxu1 %v6485_v34  ;;  %4161 = vmatprep.subr.bf16.mxu0 %v6490_v35 }
 0x14c   : > { %4354 = vmatprep.subr.bf16.mxu1 %v6493_v36 }
 0x14e   : > { %4162 = vmatpush2.bf16.msra.mxu0 %v6488_v41 }
 0x14f   : > { %4355 = vmatpush2.bf16.msra.mxu1 %v6491_v42  ;;  %4163 = vmatprep.subr.bf16.mxu0 %v6496_v43  ;;  %v481_v43 = vld [vmem:[#allocation2 + $0x5d0] sm:$0xff] }
 0x150   : > { %4356 = vmatprep.subr.bf16.mxu1 %v6499_v44  ;;  %3846 = vmatmul.mubr.bf16.gmra.mxu0 %v5566_v45  ;;  %v474_v44 = vld [vmem:[#allocation2 + $0x598] sm:$0xff]  ;;  %v5646_v5 = vcombine.low %v473_v40, %v481_v43 }
 0x151   : > { %4039 = vmatmul.mubr.bf16.gmra.mxu1 %v5568_v46  ;;  %3855 = vmatprep.mubr.bf16.mxu0 %v5583_v47  ;;  %v482_v45 = vld [vmem:[#allocation2 + $0x5d8] sm:$0xff] }
 0x152   : > { %4048 = vmatprep.mubr.bf16.mxu1 %v5585_v48  ;;  %4164 = vmatpush2.bf16.msra.mxu0 %v6494_v49  ;;  %v5630_v49 = vcombine.low %v457_v20, %v465_v23  ;;  %v5649_v53 = vcombine.high %v474_v44, %v482_v45  ;;  %v5648_v6 = vcombine.low %v474_v44, %v482_v45  ;;  %v513_v20 = vld [vmem:[#allocation2 + $0x6d0] sm:$0xff]  ;;  %v522_v45 = vld [vmem:[#allocation2 + $0x718] sm:$0xff] }
 0x153   : > { %4357 = vmatpush2.bf16.msra.mxu1 %v6497_v50  ;;  %4165 = vmatprep.subr.bf16.mxu0 %v6502_v51  ;;  %v5632_v50 = vcombine.low %v458_v24, %v466_v25  ;;  %v529_v44 = vld [vmem:[#allocation2 + $0x750] sm:$0xff] }
 0x154   : > { %4358 = vmatprep.subr.bf16.mxu1 %v6505_v52  ;;  %v5647_v52 = vcombine.high %v473_v40, %v481_v43 }
 0x156   : > { %4166 = vmatpush2.bf16.msra.mxu0 %v6500_v57 }
 0x157   : > { %4359 = vmatpush2.bf16.msra.mxu1 %v6503_v58  ;;  %4167 = vmatprep.subr.bf16.mxu0 %v6508_v59 }
 0x158   : > { %4360 = vmatprep.subr.bf16.mxu1 %v6511_v60  ;;  %3856 = vmatmul.mubr.bf16.gmra.mxu0 %v5582_v61  ;;  %v489_v60 = vld [vmem:[#allocation2 + $0x610] sm:$0xff] }
 0x159   : > { %4049 = vmatmul.mubr.bf16.gmra.mxu1 %v5584_v62  ;;  %3865 = vmatprep.mubr.bf16.mxu0 %v5599_v63  ;;  %v497_v63 = vld [vmem:[#allocation2 + $0x650] sm:$0xff] }
 0x15a   : > { %4058 = vmatprep.mubr.bf16.mxu1 %v5601_v0  ;;  %4168 = vmatpush2.bf16.msra.mxu0 %v6506_v1  ;;  %v490_v0 = vld [vmem:[#allocation2 + $0x618] sm:$0xff]  ;;  %v5663_v8 = vcombine.high %v489_v60, %v497_v63 }
 0x15b   : > { %4361 = vmatpush2.bf16.msra.mxu1 %v6509_v2  ;;  %4169 = vmatprep.subr.bf16.mxu0 %v6514_v3  ;;  %v498_v1 = vld [vmem:[#allocation2 + $0x658] sm:$0xff] }
 0x15c   : > { %4362 = vmatprep.subr.bf16.mxu1 %v6517_v4 }
 0x15e   : > { %4170 = vmatpush2.bf16.msra.mxu0 %v6512_v9  ;;  %v5665_v9 = vcombine.high %v490_v0, %v498_v1 }
 0x15f   : > { %4363 = vmatpush2.bf16.msra.mxu1 %v6515_v10  ;;  %4525 = vmatprep.subr.bf16.mxu0 %v6520_v11 }
 0x160   : > { %4718 = vmatprep.subr.bf16.mxu1 %v6523_v12  ;;  %v3401_v17 = vpop.f32.mrf.mxu0  ;;  %3866 = vmatmul.mubr.bf16.gmra.mxu0 %v5598_v13 }
 0x161   : > { %v3594_v18 = vpop.f32.mrf.mxu1  ;;  %4059 = vmatmul.mubr.bf16.gmra.mxu1 %v5600_v14  ;;  %3875 = vmatprep.mubr.bf16.mxu0 %v5615_v15 }
 0x162   : > { %v7159_v19 = vadd.f32 %v3594_v18, %v3401_v17  ;;  %4068 = vmatprep.mubr.bf16.mxu1 %v5617_v16  ;;  %v3403_v21 = vpop.f32.mrf.mxu0  ;;  %v505_v16 = vld [vmem:[#allocation2 + $0x690] sm:$0xff] }
 0x163   : > { %v3596_v22 = vpop.f32.mrf.mxu1 }
 0x164   : > { %v7161_v26 = vadd.f32 %v3596_v22, %v3403_v21  ;;  %v3405_v27 = vpop.f32.mrf.mxu0  ;;  %v506_v21 = vld [vmem:[#allocation2 + $0x698] sm:$0xff] }
 0x165   : > { %v3598_v28 = vpop.f32.mrf.mxu1  ;;  %v514_v22 = vld [vmem:[#allocation2 + $0x6d8] sm:$0xff] }
 0x166   : > { %v7163_v31 = vadd.f32 %v3598_v28, %v3405_v27  ;;  %v3407_v34 = vpop.f32.mrf.mxu0  ;;  %v5662_v27 = vcombine.low %v489_v60, %v497_v63  ;;  %v5664_v28 = vcombine.low %v490_v0, %v498_v1  ;;  %v537_v1 = vld [vmem:[#allocation2 + $0x790] sm:$0xff] }
 0x167   : > { %v3600_v35 = vpop.f32.mrf.mxu1 }
 0x168   : > { %v7165_v36 = vadd.f32 %v3600_v35, %v3407_v34  ;;  %v3411_v37 = vpop.f32.mrf.mxu0  ;;  %3876 = vmatmul.mubr.bf16.gmra.mxu0 %v5614_v29 }
 0x169   : > { %v3604_v38 = vpop.f32.mrf.mxu1  ;;  %4069 = vmatmul.mubr.bf16.gmra.mxu1 %v5616_v30  ;;  %3885 = vmatprep.mubr.bf16.mxu0 %v5631_v32  ;;  %v5679_v30 = vcombine.high %v505_v16, %v513_v20  ;;  %v5681_v32 = vcombine.high %v506_v21, %v514_v22 }
 0x16a   : > { %v7167_v39 = vadd.f32 %v3604_v38, %v3411_v37  ;;  %4078 = vmatprep.mubr.bf16.mxu1 %v5633_v33  ;;  %v3413_v41 = vpop.f32.mrf.mxu0 }
 0x16b   : > { %v3606_v42 = vpop.f32.mrf.mxu1 }
 0x16c   : > { %v7169_v46 = vadd.f32 %v3606_v42, %v3413_v41  ;;  %v3415_v47 = vpop.f32.mrf.mxu0  ;;  %v521_v41 = vld [vmem:[#allocation2 + $0x710] sm:$0xff] }
 0x16d   : > { %v3608_v48 = vpop.f32.mrf.mxu1 }
 0x16e   : > { %v7171_v51 = vadd.f32 %v3608_v48, %v3415_v47  ;;  %v3417_v54 = vpop.f32.mrf.mxu0  ;;  %v530_v47 = vld [vmem:[#allocation2 + $0x758] sm:$0xff] }
 0x16f   : > { %v3610_v55 = vpop.f32.mrf.mxu1 }
 0x170   : > { %v7173_v56 = vadd.f32 %v3610_v55, %v3417_v54  ;;  %v3421_v57 = vpop.f32.mrf.mxu0  ;;  %3886 = vmatmul.mubr.bf16.gmra.mxu0 %v5630_v49  ;;  %v5695_v55 = vcombine.high %v521_v41, %v529_v44 }
 0x171   : > { %v3614_v58 = vpop.f32.mrf.mxu1  ;;  %4079 = vmatmul.mubr.bf16.gmra.mxu1 %v5632_v50  ;;  %3895 = vmatprep.mubr.bf16.mxu0 %v5647_v52  ;;  %v5678_v52 = vcombine.low %v505_v16, %v513_v20 }
 0x172   : > { %v7175_v59 = vadd.f32 %v3614_v58, %v3421_v57  ;;  %4088 = vmatprep.mubr.bf16.mxu1 %v5649_v53  ;;  %v3423_v61 = vpop.f32.mrf.mxu0  ;;  %v5680_v53 = vcombine.low %v506_v21, %v514_v22  ;;  %v5697_v57 = vcombine.high %v522_v45, %v530_v47 }
 0x173   : > { %v3616_v62 = vpop.f32.mrf.mxu1 }
 0x174   : > { %v7177_v2 = vadd.f32 %v3616_v62, %v3423_v61  ;;  %v3425_v3 = vpop.f32.mrf.mxu0 }
 0x175   : > { %v3618_v4 = vpop.f32.mrf.mxu1 }
 0x176   : > { %v7179_v7 = vadd.f32 %v3618_v4, %v3425_v3  ;;  %v3427_v10 = vpop.f32.mrf.mxu0 }
 0x177   : > { %v3620_v11 = vpop.f32.mrf.mxu1 }
 0x178   : > { %v7181_v12 = vadd.f32 %v3620_v11, %v3427_v10  ;;  %v3431_v13 = vpop.f32.mrf.mxu0  ;;  %3896 = vmatmul.mubr.bf16.gmra.mxu0 %v5646_v5  ;;  %v545_v5 = vld [vmem:[#allocation2 + $0x7d0] sm:$0xff] }
 0x179   : > { %v3624_v14 = vpop.f32.mrf.mxu1  ;;  %4089 = vmatmul.mubr.bf16.gmra.mxu1 %v5648_v6  ;;  %3905 = vmatprep.mubr.bf16.mxu0 %v5663_v8  ;;  %v538_v6 = vld [vmem:[#allocation2 + $0x798] sm:$0xff] }
 0x17a   : > { %v7183_v15 = vadd.f32 %v3624_v14, %v3431_v13  ;;  %4098 = vmatprep.mubr.bf16.mxu1 %v5665_v9  ;;  %v3433_v17 = vpop.f32.mrf.mxu0  ;;  %v546_v8 = vld [vmem:[#allocation2 + $0x7d8] sm:$0xff]  ;;  %v5694_v13 = vcombine.low %v521_v41, %v529_v44  ;;  %v5696_v14 = vcombine.low %v522_v45, %v530_v47 }
 0x17b   : > { %v3626_v18 = vpop.f32.mrf.mxu1  ;;  %v5712_v44 = vcombine.low %v538_v6, %v546_v8 }
 0x17c   : > { %v7185_v23 = vadd.f32 %v3626_v18, %v3433_v17  ;;  %v3435_v24 = vpop.f32.mrf.mxu0  ;;  %v5711_v17 = vcombine.high %v537_v1, %v545_v5  ;;  %v5713_v18 = vcombine.high %v538_v6, %v546_v8 }
 0x17d   : > { %v3628_v25 = vpop.f32.mrf.mxu1 }
 0x17e   : > { %v7187_v29 = vadd.f32 %v3628_v25, %v3435_v24  ;;  %v3437_v33 = vpop.f32.mrf.mxu0 }
 0x17f   : > { %v3630_v34 = vpop.f32.mrf.mxu1 }
 0x180   : > { %v7189_v35 = vadd.f32 %v3630_v34, %v3437_v33  ;;  %v3441_v37 = vpop.f32.mrf.mxu0  ;;  %3906 = vmatmul.mubr.bf16.gmra.mxu0 %v5662_v27  ;;  %v307_v33 = vld [vmem:[#allocation2 + $0x60] sm:$0xff]  ;;  %v300_v34 = vld [vmem:[#allocation2 + $0x28] sm:$0xff] }
 0x181   : > { %v3634_v38 = vpop.f32.mrf.mxu1  ;;  %4099 = vmatmul.mubr.bf16.gmra.mxu1 %v5664_v28  ;;  %3915 = vmatprep.mubr.bf16.mxu0 %v5679_v30  ;;  %v299_v28 = vld [vmem:[#allocation2 + $0x20] sm:$0xff] }
 0x182   : > { %v7191_v40 = vadd.f32 %v3634_v38, %v3441_v37  ;;  %4108 = vmatprep.mubr.bf16.mxu1 %v5681_v32  ;;  %v3443_v42 = vpop.f32.mrf.mxu0  ;;  %v308_v37 = vld [vmem:[#allocation2 + $0x68] sm:$0xff]  ;;  %v5475_v47 = vcombine.high %v299_v28, %v307_v33 }
 0x183   : > { %v3636_v43 = vpop.f32.mrf.mxu1 }
 0x184   : > { %v7193_v48 = vadd.f32 %v3636_v43, %v3443_v42  ;;  %v3445_v49 = vpop.f32.mrf.mxu0  ;;  %v5710_v43 = vcombine.low %v537_v1, %v545_v5  ;;  %v324_v5 = vld [vmem:[#allocation2 + $0xe8] sm:$0xff] }
 0x185   : > { %v3638_v50 = vpop.f32.mrf.mxu1 }
 0x186   : > { %v7195_v54 = vadd.f32 %v3638_v50, %v3445_v49  ;;  %v3447_v58 = vpop.f32.mrf.mxu0  ;;  %v5477_v49 = vcombine.high %v300_v34, %v308_v37 }
 0x187   : > { %v3640_v60 = vpop.f32.mrf.mxu1 }
 0x188   : > { %v7197_v61 = vadd.f32 %v3640_v60, %v3447_v58  ;;  %v3451_v62 = vpop.f32.mrf.mxu0  ;;  %3916 = vmatmul.mubr.bf16.gmra.mxu0 %v5678_v52 }
 0x189   : > { %v3644_v63 = vpop.f32.mrf.mxu1  ;;  %4109 = vmatmul.mubr.bf16.gmra.mxu1 %v5680_v53  ;;  %3925 = vmatprep.mubr.bf16.mxu0 %v5695_v55 }
 0x18a   : > { %v7199_v0 = vadd.f32 %v3644_v63, %v3451_v62  ;;  %4118 = vmatprep.mubr.bf16.mxu1 %v5697_v57  ;;  %v3453_v3 = vpop.f32.mrf.mxu0  ;;  %v315_v63 = vld [vmem:[#allocation2 + $0xa0] sm:$0xff] }
 0x18b   : > { %v3646_v4 = vpop.f32.mrf.mxu1 }
 0x18c   : > { %v7201_v9 = vadd.f32 %v3646_v4, %v3453_v3  ;;  %v3455_v10 = vpop.f32.mrf.mxu0  ;;  %v323_v3 = vld [vmem:[#allocation2 + $0xe0] sm:$0xff]  ;;  %v316_v4 = vld [vmem:[#allocation2 + $0xa8] sm:$0xff] }
 0x18d   : > { %v3648_v11 = vpop.f32.mrf.mxu1 }
 0x18e   : > { %v7203_v16 = vadd.f32 %v3648_v11, %v3455_v10  ;;  %v3457_v20 = vpop.f32.mrf.mxu0  ;;  %v5474_v10 = vcombine.low %v299_v28, %v307_v33  ;;  %v5476_v11 = vcombine.low %v300_v34, %v308_v37  ;;  %v6524_v28 = vld [vmem:[%s6944_s22 + $0x660] ss:$8 sps:$4 sm:$0xff]  }
 0x18f   : > { %v3650_v21 = vpop.f32.mrf.mxu1  ;;  %v6527_v33 = vld [vmem:[%s6944_s22 + $0x760] ss:$8 sps:$4 sm:$0xff]  }
 0x190   : > { %v7205_v22 = vadd.f32 %v3650_v21, %v3457_v20  ;;  %v3461_v24 = vpop.f32.mrf.mxu0  ;;  %3926 = vmatmul.mubr.bf16.gmra.mxu0 %v5694_v13  ;;  %v5491_v21 = vcombine.high %v315_v63, %v323_v3  ;;  %v7231_v37 = vld [vmem:[#allocation2 + $0x120] sm:$0xff] }
 0x191   : > { %v3654_v25 = vpop.f32.mrf.mxu1  ;;  %4119 = vmatmul.mubr.bf16.gmra.mxu1 %v5696_v14  ;;  %3935 = vmatprep.mubr.bf16.mxu0 %v5711_v17  ;;  %v6518_v14 = vld [vmem:[%s6944_s22 + $0x670] ss:$8 sps:$4 sm:$0xff]  }
 0x192   : > { %v7207_v27 = vadd.f32 %v3654_v25, %v3461_v24  ;;  %4128 = vmatprep.mubr.bf16.mxu1 %v5713_v18  ;;  %v3463_v30 = vpop.f32.mrf.mxu0  ;;  %v6521_v17 = vld [vmem:[%s6944_s22 + $0x770] ss:$8 sps:$4 sm:$0xff]   ;;  %v5493_v24 = vcombine.high %v316_v4, %v324_v5 }
 0x193   : > { %v3656_v32 = vpop.f32.mrf.mxu1 }
 0x194   : > { %v7209_v38 = vadd.f32 %v3656_v32, %v3463_v30  ;;  %v3465_v41 = vpop.f32.mrf.mxu0  ;;  %v6526_v30 = vld [vmem:[%s6944_s22 + $0x664] ss:$8 sps:$4 sm:$0xff]  }
 0x195   : > { %v3658_v42 = vpop.f32.mrf.mxu1  ;;  %v6529_v32 = vld [vmem:[%s6944_s22 + $0x764] ss:$8 sps:$4 sm:$0xff]  }
 0x196   : > { %v7211_v45 = vadd.f32 %v3658_v42, %v3465_v41  ;;  %v3467_v50 = vpop.f32.mrf.mxu0 }
 0x197   : > { %v3660_v52 = vpop.f32.mrf.mxu1 }
 0x198   : > { %v7213_v53 = vadd.f32 %v3660_v52, %v3467_v50  ;;  %v3471_v55 = vpop.f32.mrf.mxu0  ;;  %3936 = vmatmul.mubr.bf16.gmra.mxu0 %v5710_v43  ;;  %v7233_v43 = vld [vmem:[#allocation2 + $0x160] sm:$0xff]  ;;  %v7237_v50 = vld [vmem:[#allocation2 + $0x168] sm:$0xff]  ;;  %v6532_v52 = vld [vmem:[%s6944_s22 + $0x654] ss:$8 sps:$4 sm:$0xff]  }
 0x199   : > { %v3664_v57 = vpop.f32.mrf.mxu1  ;;  %4129 = vmatmul.mubr.bf16.gmra.mxu1 %v5712_v44  ;;  %4171 = vmatprep.mubr.bf16.mxu0 %v5475_v47  ;;  %v7235_v44 = vld [vmem:[#allocation2 + $0x128] sm:$0xff] }
 0x19a   : > { %v7215_v58 = vadd.f32 %v3664_v57, %v3471_v55  ;;  %4364 = vmatprep.mubr.bf16.mxu1 %v5477_v49  ;;  %v3473_v60 = vpop.f32.mrf.mxu0  ;;  %v6535_v55 = vld [vmem:[%s6944_s22 + $0x754] ss:$8 sps:$4 sm:$0xff]  }
 0x19b   : > { %v3666_v62 = vpop.f32.mrf.mxu1 }
 0x19c   : > { %v7217_v1 = vadd.f32 %v3666_v62, %v3473_v60  ;;  %v3475_v6 = vpop.f32.mrf.mxu0 }
 0x19d   : > { %v3668_v8 = vpop.f32.mrf.mxu1 }
 0x19e   : > { %v7219_v13 = vadd.f32 %v3668_v8, %v3475_v6  ;;  %v3477_v18 = vpop.f32.mrf.mxu0  ;;  %v5490_v6 = vcombine.low %v315_v63, %v323_v3  ;;  %v5492_v8 = vcombine.low %v316_v4, %v324_v5  ;;  %v6538_v63 = vld [vmem:[%s6944_s22 + $0x644] ss:$8 sps:$4 sm:$0xff]  }
 0x19f   : > { %v3670_v20 = vpop.f32.mrf.mxu1  ;;  %v6541_v3 = vld [vmem:[%s6944_s22 + $0x744] ss:$8 sps:$4 sm:$0xff]  }
 0x1a0   : > { %v7223_v25 = vadd.f32 %v3670_v20, %v3477_v18  ;;  %v3481_v41 = vpop.f32.mrf.mxu0  ;;  %4172 = vmatmul.mubr.bf16.vlgmr.msra.gmra.mxu0 %v5474_v10  ;;  %v6530_v20 = vld [vmem:[%s6944_s22 + $0x650] ss:$8 sps:$4 sm:$0xff]  }
 0x1a1   : > { %v3674_v42 = vpop.f32.mrf.mxu1  ;;  %4365 = vmatmul.mubr.bf16.vlgmr.msra.gmra.mxu1 %v5476_v11  ;;  %4526 = vmatpush1.bf16.msra.mxu0 %v6518_v14  ;;  %v5507_v11 = vcombine.high %v7231_v37, %v7233_v43  ;;  %v5509_v14 = vcombine.high %v7235_v44, %v7237_v50 }
 0x1a2   : > { %v7229_v34 = vadd.f32 %v3674_v42, %v3481_v41  ;;  %4719 = vmatpush1.bf16.msra.mxu1 %v6521_v17  ;;  %v3483_v47 = vpop.f32.mrf.mxu0  ;;  %4181 = vmatprep.mubr.bf16.mxu0 %v5491_v21  ;;  %v6533_v21 = vld [vmem:[%s6944_s22 + $0x750] ss:$8 sps:$4 sm:$0xff]   ;;  %v7259_v41 = vld [vmem:[#allocation2 + $0x1e0] sm:$0xff]  ;;  %v7261_v42 = vld [vmem:[#allocation2 + $0x1a8] sm:$0xff] }
 0x1a3   : > { %v3676_v49 = vpop.f32.mrf.mxu1  ;;  %4374 = vmatprep.mubr.bf16.mxu1 %v5493_v24  ;;  %4527 = vmatprep.subr.bf16.mxu0 %v6526_v30 }
 0x1a4   : > { %v7241_v57 = vadd.f32 %v3676_v49, %v3483_v47  ;;  %4720 = vmatprep.subr.bf16.mxu1 %v6529_v32  ;;  %v3485_v60 = vpop.f32.mrf.mxu0  ;;  %v7257_v32 = vld [vmem:[#allocation2 + $0x1a0] sm:$0xff]  ;;  %v7263_v47 = vld [vmem:[#allocation2 + $0x1e8] sm:$0xff] }
 0x1a5   : > { %v3678_v62 = vpop.f32.mrf.mxu1  ;;  %4528 = vmatpush1.bf16.msra.mxu0 %v6524_v28  ;;  %v6536_v49 = vld [vmem:[%s6944_s22 + $0x640] ss:$8 sps:$4 sm:$0xff]  }
 0x1a6   : > { %v7243_v10 = vadd.f32 %v3678_v62, %v3485_v60  ;;  %4721 = vmatpush1.bf16.msra.mxu1 %v6527_v33  ;;  %v3487_v17 = vpop.f32.mrf.mxu0  ;;  %4529 = vmatprep.subr.bf16.mxu0 %v6532_v52  ;;  %v6539_v52 = vld [vmem:[%s6944_s22 + $0x740] ss:$8 sps:$4 sm:$0xff]   ;;  %v6544_v60 = vld [vmem:[%s6944_s22 + $0x634] ss:$8 sps:$4 sm:$0xff]  }
 0x1a7   : > { %v3680_v18 = vpop.f32.mrf.mxu1  ;;  %4722 = vmatprep.subr.bf16.mxu1 %v6535_v55  ;;  %v6547_v62 = vld [vmem:[%s6944_s22 + $0x734] ss:$8 sps:$4 sm:$0xff]  }
 0x1a8   : > { %v7251_v24 = vadd.f32 %v3680_v18, %v3487_v17  ;;  %v3491_v4 = vpop.f32.mrf.mxu0  ;;  %4182 = vmatmul.mubr.bf16.gmra.mxu0 %v5490_v6  ;;  %v5523_v18 = vcombine.high %v7257_v32, %v7259_v41 }
 0x1a9   : > { %v3684_v5 = vpop.f32.mrf.mxu1  ;;  %4375 = vmatmul.mubr.bf16.gmra.mxu1 %v5492_v8  ;;  %4191 = vmatprep.mubr.bf16.mxu0 %v5507_v11  ;;  %v5506_v11 = vcombine.low %v7231_v37, %v7233_v43  ;;  %v6550_v37 = vld [vmem:[%s6944_s22 + $0x624] ss:$8 sps:$4 sm:$0xff]  }
 0x1aa   : > { %v7255_v30 = vadd.f32 %v3684_v5, %v3491_v4  ;;  %4384 = vmatprep.mubr.bf16.mxu1 %v5509_v14  ;;  %v3493_v28 = vpop.f32.mrf.mxu0  ;;  %4530 = vmatpush1.bf16.msra.mxu0 %v6530_v20  ;;  %v5508_v14 = vcombine.low %v7235_v44, %v7237_v50  ;;  %v5525_v20 = vcombine.high %v7261_v42, %v7263_v47  ;;  %v6545_v4 = vld [vmem:[%s6944_s22 + $0x730] ss:$8 sps:$4 sm:$0xff]   ;;  %v6553_v43 = vld [vmem:[%s6944_s22 + $0x724] ss:$8 sps:$4 sm:$0xff]  }
 0x1ab   : > { %v3686_v33 = vpop.f32.mrf.mxu1  ;;  %4723 = vmatpush1.bf16.msra.mxu1 %v6533_v21  ;;  %4531 = vmatprep.subr.bf16.mxu0 %v6538_v63 }
 0x1ac   : > { %v7267_v55 = vadd.f32 %v3686_v33, %v3493_v28  ;;  %4724 = vmatprep.subr.bf16.mxu1 %v6541_v3  ;;  %v3495_v6 = vpop.f32.mrf.mxu0  ;;  %v6542_v3 = vld [vmem:[%s6944_s22 + $0x630] ss:$8 sps:$4 sm:$0xff]   ;;  %v7289_v33 = vld [vmem:[#allocation2 + $0x220] sm:$0xff] }
 0x1ad   : > { %v3688_v8 = vpop.f32.mrf.mxu1 }
 0x1ae   : > { %v7275_v17 = vadd.f32 %v3688_v8, %v3495_v6  ;;  %v3497_v21 = vpop.f32.mrf.mxu0  ;;  %4532 = vmatpush1.bf16.msra.mxu0 %v6536_v49  ;;  %v7291_v49 = vld [vmem:[#allocation2 + $0x260] sm:$0xff]  ;;  %v7295_v6 = vld [vmem:[#allocation2 + $0x268] sm:$0xff] }
 0x1af   : > { %v3690_v63 = vpop.f32.mrf.mxu1  ;;  %4725 = vmatpush1.bf16.msra.mxu1 %v6539_v52  ;;  %4533 = vmatprep.subr.bf16.mxu0 %v6544_v60  ;;  %v7293_v52 = vld [vmem:[#allocation2 + $0x228] sm:$0xff] }
 0x1b0   : > { %v7283_v5 = vadd.f32 %v3690_v63, %v3497_v21  ;;  %4726 = vmatprep.subr.bf16.mxu1 %v6547_v62  ;;  %v3501_v44 = vpop.f32.mrf.mxu0  ;;  %4192 = vmatmul.mubr.bf16.gmra.mxu0 %v5506_v11  ;;  %v6548_v8 = vld [vmem:[%s6944_s22 + $0x620] ss:$8 sps:$4 sm:$0xff]  }
 0x1b1   : > { %v3694_v50 = vpop.f32.mrf.mxu1  ;;  %4385 = vmatmul.mubr.bf16.gmra.mxu1 %v5508_v14  ;;  %4201 = vmatprep.mubr.bf16.mxu0 %v5523_v18  ;;  %v6551_v11 = vld [vmem:[%s6944_s22 + $0x720] ss:$8 sps:$4 sm:$0xff]   ;;  %v6556_v18 = vld [vmem:[%s6944_s22 + $0x614] ss:$8 sps:$4 sm:$0xff]  }
 0x1b2   : > { %8075 = vst [vmem:[#allocation12_spill] sm:$0xff] %v7283_v5  ;;  %v7287_v28 = vadd.f32 %v3694_v50, %v3501_v44  ;;  %4394 = vmatprep.mubr.bf16.mxu1 %v5525_v20  ;;  %v3503_v60 = vpop.f32.mrf.mxu0  ;;  %4534 = vmatpush1.bf16.msra.mxu0 %v6542_v3  ;;  %v6559_v20 = vld [vmem:[%s6944_s22 + $0x714] ss:$8 sps:$4 sm:$0xff]   ;;  %v5522_v44 = vcombine.low %v7257_v32, %v7259_v41  ;;  %v6562_v32 = vld [vmem:[%s6944_s22 + $0x604] ss:$8 sps:$4 sm:$0xff]  }
 0x1b3   : > { %v3696_v62 = vpop.f32.mrf.mxu1  ;;  %4727 = vmatpush1.bf16.msra.mxu1 %v6545_v4  ;;  %4535 = vmatprep.subr.bf16.mxu0 %v6550_v37  ;;  %v5524_v3 = vcombine.low %v7261_v42, %v7263_v47  ;;  %v5539_v50 = vcombine.high %v7289_v33, %v7291_v49  ;;  %v5541_v37 = vcombine.high %v7293_v52, %v7295_v6  ;;  %v6565_v41 = vld [vmem:[%s6944_s22 + $0x704] ss:$8 sps:$4 sm:$0xff]  }
 0x1b4   : > { %8076 = vst [vmem:[#allocation13_spill] sm:$0xff] %v7287_v28  ;;  %v7299_v14 = vadd.f32 %v3696_v62, %v3503_v60  ;;  %4728 = vmatprep.subr.bf16.mxu1 %v6553_v43  ;;  %v3505_v21 = vpop.f32.mrf.mxu0  ;;  %v6554_v62 = vld [vmem:[%s6944_s22 + $0x610] ss:$8 sps:$4 sm:$0xff]  }
 0x1b5   : > { %v3698_v63 = vpop.f32.mrf.mxu1 }
 0x1b6   : > { %8077 = vst [vmem:[#allocation14_spill] sm:$0xff] %v7299_v14  ;;  %v7307_v4 = vadd.f32 %v3698_v63, %v3505_v21  ;;  %v3507_v43 = vpop.f32.mrf.mxu0  ;;  %4536 = vmatpush1.bf16.msra.mxu0 %v6548_v8  ;;  %v6557_v14 = vld [vmem:[%s6944_s22 + $0x710] ss:$8 sps:$4 sm:$0xff]   ;;  %v7321_v8 = vld [vmem:[#allocation2 + $0x2a0] sm:$0xff] }
 0x1b7   : > { %v3700_v60 = vpop.f32.mrf.mxu1  ;;  %4729 = vmatpush1.bf16.msra.mxu1 %v6551_v11  ;;  %4537 = vmatprep.subr.bf16.mxu0 %v6556_v18  ;;  %v7323_v11 = vld [vmem:[#allocation2 + $0x2e0] sm:$0xff]  ;;  %v7325_v18 = vld [vmem:[#allocation2 + $0x2a8] sm:$0xff] }
 0x1b8   : > { %8078 = vst [vmem:[#allocation15_spill] sm:$0xff] %v7307_v4  ;;  %v7315_v28 = vadd.f32 %v3700_v60, %v3507_v43  ;;  %4730 = vmatprep.subr.bf16.mxu1 %v6559_v20  ;;  %v3511_v42 = vpop.f32.mrf.mxu0  ;;  %4202 = vmatmul.mubr.bf16.gmra.mxu0 %v5522_v44  ;;  %v7327_v43 = vld [vmem:[#allocation2 + $0x2e8] sm:$0xff] }
 0x1b9   : > { %v3704_v47 = vpop.f32.mrf.mxu1  ;;  %4395 = vmatmul.mubr.bf16.gmra.mxu1 %v5524_v3  ;;  %4211 = vmatprep.mubr.bf16.mxu0 %v5539_v50  ;;  %v6560_v44 = vld [vmem:[%s6944_s22 + $0x600] ss:$8 sps:$4 sm:$0xff]   ;;  %v6568_v50 = vld [vmem:[%s6944_s22 + $0x6f4] ss:$8 sps:$4 sm:$0xff]  }
 0x1ba   : > { %8079 = vst [vmem:[#allocation16_spill] sm:$0xff] %v7315_v28  ;;  %v7319_v21 = vadd.f32 %v3704_v47, %v3511_v42  ;;  %4404 = vmatprep.mubr.bf16.mxu1 %v5541_v37  ;;  %v3513_v20 = vpop.f32.mrf.mxu0  ;;  %4538 = vmatpush1.bf16.msra.mxu0 %v6554_v62  ;;  %v6563_v3 = vld [vmem:[%s6944_s22 + $0x700] ss:$8 sps:$4 sm:$0xff]   ;;  %v6571_v37 = vld [vmem:[%s6944_s22 + $0x7f4] ss:$8 sps:$4 sm:$0xff]  }
 0x1bb   : > { %v3706_v63 = vpop.f32.mrf.mxu1  ;;  %4731 = vmatpush1.bf16.msra.mxu1 %v6557_v14  ;;  %4539 = vmatprep.subr.bf16.mxu0 %v6562_v32  ;;  %v5540_v14 = vcombine.low %v7293_v52, %v7295_v6  ;;  %v5557_v32 = vcombine.high %v7325_v18, %v7327_v43  ;;  %v6569_v28 = vld [vmem:[%s6944_s22 + $0x7f0] ss:$8 sps:$4 sm:$0xff]  }
 0x1bc   : > { %8080 = vst [vmem:[#allocation17_spill] sm:$0xff] %v7319_v21  ;;  %v7331_v60 = vadd.f32 %v3706_v63, %v3513_v20  ;;  %4732 = vmatprep.subr.bf16.mxu1 %v6565_v41  ;;  %v3515_v42 = vpop.f32.mrf.mxu0  ;;  %v5538_v21 = vcombine.low %v7289_v33, %v7291_v49  ;;  %v5555_v20 = vcombine.high %v7321_v8, %v7323_v11  ;;  %v6574_v33 = vld [vmem:[%s6944_s22 + $0x6e4] ss:$8 sps:$4 sm:$0xff]  }
 0x1bd   : > { %v3708_v47 = vpop.f32.mrf.mxu1  ;;  %v6577_v49 = vld [vmem:[%s6944_s22 + $0x7e4] ss:$8 sps:$4 sm:$0xff]  }
 0x1be   : > { %8081 = vst [vmem:[#allocation18_spill] sm:$0xff] %v7331_v60  ;;  %v7339_v62 = vadd.f32 %v3708_v47, %v3515_v42  ;;  %v3517_v41 = vpop.f32.mrf.mxu0  ;;  %4540 = vmatpush1.bf16.msra.mxu0 %v6560_v44  ;;  %v6566_v60 = vld [vmem:[%s6944_s22 + $0x6f0] ss:$8 sps:$4 sm:$0xff]   ;;  %v7353_v44 = vld [vmem:[#allocation2 + $0x320] sm:$0xff] }
 0x1bf   : > { %v3710_v63 = vpop.f32.mrf.mxu1  ;;  %4733 = vmatpush1.bf16.msra.mxu1 %v6563_v3  ;;  %4541 = vmatprep.subr.bf16.mxu0 %v6568_v50  ;;  %v7355_v3 = vld [vmem:[#allocation2 + $0x360] sm:$0xff]  ;;  %v7357_v50 = vld [vmem:[#allocation2 + $0x328] sm:$0xff] }
 0x1c0   : > { %8082 = vst [vmem:[#allocation19_spill] sm:$0xff] %v7339_v62  ;;  %v7347_v4 = vadd.f32 %v3710_v63, %v3517_v41  ;;  %4734 = vmatprep.subr.bf16.mxu1 %v6571_v37  ;;  %v3521_v52 = vpop.f32.mrf.mxu0  ;;  %4212 = vmatmul.mubr.bf16.gmra.mxu0 %v5538_v21  ;;  %v7359_v41 = vld [vmem:[#allocation2 + $0x368] sm:$0xff] }
 0x1c1   : > { %v3714_v6 = vpop.f32.mrf.mxu1  ;;  %4405 = vmatmul.mubr.bf16.gmra.mxu1 %v5540_v14  ;;  %4221 = vmatprep.mubr.bf16.mxu0 %v5555_v20  ;;  %v6572_v21 = vld [vmem:[%s6944_s22 + $0x6e0] ss:$8 sps:$4 sm:$0xff]   ;;  %v6580_v20 = vld [vmem:[%s6944_s22 + $0x6d4] ss:$8 sps:$4 sm:$0xff]  }
 0x1c2   : > { %8083 = vst [vmem:[#allocation20_spill] sm:$0xff] %v7347_v4  ;;  %v7351_v42 = vadd.f32 %v3714_v6, %v3521_v52  ;;  %4414 = vmatprep.mubr.bf16.mxu1 %v5557_v32  ;;  %v3523_v37 = vpop.f32.mrf.mxu0  ;;  %4542 = vmatpush2.bf16.msra.mxu0 %v6566_v60  ;;  %v6575_v14 = vld [vmem:[%s6944_s22 + $0x7e0] ss:$8 sps:$4 sm:$0xff]   ;;  %v6583_v32 = vld [vmem:[%s6944_s22 + $0x7d4] ss:$8 sps:$4 sm:$0xff]  }
 0x1c3   : > { %v3716_v47 = vpop.f32.mrf.mxu1  ;;  %4735 = vmatpush2.bf16.msra.mxu1 %v6569_v28  ;;  %4543 = vmatprep.subr.bf16.mxu0 %v6574_v33  ;;  %v5556_v28 = vcombine.low %v7325_v18, %v7327_v43  ;;  %v5573_v33 = vcombine.high %v7357_v50, %v7359_v41  ;;  %v6581_v4 = vld [vmem:[%s6944_s22 + $0x7d0] ss:$8 sps:$4 sm:$0xff]  }
 0x1c4   : > { %8084 = vst [vmem:[#allocation21_spill] sm:$0xff] %v7351_v42  ;;  %v7363_v63 = vadd.f32 %v3716_v47, %v3523_v37  ;;  %4736 = vmatprep.subr.bf16.mxu1 %v6577_v49  ;;  %v3525_v52 = vpop.f32.mrf.mxu0  ;;  %v5554_v42 = vcombine.low %v7321_v8, %v7323_v11  ;;  %v5571_v37 = vcombine.high %v7353_v44, %v7355_v3  ;;  %v6586_v8 = vld [vmem:[%s6944_s22 + $0x6c4] ss:$8 sps:$4 sm:$0xff]  }
 0x1c5   : > { %v3718_v6 = vpop.f32.mrf.mxu1  ;;  %v6589_v11 = vld [vmem:[%s6944_s22 + $0x7c4] ss:$8 sps:$4 sm:$0xff]  }
 0x1c6   : > { %8085 = vst [vmem:[#allocation22_spill] sm:$0xff] %v7363_v63  ;;  %v7371_v60 = vadd.f32 %v3718_v6, %v3525_v52  ;;  %v3527_v49 = vpop.f32.mrf.mxu0  ;;  %4544 = vmatpush2.bf16.msra.mxu0 %v6572_v21  ;;  %v6578_v63 = vld [vmem:[%s6944_s22 + $0x6d0] ss:$8 sps:$4 sm:$0xff]   ;;  %v7385_v21 = vld [vmem:[#allocation2 + $0x3a0] sm:$0xff] }
 0x1c7   : > { %v3720_v47 = vpop.f32.mrf.mxu1  ;;  %4737 = vmatpush2.bf16.msra.mxu1 %v6575_v14  ;;  %4545 = vmatprep.subr.bf16.mxu0 %v6580_v20  ;;  %v7387_v14 = vld [vmem:[#allocation2 + $0x3e0] sm:$0xff]  ;;  %v7389_v20 = vld [vmem:[#allocation2 + $0x3a8] sm:$0xff] }
 0x1c8   : > { %8086 = vst [vmem:[#allocation23_spill] sm:$0xff] %v7371_v60  ;;  %v7379_v62 = vadd.f32 %v3720_v47, %v3527_v49  ;;  %4738 = vmatprep.subr.bf16.mxu1 %v6583_v32  ;;  %v3531_v18 = vpop.f32.mrf.mxu0  ;;  %4222 = vmatmul.mubr.bf16.gmra.mxu0 %v5554_v42  ;;  %v7391_v49 = vld [vmem:[#allocation2 + $0x3e8] sm:$0xff] }
 0x1c9   : > { %v3724_v43 = vpop.f32.mrf.mxu1  ;;  %4415 = vmatmul.mubr.bf16.gmra.mxu1 %v5556_v28  ;;  %4231 = vmatprep.mubr.bf16.mxu0 %v5571_v37  ;;  %v6584_v42 = vld [vmem:[%s6944_s22 + $0x6c0] ss:$8 sps:$4 sm:$0xff]   ;;  %v6592_v37 = vld [vmem:[%s6944_s22 + $0x6b4] ss:$8 sps:$4 sm:$0xff]  }
 0x1ca   : > { %8087 = vst [vmem:[#allocation24_spill] sm:$0xff] %v7379_v62  ;;  %v7383_v52 = vadd.f32 %v3724_v43, %v3531_v18  ;;  %4424 = vmatprep.mubr.bf16.mxu1 %v5573_v33  ;;  %v3533_v32 = vpop.f32.mrf.mxu0  ;;  %4546 = vmatpush2.bf16.msra.mxu0 %v6578_v63  ;;  %v6587_v28 = vld [vmem:[%s6944_s22 + $0x7c0] ss:$8 sps:$4 sm:$0xff]   ;;  %v6595_v33 = vld [vmem:[%s6944_s22 + $0x7b4] ss:$8 sps:$4 sm:$0xff]  }
 0x1cb   : > { %v3726_v6 = vpop.f32.mrf.mxu1  ;;  %4739 = vmatpush2.bf16.msra.mxu1 %v6581_v4  ;;  %4547 = vmatprep.subr.bf16.mxu0 %v6586_v8  ;;  %v5572_v4 = vcombine.low %v7357_v50, %v7359_v41  ;;  %v5589_v8 = vcombine.high %v7389_v20, %v7391_v49  ;;  %v6593_v62 = vld [vmem:[%s6944_s22 + $0x7b0] ss:$8 sps:$4 sm:$0xff]  }
 0x1cc   : > { %8088 = vst [vmem:[#allocation25_spill] sm:$0xff] %v7383_v52  ;;  %v7395_v47 = vadd.f32 %v3726_v6, %v3533_v32  ;;  %4740 = vmatprep.subr.bf16.mxu1 %v6589_v11  ;;  %v3535_v18 = vpop.f32.mrf.mxu0  ;;  %v5570_v52 = vcombine.low %v7353_v44, %v7355_v3  ;;  %v5587_v32 = vcombine.high %v7385_v21, %v7387_v14  ;;  %v6598_v44 = vld [vmem:[%s6944_s22 + $0x6a4] ss:$8 sps:$4 sm:$0xff]  }
 0x1cd   : > { %v3728_v43 = vpop.f32.mrf.mxu1  ;;  %v6601_v3 = vld [vmem:[%s6944_s22 + $0x7a4] ss:$8 sps:$4 sm:$0xff]  }
 0x1ce   : > { %8089 = vst [vmem:[#allocation26_spill] sm:$0xff] %v7395_v47  ;;  %v7403_v63 = vadd.f32 %v3728_v43, %v3535_v18  ;;  %v3537_v11 = vpop.f32.mrf.mxu0  ;;  %4548 = vmatpush2.bf16.msra.mxu0 %v6584_v42  ;;  %v6590_v47 = vld [vmem:[%s6944_s22 + $0x6b0] ss:$8 sps:$4 sm:$0xff]   ;;  %v7417_v42 = vld [vmem:[#allocation2 + $0x420] sm:$0xff] }
 0x1cf   : > { %v3730_v6 = vpop.f32.mrf.mxu1  ;;  %4741 = vmatpush2.bf16.msra.mxu1 %v6587_v28  ;;  %4549 = vmatprep.subr.bf16.mxu0 %v6592_v37  ;;  %v7419_v28 = vld [vmem:[#allocation2 + $0x460] sm:$0xff]  ;;  %v7421_v37 = vld [vmem:[#allocation2 + $0x428] sm:$0xff] }
 0x1d0   : > { %8090 = vst [vmem:[#allocation27_spill] sm:$0xff] %v7403_v63  ;;  %v7411_v60 = vadd.f32 %v3730_v6, %v3537_v11  ;;  %4742 = vmatprep.subr.bf16.mxu1 %v6595_v33  ;;  %v3541_v50 = vpop.f32.mrf.mxu0  ;;  %4232 = vmatmul.mubr.bf16.gmra.mxu0 %v5570_v52  ;;  %v7423_v11 = vld [vmem:[#allocation2 + $0x468] sm:$0xff] }
 0x1d1   : > { %v3734_v41 = vpop.f32.mrf.mxu1  ;;  %4425 = vmatmul.mubr.bf16.gmra.mxu1 %v5572_v4  ;;  %4241 = vmatprep.mubr.bf16.mxu0 %v5587_v32  ;;  %v6596_v52 = vld [vmem:[%s6944_s22 + $0x6a0] ss:$8 sps:$4 sm:$0xff]   ;;  %v6604_v32 = vld [vmem:[%s6944_s22 + $0x694] ss:$8 sps:$4 sm:$0xff]  }
 0x1d2   : > { %8091 = vst [vmem:[#allocation28_spill] sm:$0xff] %v7411_v60  ;;  %v7415_v18 = vadd.f32 %v3734_v41, %v3541_v50  ;;  %4434 = vmatprep.mubr.bf16.mxu1 %v5589_v8  ;;  %v3543_v33 = vpop.f32.mrf.mxu0  ;;  %4550 = vmatpush2.bf16.msra.mxu0 %v6590_v47  ;;  %v6599_v4 = vld [vmem:[%s6944_s22 + $0x7a0] ss:$8 sps:$4 sm:$0xff]   ;;  %v6607_v8 = vld [vmem:[%s6944_s22 + $0x794] ss:$8 sps:$4 sm:$0xff]  }
 0x1d3   : > { %v3736_v43 = vpop.f32.mrf.mxu1  ;;  %4743 = vmatpush2.bf16.msra.mxu1 %v6593_v62  ;;  %4551 = vmatprep.subr.bf16.mxu0 %v6598_v44  ;;  %v5588_v62 = vcombine.low %v7389_v20, %v7391_v49  ;;  %v5605_v44 = vcombine.high %v7421_v37, %v7423_v11  ;;  %v6605_v60 = vld [vmem:[%s6944_s22 + $0x790] ss:$8 sps:$4 sm:$0xff]  }
 0x1d4   : > { %8092 = vst [vmem:[#allocation29_spill] sm:$0xff] %v7415_v18  ;;  %v7427_v6 = vadd.f32 %v3736_v43, %v3543_v33  ;;  %4744 = vmatprep.subr.bf16.mxu1 %v6601_v3  ;;  %v3545_v50 = vpop.f32.mrf.mxu0  ;;  %v5586_v18 = vcombine.low %v7385_v21, %v7387_v14  ;;  %v5603_v33 = vcombine.high %v7417_v42, %v7419_v28  ;;  %v6610_v21 = vld [vmem:[%s6944_s22 + $0x684] ss:$8 sps:$4 sm:$0xff]  }
 0x1d5   : > { %v3738_v41 = vpop.f32.mrf.mxu1  ;;  %v6613_v14 = vld [vmem:[%s6944_s22 + $0x784] ss:$8 sps:$4 sm:$0xff]  }
 0x1d6   : > { %8093 = vst [vmem:[#allocation30_spill] sm:$0xff] %v7427_v6  ;;  %v7435_v47 = vadd.f32 %v3738_v41, %v3545_v50  ;;  %v3547_v3 = vpop.f32.mrf.mxu0  ;;  %4552 = vmatpush2.bf16.msra.mxu0 %v6596_v52  ;;  %v6602_v6 = vld [vmem:[%s6944_s22 + $0x690] ss:$8 sps:$4 sm:$0xff]   ;;  %v443_v52 = vld [vmem:[#allocation2 + $0x4a0] sm:$0xff]  ;;  %v444_v41 = vld [vmem:[#allocation2 + $0x4a8] sm:$0xff] }
 0x1d7   : > { %v3740_v43 = vpop.f32.mrf.mxu1  ;;  %4745 = vmatpush2.bf16.msra.mxu1 %v6599_v4  ;;  %4553 = vmatprep.subr.bf16.mxu0 %v6604_v32  ;;  %v451_v4 = vld [vmem:[#allocation2 + $0x4e0] sm:$0xff] }
 0x1d8   : > { %8094 = vst [vmem:[#allocation31_spill] sm:$0xff] %v7435_v47  ;;  %v7443_v63 = vadd.f32 %v3740_v43, %v3547_v3  ;;  %4746 = vmatprep.subr.bf16.mxu1 %v6607_v8  ;;  %v3551_v20 = vpop.f32.mrf.mxu0  ;;  %4242 = vmatmul.mubr.bf16.gmra.mxu0 %v5586_v18  ;;  %v452_v43 = vld [vmem:[#allocation2 + $0x4e8] sm:$0xff] }
 0x1d9   : > { %v3744_v49 = vpop.f32.mrf.mxu1  ;;  %4435 = vmatmul.mubr.bf16.gmra.mxu1 %v5588_v62  ;;  %4251 = vmatprep.mubr.bf16.mxu0 %v5603_v33  ;;  %v6608_v32 = vld [vmem:[%s6944_s22 + $0x680] ss:$8 sps:$4 sm:$0xff]   ;;  %v5602_v33 = vcombine.low %v7417_v42, %v7419_v28 }
 0x1da   : > { %8095 = vst [vmem:[#allocation32_spill] sm:$0xff] %v7443_v63  ;;  %v7447_v50 = vadd.f32 %v3744_v49, %v3551_v20  ;;  %4444 = vmatprep.mubr.bf16.mxu1 %v5605_v44  ;;  %v3553_v47 = vpop.f32.mrf.mxu0  ;;  %4554 = vmatpush2.bf16.msra.mxu0 %v6602_v6  ;;  %v6611_v8 = vld [vmem:[%s6944_s22 + $0x780] ss:$8 sps:$4 sm:$0xff]   ;;  %v5604_v44 = vcombine.low %v7421_v37, %v7423_v11 }
 0x1db   : > { %v3746_v3 = vpop.f32.mrf.mxu1  ;;  %4747 = vmatpush2.bf16.msra.mxu1 %v6605_v60  ;;  %4555 = vmatprep.subr.bf16.mxu0 %v6610_v21  ;;  %v5619_v49 = vcombine.high %v443_v52, %v451_v4  ;;  %v459_v42 = vld [vmem:[#allocation2 + $0x520] sm:$0xff] }
 0x1dc   : > { %8096 = vst [vmem:[#allocation33_spill] sm:$0xff] %v7447_v50  ;;  %v7451_v63 = vadd.f32 %v3746_v3, %v3553_v47  ;;  %4748 = vmatprep.subr.bf16.mxu1 %v6613_v14  ;;  %v3555_v18 = vpop.f32.mrf.mxu0  ;;  %v5621_v50 = vcombine.high %v444_v41, %v452_v43  ;;  %v467_v11 = vld [vmem:[#allocation2 + $0x560] sm:$0xff] }
 0x1dd   : > { %v3748_v62 = vpop.f32.mrf.mxu1 }
 0x1de   : > { %8097 = vst [vmem:[#allocation34_spill] sm:$0xff] %v7451_v63  ;;  %v7457_v20 = vadd.f32 %v3748_v62, %v3555_v18  ;;  %v3557_v6 = vpop.f32.mrf.mxu0  ;;  %4556 = vmatpush2.bf16.msra.mxu0 %v6608_v32  ;;  %v460_v18 = vld [vmem:[#allocation2 + $0x528] sm:$0xff] }
 0x1df   : > { %v3750_v60 = vpop.f32.mrf.mxu1  ;;  %4749 = vmatpush2.bf16.msra.mxu1 %v6611_v8  ;;  %v468_v62 = vld [vmem:[#allocation2 + $0x568] sm:$0xff] }
 0x1e0   : > { %8098 = vst [vmem:[#allocation35_spill] sm:$0xff] %v7457_v20  ;;  %v7459_v47 = vadd.f32 %v3750_v60, %v3557_v6  ;;  %v3787_v21 = vpop.f32.mrf.mxu0  ;;  %4252 = vmatmul.mubr.bf16.gmra.mxu0 %v5602_v33  ;;  %v5618_v60 = vcombine.low %v443_v52, %v451_v4  ;;  %v475_v4 = vld [vmem:[#allocation2 + $0x5a0] sm:$0xff] }
 0x1e1   : > { %v3980_v14 = vpop.f32.mrf.mxu1  ;;  %4445 = vmatmul.mubr.bf16.gmra.mxu1 %v5604_v44  ;;  %v3788_v3 = vadd.f32 %v3787_v21, %v7159_v19  ;;  %4261 = vmatprep.mubr.bf16.mxu0 %v5619_v49  ;;  %v5635_v44 = vcombine.high %v459_v42, %v467_v11 }
 0x1e2   : > { %8099 = vst [vmem:[#allocation36_spill] sm:$0xff] %v7459_v47  ;;  %4454 = vmatprep.mubr.bf16.mxu1 %v5621_v50  ;;  %v3789_v28 = vpop.f32.mrf.mxu0  ;;  %v5620_v47 = vcombine.low %v444_v41, %v452_v43  ;;  %v5637_v50 = vcombine.high %v460_v18, %v468_v62  ;;  %v483_v43 = vld [vmem:[#allocation2 + $0x5e0] sm:$0xff] }
 0x1e3   : > { %v3982_v37 = vpop.f32.mrf.mxu1  ;;  %v7462_v20 = vadd.f32 %v3980_v14, %v3788_v3  ;;  %v3790_v32 = vadd.f32 %v3789_v28, %v7161_v26  ;;  %v476_v28 = vld [vmem:[#allocation2 + $0x5a8] sm:$0xff] }
 0x1e4   : > { %v3791_v8 = vpop.f32.mrf.mxu0 }
 0x1e5   : > { %v3984_v6 = vpop.f32.mrf.mxu1  ;;  %v7465_v33 = vadd.f32 %v3982_v37, %v3790_v32  ;;  %v3792_v19 = vadd.f32 %v3791_v8, %v7163_v31  ;;  %v484_v37 = vld [vmem:[#allocation2 + $0x5e8] sm:$0xff] }
 0x1e6   : > { %v3793_v49 = vpop.f32.mrf.mxu0 }
 0x1e7   : > { %v3986_v21 = vpop.f32.mrf.mxu1  ;;  %v7468_v63 = vadd.f32 %v3984_v6, %v3792_v19  ;;  %v3794_v5 = vadd.f32 %v3793_v49, %v7165_v36  ;;  %v5651_v19 = vcombine.high %v475_v4, %v483_v43 }
 0x1e8   : > { %v3797_v14 = vpop.f32.mrf.mxu0  ;;  %4262 = vmatmul.mubr.bf16.gmra.mxu0 %v5618_v60  ;;  %v5634_v60 = vcombine.low %v459_v42, %v467_v11  ;;  %v491_v11 = vld [vmem:[#allocation2 + $0x620] sm:$0xff] }
 0x1e9   : > { %v3990_v3 = vpop.f32.mrf.mxu1  ;;  %4455 = vmatmul.mubr.bf16.gmra.mxu1 %v5620_v47  ;;  %v7471_v26 = vadd.f32 %v3986_v21, %v3794_v5  ;;  %v3798_v52 = vadd.f32 %v3797_v14, %v7167_v39  ;;  %4271 = vmatprep.mubr.bf16.mxu0 %v5635_v44  ;;  %v5636_v47 = vcombine.low %v460_v18, %v468_v62  ;;  %v499_v62 = vld [vmem:[#allocation2 + $0x660] sm:$0xff] }
 0x1ea   : > { %4464 = vmatprep.mubr.bf16.mxu1 %v5637_v50  ;;  %v3799_v31 = vpop.f32.mrf.mxu0  ;;  %v5653_v44 = vcombine.high %v476_v28, %v484_v37 }
 0x1eb   : > { %v3992_v41 = vpop.f32.mrf.mxu1  ;;  %v7474_v32 = vadd.f32 %v3990_v3, %v3798_v52  ;;  %v3800_v36 = vadd.f32 %v3799_v31, %v7169_v46  ;;  %v492_v31 = vld [vmem:[#allocation2 + $0x628] sm:$0xff] }
 0x1ec   : > { %v3801_v8 = vpop.f32.mrf.mxu0 }
 0x1ed   : > { %v3994_v6 = vpop.f32.mrf.mxu1  ;;  %v7477_v5 = vadd.f32 %v3992_v41, %v3800_v36  ;;  %v3802_v39 = vadd.f32 %v3801_v8, %v7171_v51  ;;  %v500_v41 = vld [vmem:[#allocation2 + $0x668] sm:$0xff] }
 0x1ee   : > { %v3803_v50 = vpop.f32.mrf.mxu0 }
 0x1ef   : > { %v3996_v49 = vpop.f32.mrf.mxu1  ;;  %v7480_v21 = vadd.f32 %v3994_v6, %v3802_v39  ;;  %v3804_v14 = vadd.f32 %v3803_v50, %v7173_v56 }
 0x1f0   : > { %v3807_v3 = vpop.f32.mrf.mxu0  ;;  %4272 = vmatmul.mubr.bf16.gmra.mxu0 %v5634_v60  ;;  %v5650_v60 = vcombine.low %v475_v4, %v483_v43  ;;  %v507_v43 = vld [vmem:[#allocation2 + $0x6a0] sm:$0xff] }
 0x1f1   : > { %v4000_v52 = vpop.f32.mrf.mxu1  ;;  %4465 = vmatmul.mubr.bf16.gmra.mxu1 %v5636_v47  ;;  %v7483_v46 = vadd.f32 %v3996_v49, %v3804_v14  ;;  %v3808_v42 = vadd.f32 %v3807_v3, %v7175_v59  ;;  %4281 = vmatprep.mubr.bf16.mxu0 %v5651_v19  ;;  %v5652_v47 = vcombine.low %v476_v28, %v484_v37  ;;  %v515_v37 = vld [vmem:[#allocation2 + $0x6e0] sm:$0xff] }
 0x1f2   : > { %4474 = vmatprep.mubr.bf16.mxu1 %v5653_v44  ;;  %v3809_v51 = vpop.f32.mrf.mxu0  ;;  %v5667_v19 = vcombine.high %v491_v11, %v499_v62  ;;  %v5669_v44 = vcombine.high %v492_v31, %v500_v41 }
 0x1f3   : > { %v4002_v18 = vpop.f32.mrf.mxu1  ;;  %v7486_v36 = vadd.f32 %v4000_v52, %v3808_v42  ;;  %v3810_v56 = vadd.f32 %v3809_v51, %v7177_v2  ;;  %v508_v51 = vld [vmem:[#allocation2 + $0x6a8] sm:$0xff] }
 0x1f4   : > { %v3811_v8 = vpop.f32.mrf.mxu0 }
 0x1f5   : > { %v4004_v6 = vpop.f32.mrf.mxu1  ;;  %v7489_v39 = vadd.f32 %v4002_v18, %v3810_v56  ;;  %v3812_v59 = vadd.f32 %v3811_v8, %v7179_v7  ;;  %v516_v18 = vld [vmem:[#allocation2 + $0x6e8] sm:$0xff] }
 0x1f6   : > { %v3813_v50 = vpop.f32.mrf.mxu0 }
 0x1f7   : > { %v4006_v49 = vpop.f32.mrf.mxu1  ;;  %v7492_v14 = vadd.f32 %v4004_v6, %v3812_v59  ;;  %v3814_v3 = vadd.f32 %v3813_v50, %v7181_v12 }
 0x1f8   : > { %v3817_v52 = vpop.f32.mrf.mxu0  ;;  %4282 = vmatmul.mubr.bf16.gmra.mxu0 %v5650_v60  ;;  %v5666_v60 = vcombine.low %v491_v11, %v499_v62  ;;  %v523_v62 = vld [vmem:[#allocation2 + $0x720] sm:$0xff] }
 0x1f9   : > { %v4010_v42 = vpop.f32.mrf.mxu1  ;;  %4475 = vmatmul.mubr.bf16.gmra.mxu1 %v5652_v47  ;;  %v7495_v2 = vadd.f32 %v4006_v49, %v3814_v3  ;;  %v3818_v4 = vadd.f32 %v3817_v52, %v7183_v15  ;;  %4291 = vmatprep.mubr.bf16.mxu0 %v5667_v19  ;;  %v5668_v47 = vcombine.low %v492_v31, %v500_v41  ;;  %v531_v41 = vld [vmem:[#allocation2 + $0x760] sm:$0xff] }
 0x1fa   : > { %4484 = vmatprep.mubr.bf16.mxu1 %v5669_v44  ;;  %v3819_v7 = vpop.f32.mrf.mxu0  ;;  %v5683_v19 = vcombine.high %v507_v43, %v515_v37  ;;  %v5685_v44 = vcombine.high %v508_v51, %v516_v18 }
 0x1fb   : > { %v4012_v28 = vpop.f32.mrf.mxu1  ;;  %v7498_v56 = vadd.f32 %v4010_v42, %v3818_v4  ;;  %v3820_v12 = vadd.f32 %v3819_v7, %v7185_v23  ;;  %v524_v7 = vld [vmem:[#allocation2 + $0x728] sm:$0xff] }
 0x1fc   : > { %v3821_v8 = vpop.f32.mrf.mxu0 }
 0x1fd   : > { %v4014_v6 = vpop.f32.mrf.mxu1  ;;  %v7501_v59 = vadd.f32 %v4012_v28, %v3820_v12  ;;  %v3822_v15 = vadd.f32 %v3821_v8, %v7187_v29  ;;  %v532_v28 = vld [vmem:[#allocation2 + $0x768] sm:$0xff] }
 0x1fe   : > { %v3823_v50 = vpop.f32.mrf.mxu0 }
 0x1ff   : > { %v4016_v49 = vpop.f32.mrf.mxu1  ;;  %v7504_v3 = vadd.f32 %v4014_v6, %v3822_v15  ;;  %v3824_v52 = vadd.f32 %v3823_v50, %v7189_v35 }
 0x200   : > { %v3827_v42 = vpop.f32.mrf.mxu0  ;;  %4292 = vmatmul.mubr.bf16.gmra.mxu0 %v5666_v60  ;;  %v5682_v60 = vcombine.low %v507_v43, %v515_v37  ;;  %v539_v37 = vld [vmem:[#allocation2 + $0x7a0] sm:$0xff] }
 0x201   : > { %v4020_v4 = vpop.f32.mrf.mxu1  ;;  %4485 = vmatmul.mubr.bf16.gmra.mxu1 %v5668_v47  ;;  %v7507_v23 = vadd.f32 %v4016_v49, %v3824_v52  ;;  %v3828_v11 = vadd.f32 %v3827_v42, %v7191_v40  ;;  %4301 = vmatprep.mubr.bf16.mxu0 %v5683_v19  ;;  %v5684_v47 = vcombine.low %v508_v51, %v516_v18  ;;  %v547_v18 = vld [vmem:[#allocation2 + $0x7e0] sm:$0xff] }
 0x202   : > { %4494 = vmatprep.mubr.bf16.mxu1 %v5685_v44  ;;  %v3829_v29 = vpop.f32.mrf.mxu0  ;;  %v5699_v19 = vcombine.high %v523_v62, %v531_v41  ;;  %v5701_v44 = vcombine.high %v524_v7, %v532_v28 }
 0x203   : > { %v4022_v31 = vpop.f32.mrf.mxu1  ;;  %v7510_v12 = vadd.f32 %v4020_v4, %v3828_v11  ;;  %v3830_v35 = vadd.f32 %v3829_v29, %v7193_v48  ;;  %v540_v29 = vld [vmem:[#allocation2 + $0x7a8] sm:$0xff] }
 0x204   : > { %v3831_v8 = vpop.f32.mrf.mxu0 }
 0x205   : > { %v4024_v6 = vpop.f32.mrf.mxu1  ;;  %v7513_v15 = vadd.f32 %v4022_v31, %v3830_v35  ;;  %v3832_v40 = vadd.f32 %v3831_v8, %v7195_v54  ;;  %v548_v31 = vld [vmem:[#allocation2 + $0x7e8] sm:$0xff] }
 0x206   : > { %v3833_v50 = vpop.f32.mrf.mxu0 }
 0x207   : > { %8100 = vst [vmem:[#allocation37_spill] sm:$0xff] %v7513_v15  ;;  %v4026_v49 = vpop.f32.mrf.mxu1  ;;  %v7516_v52 = vadd.f32 %v4024_v6, %v3832_v40  ;;  %v3834_v42 = vadd.f32 %v3833_v50, %v7197_v61  ;;  %v8120_v15 = vld [vmem:[#allocation20_spill] sm:$0xff] }
 0x208   : > { %v3837_v4 = vpop.f32.mrf.mxu0  ;;  %4302 = vmatmul.mubr.bf16.gmra.mxu0 %v5682_v60  ;;  %v5698_v60 = vcombine.low %v523_v62, %v531_v41  ;;  %v301_v41 = vld [vmem:[#allocation2 + $0x30] sm:$0xff] }
 0x209   : > { %v4030_v11 = vpop.f32.mrf.mxu1  ;;  %4495 = vmatmul.mubr.bf16.gmra.mxu1 %v5684_v47  ;;  %v7519_v48 = vadd.f32 %v4026_v49, %v3834_v42  ;;  %v3838_v43 = vadd.f32 %v3837_v4, %v7199_v0  ;;  %4311 = vmatprep.mubr.bf16.mxu0 %v5699_v19  ;;  %v5700_v47 = vcombine.low %v524_v7, %v532_v28  ;;  %v309_v28 = vld [vmem:[#allocation2 + $0x70] sm:$0xff] }
 0x20a   : > { %4504 = vmatprep.mubr.bf16.mxu1 %v5701_v44  ;;  %v3839_v54 = vpop.f32.mrf.mxu0  ;;  %v5715_v19 = vcombine.high %v539_v37, %v547_v18  ;;  %v5717_v44 = vcombine.high %v540_v29, %v548_v31 }
 0x20b   : > { %8101 = vst [vmem:[#allocation38_spill] sm:$0xff] %v7519_v48  ;;  %v4032_v51 = vpop.f32.mrf.mxu1  ;;  %v7522_v35 = vadd.f32 %v4030_v11, %v3838_v43  ;;  %v3840_v61 = vadd.f32 %v3839_v54, %v7201_v9  ;;  %v302_v54 = vld [vmem:[#allocation2 + $0x38] sm:$0xff] }
 0x20c   : > { %v3841_v8 = vpop.f32.mrf.mxu0 }
 0x20d   : > { %v4034_v6 = vpop.f32.mrf.mxu1  ;;  %v7525_v40 = vadd.f32 %v4032_v51, %v3840_v61  ;;  %v3842_v0 = vadd.f32 %v3841_v8, %v7203_v16  ;;  %v310_v51 = vld [vmem:[#allocation2 + $0x78] sm:$0xff] }
 0x20e   : > { %v3843_v50 = vpop.f32.mrf.mxu0 }
 0x20f   : > { %8102 = vst [vmem:[#allocation39_spill] sm:$0xff] %v7525_v40  ;;  %v4036_v49 = vpop.f32.mrf.mxu1  ;;  %v7528_v42 = vadd.f32 %v4034_v6, %v3842_v0  ;;  %v3844_v4 = vadd.f32 %v3843_v50, %v7205_v22 }
 0x210   : > { %v3847_v11 = vpop.f32.mrf.mxu0  ;;  %4312 = vmatmul.mubr.bf16.gmra.mxu0 %v5698_v60  ;;  %v5714_v60 = vcombine.low %v539_v37, %v547_v18  ;;  %v317_v18 = vld [vmem:[#allocation2 + $0xb0] sm:$0xff] }
 0x211   : > { %v4040_v43 = vpop.f32.mrf.mxu1  ;;  %4505 = vmatmul.mubr.bf16.gmra.mxu1 %v5700_v47  ;;  %v7531_v9 = vadd.f32 %v4036_v49, %v3844_v4  ;;  %v3848_v62 = vadd.f32 %v3847_v11, %v7207_v27  ;;  %4321 = vmatprep.mubr.bf16.mxu0 %v5715_v19  ;;  %v5716_v47 = vcombine.low %v540_v29, %v548_v31  ;;  %v325_v31 = vld [vmem:[#allocation2 + $0xf0] sm:$0xff] }
 0x212   : > { %4514 = vmatprep.mubr.bf16.mxu1 %v5717_v44  ;;  %v3849_v16 = vpop.f32.mrf.mxu0  ;;  %v5479_v19 = vcombine.high %v301_v41, %v309_v28  ;;  %v5481_v44 = vcombine.high %v302_v54, %v310_v51 }
 0x213   : > { %8103 = vst [vmem:[#allocation40_spill] sm:$0xff] %v7531_v9  ;;  %v4042_v7 = vpop.f32.mrf.mxu1  ;;  %v7534_v61 = vadd.f32 %v4040_v43, %v3848_v62  ;;  %v3850_v22 = vadd.f32 %v3849_v16, %v7209_v38  ;;  %v318_v16 = vld [vmem:[#allocation2 + $0xb8] sm:$0xff] }
 0x214   : > { %v3851_v8 = vpop.f32.mrf.mxu0 }
 0x215   : > { %v4044_v6 = vpop.f32.mrf.mxu1  ;;  %v7537_v0 = vadd.f32 %v4042_v7, %v3850_v22  ;;  %v3852_v27 = vadd.f32 %v3851_v8, %v7211_v45  ;;  %v326_v7 = vld [vmem:[#allocation2 + $0xf8] sm:$0xff] }
 0x216   : > { %v3853_v50 = vpop.f32.mrf.mxu0 }
 0x217   : > { %8104 = vst [vmem:[#allocation41_spill] sm:$0xff] %v7537_v0  ;;  %v4046_v49 = vpop.f32.mrf.mxu1  ;;  %v7540_v4 = vadd.f32 %v4044_v6, %v3852_v27  ;;  %v3854_v11 = vadd.f32 %v3853_v50, %v7213_v53  ;;  %v8112_v0 = vld [vmem:[#allocation16_spill] sm:$0xff] }
 0x218   : > { %v3857_v43 = vpop.f32.mrf.mxu0  ;;  %4322 = vmatmul.mubr.bf16.gmra.mxu0 %v5714_v60  ;;  %v5478_v60 = vcombine.low %v301_v41, %v309_v28  ;;  %v333_v28 = vld [vmem:[#allocation2 + $0x130] sm:$0xff] }
 0x219   : > { %v4050_v62 = vpop.f32.mrf.mxu1  ;;  %4515 = vmatmul.mubr.bf16.gmra.mxu1 %v5716_v47  ;;  %v7543_v38 = vadd.f32 %v4046_v49, %v3854_v11  ;;  %v3858_v37 = vadd.f32 %v3857_v43, %v7215_v58  ;;  %4557 = vmatprep.mubr.bf16.mxu0 %v5479_v19  ;;  %v5480_v47 = vcombine.low %v302_v54, %v310_v51  ;;  %v341_v51 = vld [vmem:[#allocation2 + $0x170] sm:$0xff] }
 0x21a   : > { %4750 = vmatprep.mubr.bf16.mxu1 %v5481_v44  ;;  %v3859_v45 = vpop.f32.mrf.mxu0  ;;  %v5495_v19 = vcombine.high %v317_v18, %v325_v31  ;;  %v5497_v44 = vcombine.high %v318_v16, %v326_v7 }
 0x21b   : > { %8105 = vst [vmem:[#allocation42_spill] sm:$0xff] %v7543_v38  ;;  %v4052_v29 = vpop.f32.mrf.mxu1  ;;  %v7546_v22 = vadd.f32 %v4050_v62, %v3858_v37  ;;  %v3860_v53 = vadd.f32 %v3859_v45, %v7217_v1  ;;  %v334_v45 = vld [vmem:[#allocation2 + $0x138] sm:$0xff] }
 0x21c   : > { %v3861_v8 = vpop.f32.mrf.mxu0 }
 0x21d   : > { %v4054_v6 = vpop.f32.mrf.mxu1  ;;  %v7549_v27 = vadd.f32 %v4052_v29, %v3860_v53  ;;  %v3862_v58 = vadd.f32 %v3861_v8, %v7219_v13  ;;  %v342_v29 = vld [vmem:[#allocation2 + $0x178] sm:$0xff] }
 0x21e   : > { %v3863_v50 = vpop.f32.mrf.mxu0 }
 0x21f   : > { %8106 = vst [vmem:[#allocation43_spill] sm:$0xff] %v7549_v27  ;;  %v4056_v49 = vpop.f32.mrf.mxu1  ;;  %v7552_v11 = vadd.f32 %v4054_v6, %v3862_v58  ;;  %v3864_v43 = vadd.f32 %v3863_v50, %v7223_v25 }
 0x220   : > { %v3867_v62 = vpop.f32.mrf.mxu0  ;;  %4558 = vmatmul.mubr.bf16.vlgmr.msra.gmra.mxu0 %v5478_v60  ;;  %v5494_v60 = vcombine.low %v317_v18, %v325_v31  ;;  %v349_v31 = vld [vmem:[#allocation2 + $0x1b0] sm:$0xff] }
 0x221   : > { %v4060_v37 = vpop.f32.mrf.mxu1  ;;  %4751 = vmatmul.mubr.bf16.vlgmr.msra.gmra.mxu1 %v5480_v47  ;;  %v7555_v1 = vadd.f32 %v4056_v49, %v3864_v43  ;;  %v3868_v41 = vadd.f32 %v3867_v62, %v7229_v34  ;;  %4567 = vmatprep.mubr.bf16.mxu0 %v5495_v19  ;;  %v5496_v47 = vcombine.low %v318_v16, %v326_v7  ;;  %v357_v7 = vld [vmem:[#allocation2 + $0x1f0] sm:$0xff] }
 0x222   : > { %4760 = vmatprep.mubr.bf16.mxu1 %v5497_v44  ;;  %v3869_v13 = vpop.f32.mrf.mxu0  ;;  %v5511_v19 = vcombine.high %v333_v28, %v341_v51  ;;  %v5513_v44 = vcombine.high %v334_v45, %v342_v29 }
 0x223   : > { %8107 = vst [vmem:[#allocation44_spill] sm:$0xff] %v7555_v1  ;;  %v4062_v54 = vpop.f32.mrf.mxu1  ;;  %v7558_v53 = vadd.f32 %v4060_v37, %v3868_v41  ;;  %v3870_v25 = vadd.f32 %v3869_v13, %v7241_v57  ;;  %v350_v13 = vld [vmem:[#allocation2 + $0x1b8] sm:$0xff] }
 0x224   : > { %v3871_v8 = vpop.f32.mrf.mxu0 }
 0x225   : > { %v4064_v6 = vpop.f32.mrf.mxu1  ;;  %v7561_v58 = vadd.f32 %v4062_v54, %v3870_v25  ;;  %v3872_v34 = vadd.f32 %v3871_v8, %v7243_v10  ;;  %v358_v54 = vld [vmem:[#allocation2 + $0x1f8] sm:$0xff] }
 0x226   : > { %v3873_v50 = vpop.f32.mrf.mxu0 }
 0x227   : > { %v4066_v49 = vpop.f32.mrf.mxu1  ;;  %v7564_v43 = vadd.f32 %v4064_v6, %v3872_v34  ;;  %v3874_v62 = vadd.f32 %v3873_v50, %v7251_v24 }
 0x228   : > { %v3877_v37 = vpop.f32.mrf.mxu0  ;;  %4568 = vmatmul.mubr.bf16.gmra.mxu0 %v5494_v60  ;;  %v5510_v60 = vcombine.low %v333_v28, %v341_v51  ;;  %v8109_v28 = vld [vmem:[#allocation13_spill] sm:$0xff] }
 0x229   : > { %v4070_v41 = vpop.f32.mrf.mxu1  ;;  %4761 = vmatmul.mubr.bf16.gmra.mxu1 %v5496_v47  ;;  %v7567_v57 = vadd.f32 %v4066_v49, %v3874_v62  ;;  %v3878_v18 = vadd.f32 %v3877_v37, %v7255_v30  ;;  %4577 = vmatprep.mubr.bf16.mxu0 %v5511_v19  ;;  %v5512_v47 = vcombine.low %v334_v45, %v342_v29  ;;  %v8108_v37 = vld [vmem:[#allocation12_spill] sm:$0xff]  ;;  %v365_v45 = vld [vmem:[#allocation2 + $0x230] sm:$0xff] }
 0x22a   : > { %4770 = vmatprep.mubr.bf16.mxu1 %v5513_v44  ;;  %v3879_v10 = vpop.f32.mrf.mxu0  ;;  %v5527_v19 = vcombine.high %v349_v31, %v357_v7  ;;  %v5529_v44 = vcombine.high %v350_v13, %v358_v54 }
 0x22b   : > { %v4072_v16 = vpop.f32.mrf.mxu1  ;;  %v7570_v25 = vadd.f32 %v4070_v41, %v3878_v18  ;;  %v3880_v24 = vadd.f32 %v3879_v10, %v7267_v55  ;;  %v373_v10 = vld [vmem:[#allocation2 + $0x270] sm:$0xff] }
 0x22c   : > { %v3881_v8 = vpop.f32.mrf.mxu0 }
 0x22d   : > { %v4074_v6 = vpop.f32.mrf.mxu1  ;;  %v7573_v34 = vadd.f32 %v4072_v16, %v3880_v24  ;;  %v3882_v30 = vadd.f32 %v3881_v8, %v7275_v17  ;;  %v366_v16 = vld [vmem:[#allocation2 + $0x238] sm:$0xff] }
 0x22e   : > { %v3883_v50 = vpop.f32.mrf.mxu0  ;;  %v374_v24 = vld [vmem:[#allocation2 + $0x278] sm:$0xff] }
 0x22f   : > { %v4076_v49 = vpop.f32.mrf.mxu1  ;;  %v7576_v62 = vadd.f32 %v4074_v6, %v3882_v30  ;;  %v3884_v1 = vadd.f32 %v3883_v50, %v8108_v37  ;;  %v8110_v6 = vld [vmem:[#allocation14_spill] sm:$0xff] }
 0x230   : > { %v3887_v41 = vpop.f32.mrf.mxu0  ;;  %4578 = vmatmul.mubr.bf16.gmra.mxu0 %v5510_v60  ;;  %v5526_v60 = vcombine.low %v349_v31, %v357_v7  ;;  %v8114_v31 = vld [vmem:[#allocation17_spill] sm:$0xff] }
 0x231   : > { %v4080_v18 = vpop.f32.mrf.mxu1  ;;  %4771 = vmatmul.mubr.bf16.gmra.mxu1 %v5512_v47  ;;  %v7579_v55 = vadd.f32 %v4076_v49, %v3884_v1  ;;  %v3888_v51 = vadd.f32 %v3887_v41, %v8109_v28  ;;  %4587 = vmatprep.mubr.bf16.mxu0 %v5527_v19  ;;  %v5528_v47 = vcombine.low %v350_v13, %v358_v54  ;;  %v8111_v49 = vld [vmem:[#allocation15_spill] sm:$0xff]  ;;  %v381_v13 = vld [vmem:[#allocation2 + $0x2b0] sm:$0xff] }
 0x232   : > { %4780 = vmatprep.mubr.bf16.mxu1 %v5529_v44  ;;  %v3889_v17 = vpop.f32.mrf.mxu0  ;;  %v5543_v19 = vcombine.high %v365_v45, %v373_v10  ;;  %v5545_v44 = vcombine.high %v366_v16, %v374_v24 }
 0x233   : > { %v4082_v29 = vpop.f32.mrf.mxu1  ;;  %v7582_v8 = vadd.f32 %v4080_v18, %v3888_v51  ;;  %v3890_v30 = vadd.f32 %v3889_v17, %v8110_v6  ;;  %v389_v6 = vld [vmem:[#allocation2 + $0x2f0] sm:$0xff] }
 0x234   : > { %v3891_v50 = vpop.f32.mrf.mxu0 }
 0x235   : > { %v4084_v37 = vpop.f32.mrf.mxu1  ;;  %v7585_v1 = vadd.f32 %v4082_v29, %v3890_v30  ;;  %v3892_v41 = vadd.f32 %v3891_v50, %v8111_v49  ;;  %v382_v30 = vld [vmem:[#allocation2 + $0x2b8] sm:$0xff]  ;;  %v8116_v49 = vld [vmem:[#allocation18_spill] sm:$0xff] }
 0x236   : > { %v3893_v28 = vpop.f32.mrf.mxu0  ;;  %v390_v50 = vld [vmem:[#allocation2 + $0x2f8] sm:$0xff] }
 0x237   : > { %v4086_v27 = vpop.f32.mrf.mxu1  ;;  %v7588_v38 = vadd.f32 %v4084_v37, %v3892_v41  ;;  %v3894_v9 = vadd.f32 %v3893_v28, %v8112_v0 }
 0x238   : > { %v3897_v18 = vpop.f32.mrf.mxu0  ;;  %4588 = vmatmul.mubr.bf16.gmra.mxu0 %v5526_v60  ;;  %v5542_v60 = vcombine.low %v365_v45, %v373_v10  ;;  %v8122_v45 = vld [vmem:[#allocation21_spill] sm:$0xff] }
 0x239   : > { %v4090_v51 = vpop.f32.mrf.mxu1  ;;  %4781 = vmatmul.mubr.bf16.gmra.mxu1 %v5528_v47  ;;  %v7591_v17 = vadd.f32 %v4086_v27, %v3894_v9  ;;  %v3898_v7 = vadd.f32 %v3897_v18, %v8114_v31  ;;  %4597 = vmatprep.mubr.bf16.mxu0 %v5543_v19  ;;  %v5544_v47 = vcombine.low %v366_v16, %v374_v24  ;;  %v8118_v27 = vld [vmem:[#allocation19_spill] sm:$0xff]  ;;  %v397_v16 = vld [vmem:[#allocation2 + $0x330] sm:$0xff] }
 0x23a   : > { %4790 = vmatprep.mubr.bf16.mxu1 %v5545_v44  ;;  %v3899_v54 = vpop.f32.mrf.mxu0  ;;  %v5559_v19 = vcombine.high %v381_v13, %v389_v6  ;;  %v5561_v44 = vcombine.high %v382_v30, %v390_v50 }
 0x23b   : > { %8113 = vst [vmem:[#allocation12_spill] sm:$0xff] %v7591_v17  ;;  %v4092_v29 = vpop.f32.mrf.mxu1  ;;  %v7594_v37 = vadd.f32 %v4090_v51, %v3898_v7  ;;  %v3900_v0 = vadd.f32 %v3899_v54, %v8116_v49  ;;  %v405_v49 = vld [vmem:[#allocation2 + $0x370] sm:$0xff] }
 0x23c   : > { %v3901_v41 = vpop.f32.mrf.mxu0 }
 0x23d   : > { %8115 = vst [vmem:[#allocation13_spill] sm:$0xff] %v7594_v37  ;;  %v4094_v28 = vpop.f32.mrf.mxu1  ;;  %v7597_v9 = vadd.f32 %v4092_v29, %v3900_v0  ;;  %v3902_v18 = vadd.f32 %v3901_v41, %v8118_v27  ;;  %v398_v0 = vld [vmem:[#allocation2 + $0x338] sm:$0xff]  ;;  %v8123_v27 = vld [vmem:[#allocation22_spill] sm:$0xff] }
 0x23e   : > { %v3903_v31 = vpop.f32.mrf.mxu0  ;;  %v406_v41 = vld [vmem:[#allocation2 + $0x378] sm:$0xff] }
 0x23f   : > { %8117 = vst [vmem:[#allocation14_spill] sm:$0xff] %v7597_v9  ;;  %v4096_v40 = vpop.f32.mrf.mxu1  ;;  %v7600_v48 = vadd.f32 %v4094_v28, %v3902_v18  ;;  %v3904_v17 = vadd.f32 %v3903_v31, %v8120_v15  ;;  %v8125_v9 = vld [vmem:[#allocation24_spill] sm:$0xff] }
 0x240   : > { %v3907_v51 = vpop.f32.mrf.mxu0  ;;  %4598 = vmatmul.mubr.bf16.gmra.mxu0 %v5542_v60  ;;  %v5558_v60 = vcombine.low %v381_v13, %v389_v6  ;;  %v8126_v13 = vld [vmem:[#allocation25_spill] sm:$0xff] }
 0x241   : > { %8119 = vst [vmem:[#allocation15_spill] sm:$0xff] %v7600_v48  ;;  %v4100_v7 = vpop.f32.mrf.mxu1  ;;  %4791 = vmatmul.mubr.bf16.gmra.mxu1 %v5544_v47  ;;  %v7603_v54 = vadd.f32 %v4096_v40, %v3904_v17  ;;  %v3908_v10 = vadd.f32 %v3907_v51, %v8122_v45  ;;  %4607 = vmatprep.mubr.bf16.mxu0 %v5559_v19  ;;  %v8124_v17 = vld [vmem:[#allocation23_spill] sm:$0xff] }
 0x242   : > { %4800 = vmatprep.mubr.bf16.mxu1 %v5561_v44  ;;  %v3909_v24 = vpop.f32.mrf.mxu0  ;;  %v5560_v47 = vcombine.low %v382_v30, %v390_v50  ;;  %v5575_v19 = vcombine.high %v397_v16, %v405_v49  ;;  %v5577_v44 = vcombine.high %v398_v0, %v406_v41  ;;  %v7618_v30 = vld [vmem:[#allocation2 + $0x3b0] sm:$0xff] }
 0x243   : > { %8121 = vst [vmem:[#allocation16_spill] sm:$0xff] %v7603_v54  ;;  %v4102_v29 = vpop.f32.mrf.mxu1  ;;  %v7606_v28 = vadd.f32 %v4100_v7, %v3908_v10  ;;  %v3910_v15 = vadd.f32 %v3909_v24, %v8123_v27  ;;  %v7620_v27 = vld [vmem:[#allocation2 + $0x3f0] sm:$0xff] }
 0x244   : > { %v3911_v18 = vpop.f32.mrf.mxu0 }
 0x245   : > { %v4104_v31 = vpop.f32.mrf.mxu1  ;;  %v7609_v40 = vadd.f32 %v4102_v29, %v3910_v15  ;;  %v3912_v51 = vadd.f32 %v3911_v18, %v8124_v17  ;;  %v7622_v15 = vld [vmem:[#allocation2 + $0x3b8] sm:$0xff]  ;;  %v5576_v17 = vcombine.low %v398_v0, %v406_v41 }
 0x246   : > { %v3913_v45 = vpop.f32.mrf.mxu0 }
 0x247   : > { %v4106_v54 = vpop.f32.mrf.mxu1  ;;  %v7612_v48 = vadd.f32 %v4104_v31, %v3912_v51  ;;  %v3914_v37 = vadd.f32 %v3913_v45, %v8125_v9  ;;  %v7624_v9 = vld [vmem:[#allocation2 + $0x3f8] sm:$0xff]  ;;  %v8127_v31 = vld [vmem:[#allocation26_spill] sm:$0xff]  ;;  %v5591_v45 = vcombine.high %v7618_v30, %v7620_v27 }
 0x248   : > { %v3917_v7 = vpop.f32.mrf.mxu0  ;;  %4608 = vmatmul.mubr.bf16.gmra.mxu0 %v5558_v60 }
 0x249   : > { %v4110_v10 = vpop.f32.mrf.mxu1  ;;  %4801 = vmatmul.mubr.bf16.gmra.mxu1 %v5560_v47  ;;  %v7615_v24 = vadd.f32 %v4106_v54, %v3914_v37  ;;  %v3918_v6 = vadd.f32 %v3917_v7, %v8126_v13  ;;  %4617 = vmatprep.mubr.bf16.mxu0 %v5575_v19  ;;  %v5574_v47 = vcombine.low %v397_v16, %v405_v49  ;;  %v8128_v19 = vld [vmem:[#allocation27_spill] sm:$0xff]  ;;  %v8130_v16 = vld [vmem:[#allocation28_spill] sm:$0xff] }
 0x24a   : > { %4810 = vmatprep.mubr.bf16.mxu1 %v5577_v44  ;;  %v3919_v50 = vpop.f32.mrf.mxu0  ;;  %v5593_v7 = vcombine.high %v7622_v15, %v7624_v9  ;;  %v5054_v13 = vld [vmem:[%s6950_s11 + $0x78] sm:$0xff] }
 0x24b   : > { %v4112_v29 = vpop.f32.mrf.mxu1  ;;  %v7626_v18 = vadd.f32 %v4110_v10, %v3918_v6  ;;  %v3920_v37 = vadd.f32 %v3919_v50, %v8127_v31  ;;  %6032 = vmatprep.subr.mxu0 %v5054_v13  ;;  %6112 = vmatprep.subr.mxu1 %v5054_v13 }
 0x24c   : > { %v3921_v54 = vpop.f32.mrf.mxu0  ;;  %6033 = vmatpush3.msra.mxu0 %v5054_v13  ;;  %6128 = vmatpush3.msra.mxu1 %v5054_v13  ;;  %v7648_v13 = vld [vmem:[#allocation2 + $0x438] sm:$0xff] }
 0x24d   : > { %v4114_v60 = vpop.f32.mrf.mxu1  ;;  %v7629_v51 = vadd.f32 %v4112_v29, %v3920_v37  ;;  %v3922_v44 = vadd.f32 %v3921_v54, %v8128_v19  ;;  %v5053_v29 = vld [vmem:[%s6950_s11 + $0x70] sm:$0xff]  ;;  %v8132_v37 = vld [vmem:[#allocation29_spill] sm:$0xff] }
 0x24e   : > { %v3923_v10 = vpop.f32.mrf.mxu0  ;;  %v7644_v19 = vld [vmem:[#allocation2 + $0x430] sm:$0xff]  ;;  %6034 = vmatprep.subr.mxu0 %v5053_v29  ;;  %6113 = vmatprep.subr.mxu1 %v5053_v29 }
 0x24f   : > { %v4116_v6 = vpop.f32.mrf.mxu1  ;;  %v7637_v50 = vadd.f32 %v4114_v60, %v3922_v44  ;;  %v3924_v49 = vadd.f32 %v3923_v10, %v8130_v16  ;;  %v7646_v60 = vld [vmem:[#allocation2 + $0x470] sm:$0xff]  ;;  %v7650_v16 = vld [vmem:[#allocation2 + $0x478] sm:$0xff]  ;;  %6035 = vmatpush3.msra.mxu0 %v5053_v29  ;;  %6129 = vmatpush3.msra.mxu1 %v5053_v29 }
 0x250   : > { %v3927_v0 = vpop.f32.mrf.mxu0  ;;  %4618 = vmatmul.mubr.bf16.gmra.mxu0 %v5574_v47  ;;  %v5052_v47 = vld [vmem:[%s6950_s11 + $0x68] sm:$0xff]  ;;  %v5609_v29 = vcombine.high %v7648_v13, %v7650_v16 }
 0x251   : > { %8129 = vst [vmem:[#allocation17_spill] sm:$0xff] %v7637_v50  ;;  %v4120_v41 = vpop.f32.mrf.mxu1  ;;  %4811 = vmatmul.mubr.bf16.gmra.mxu1 %v5576_v17  ;;  %v7641_v31 = vadd.f32 %v4116_v6, %v3924_v49  ;;  %v3928_v54 = vadd.f32 %v3927_v0, %v8132_v37  ;;  %4627 = vmatprep.mubr.bf16.mxu0 %v5591_v45  ;;  %v8134_v6 = vld [vmem:[#allocation30_spill] sm:$0xff]  ;;  %v5051_v50 = vld [vmem:[%s6950_s11 + $0x60] sm:$0xff] }
 0x252   : > { %4820 = vmatprep.mubr.bf16.mxu1 %v5593_v7  ;;  %v3929_v44 = vpop.f32.mrf.mxu0  ;;  %v5590_v0 = vcombine.low %v7618_v30, %v7620_v27  ;;  %v5592_v37 = vcombine.low %v7622_v15, %v7624_v9  ;;  %6036 = vmatprep.subr.mxu0 %v5052_v47  ;;  %v8138_v9 = vld [vmem:[#allocation32_spill] sm:$0xff] }
 0x253   : > { %8131 = vst [vmem:[#allocation18_spill] sm:$0xff] %v7641_v31  ;;  %v4122_v10 = vpop.f32.mrf.mxu1  ;;  %v7653_v17 = vadd.f32 %v4120_v41, %v3928_v54  ;;  %v3930_v49 = vadd.f32 %v3929_v44, %v8134_v6  ;;  %v5607_v31 = vcombine.high %v7644_v19, %v7646_v60  ;;  %6114 = vmatprep.subr.mxu1 %v5052_v47  ;;  %v8136_v54 = vld [vmem:[#allocation31_spill] sm:$0xff] }
 0x254   : > { %v3931_v45 = vpop.f32.mrf.mxu0  ;;  %6037 = vmatpush3.msra.mxu0 %v5052_v47  ;;  %6130 = vmatpush3.msra.mxu1 %v5052_v47 }
 0x255   : > { %8133 = vst [vmem:[#allocation19_spill] sm:$0xff] %v7653_v17  ;;  %v4124_v7 = vpop.f32.mrf.mxu1  ;;  %v7663_v41 = vadd.f32 %v4122_v10, %v3930_v49  ;;  %v3932_v44 = vadd.f32 %v3931_v45, %v8136_v54  ;;  %6038 = vmatprep.subr.mxu0 %v5051_v50  ;;  %6115 = vmatprep.subr.mxu1 %v5051_v50  ;;  %v5050_v17 = vld [vmem:[%s6950_s11 + $0x58] sm:$0xff]  ;;  %v8140_v54 = vld [vmem:[#allocation33_spill] sm:$0xff] }
 0x256   : > { %v3933_v30 = vpop.f32.mrf.mxu0  ;;  %6039 = vmatpush3.msra.mxu0 %v5051_v50  ;;  %6131 = vmatpush3.msra.mxu1 %v5051_v50  ;;  %v7682_v50 = vld [vmem:[#allocation2 + $0x4f8] sm:$0xff] }
 0x257   : > { %8135 = vst [vmem:[#allocation20_spill] sm:$0xff] %v7663_v41  ;;  %v4126_v27 = vpop.f32.mrf.mxu1  ;;  %v7668_v15 = vadd.f32 %v4124_v7, %v3932_v44  ;;  %v3934_v6 = vadd.f32 %v3933_v30, %v8138_v9  ;;  %v7675_v41 = vld [vmem:[#allocation2 + $0x4b0] sm:$0xff]  ;;  %6040 = vmatprep.subr.mxu0 %v5050_v17  ;;  %6116 = vmatprep.subr.mxu1 %v5050_v17 }
 0x258   : > { %v3937_v10 = vpop.f32.mrf.mxu0  ;;  %4628 = vmatmul.mubr.bf16.gmra.mxu0 %v5590_v0  ;;  %v7677_v7 = vld [vmem:[#allocation2 + $0x4f0] sm:$0xff]  ;;  %6132 = vmatpush3.msra.mxu1 %v5050_v17 }
 0x259   : > { %8137 = vst [vmem:[#allocation21_spill] sm:$0xff] %v7668_v15  ;;  %v4130_v49 = vpop.f32.mrf.mxu1  ;;  %4821 = vmatmul.mubr.bf16.gmra.mxu1 %v5592_v37  ;;  %v7672_v45 = vadd.f32 %v4126_v27, %v3934_v6  ;;  %v3938_v47 = vadd.f32 %v3937_v10, %v8140_v54  ;;  %4637 = vmatprep.mubr.bf16.mxu0 %v5607_v31  ;;  %v5049_v44 = vld [vmem:[%s6950_s11 + $0x50] sm:$0xff]  ;;  %v7680_v15 = vld [vmem:[#allocation2 + $0x4b8] sm:$0xff]  ;;  %v5048_v31 = vld [vmem:[%s6950_s11 + $0x48] sm:$0xff] }
 0x25a   : > { %4830 = vmatprep.mubr.bf16.mxu1 %v5609_v29  ;;  %v3939_v30 = vpop.f32.mrf.mxu0  ;;  %v8142_v37 = vld [vmem:[#allocation34_spill] sm:$0xff]  ;;  %6041 = vmatpush3.msra.mxu0 %v5050_v17  ;;  %v5606_v10 = vcombine.low %v7644_v19, %v7646_v60  ;;  %v5608_v54 = vcombine.low %v7648_v13, %v7650_v16  ;;  %v5625_v17 = vcombine.high %v7680_v15, %v7682_v50  ;;  %v8145_v13 = vld [vmem:[#allocation36_spill] sm:$0xff] }
 0x25b   : > { %8139 = vst [vmem:[#allocation22_spill] sm:$0xff] %v7672_v45  ;;  %v4132_v9 = vpop.f32.mrf.mxu1  ;;  %v7684_v0 = vadd.f32 %v4130_v49, %v3938_v47  ;;  %v3940_v27 = vadd.f32 %v3939_v30, %v8142_v37  ;;  %v5623_v45 = vcombine.high %v7675_v41, %v7677_v7  ;;  %6042 = vmatprep.subr.mxu0 %v5049_v44  ;;  %v8143_v47 = vld [vmem:[#allocation35_spill] sm:$0xff] }
 0x25c   : > { %v3941_v29 = vpop.f32.mrf.mxu0  ;;  %6117 = vmatprep.subr.mxu1 %v5049_v44  ;;  %6043 = vmatpush3.msra.mxu0 %v5049_v44 }
 0x25d   : > { %8141 = vst [vmem:[#allocation23_spill] sm:$0xff] %v7684_v0  ;;  %v4134_v6 = vpop.f32.mrf.mxu1  ;;  %v7694_v49 = vadd.f32 %v4132_v9, %v3940_v27  ;;  %v3942_v30 = vadd.f32 %v3941_v29, %v8143_v47  ;;  %6133 = vmatpush3.msra.mxu1 %v5049_v44  ;;  %6044 = vmatprep.subr.mxu0 %v5048_v31  ;;  %v5047_v0 = vld [vmem:[%s6950_s11 + $0x40] sm:$0xff]  ;;  %v7706_v47 = vld [vmem:[#allocation2 + $0x530] sm:$0xff] }
 0x25e   : > { %v3943_v37 = vpop.f32.mrf.mxu0  ;;  %6118 = vmatprep.subr.mxu1 %v5048_v31  ;;  %6045 = vmatpush3.msra.mxu0 %v5048_v31 }
 0x25f   : > { %v4136_v19 = vpop.f32.mrf.mxu1  ;;  %v7699_v60 = vadd.f32 %v4134_v6, %v3942_v30  ;;  %v3944_v16 = vadd.f32 %v3943_v37, %v8145_v13  ;;  %6134 = vmatpush3.msra.mxu1 %v5048_v31  ;;  %v7708_v6 = vld [vmem:[#allocation2 + $0x570] sm:$0xff]  ;;  %v5046_v30 = vld [vmem:[%s6950_s11 + $0x38] sm:$0xff]  ;;  %6046 = vmatprep.subr.mxu0 %v5047_v0 }
 0x260   : > { %v4173_v9 = vpop.f32.mrf.mxu0  ;;  %4638 = vmatmul.mubr.bf16.gmra.mxu0 %v5606_v10  ;;  %v7713_v31 = vld [vmem:[#allocation2 + $0x578] sm:$0xff]  ;;  %6119 = vmatprep.subr.mxu1 %v5047_v0 }
 0x261   : > { %8144 = vst [vmem:[#allocation24_spill] sm:$0xff] %v7699_v60  ;;  %v4366_v27 = vpop.f32.mrf.mxu1  ;;  %4831 = vmatmul.mubr.bf16.gmra.mxu1 %v5608_v54  ;;  %v7703_v29 = vadd.f32 %v4136_v19, %v3944_v16  ;;  %v4174_v44 = vadd.f32 %v4173_v9, %v7462_v20  ;;  %4647 = vmatprep.mubr.bf16.mxu0 %v5623_v45  ;;  %v7711_v60 = vld [vmem:[#allocation2 + $0x538] sm:$0xff]  ;;  %v5045_v20 = vld [vmem:[%s6950_s11 + $0x30] sm:$0xff] }
 0x262   : > { %4840 = vmatprep.mubr.bf16.mxu1 %v5625_v17  ;;  %v4175_v37 = vpop.f32.mrf.mxu0  ;;  %6047 = vmatpush3.msra.mxu0 %v5047_v0  ;;  %v5622_v19 = vcombine.low %v7675_v41, %v7677_v7  ;;  %v5624_v16 = vcombine.low %v7680_v15, %v7682_v50  ;;  %v5639_v9 = vcombine.high %v7706_v47, %v7708_v6  ;;  %v5044_v50 = vld [vmem:[%s6950_s11 + $0x28] sm:$0xff] }
 0x263   : > { %v4368_v13 = vpop.f32.mrf.mxu1  ;;  %v7715_v10 = vadd.f32 %v4366_v27, %v4174_v44  ;;  %v4176_v54 = vadd.f32 %v4175_v37, %v7465_v33  ;;  %6135 = vmatpush3.msra.mxu1 %v5047_v0  ;;  %6048 = vmatprep.subr.mxu0 %v5046_v30  ;;  %v5641_v0 = vcombine.high %v7711_v60, %v7713_v31 }
 0x264   : > { %v4177_v45 = vpop.f32.mrf.mxu0  ;;  %6120 = vmatprep.subr.mxu1 %v5046_v30  ;;  %6049 = vmatpush3.msra.mxu0 %v5046_v30 }
 0x265   : > { %v4370_v17 = vpop.f32.mrf.mxu1  ;;  %v7725_v27 = vadd.f32 %v4368_v13, %v4176_v54  ;;  %v4178_v33 = vadd.f32 %v4177_v45, %v7468_v63  ;;  %6136 = vmatpush3.msra.mxu1 %v5046_v30  ;;  %6050 = vmatprep.subr.mxu0 %v5045_v20  ;;  %v7737_v54 = vld [vmem:[#allocation2 + $0x5b0] sm:$0xff] }
 0x266   : > { %v4179_v44 = vpop.f32.mrf.mxu0  ;;  %6121 = vmatprep.subr.mxu1 %v5045_v20  ;;  %6051 = vmatpush3.msra.mxu0 %v5045_v20  ;;  %v7739_v45 = vld [vmem:[#allocation2 + $0x5f0] sm:$0xff] }
 0x267   : > { %v4372_v41 = vpop.f32.mrf.mxu1  ;;  %v7730_v15 = vadd.f32 %v4370_v17, %v4178_v33  ;;  %v4180_v7 = vadd.f32 %v4179_v44, %v7471_v26  ;;  %6137 = vmatpush3.msra.mxu1 %v5045_v20  ;;  %v5043_v17 = vld [vmem:[%s6950_s11 + $0x20] sm:$0xff]  ;;  %v7742_v44 = vld [vmem:[#allocation2 + $0x5b8] sm:$0xff]  ;;  %6052 = vmatprep.subr.mxu0 %v5044_v50 }
 0x268   : > { %v4183_v37 = vpop.f32.mrf.mxu0  ;;  %4648 = vmatmul.mubr.bf16.gmra.mxu0 %v5622_v19  ;;  %v7744_v20 = vld [vmem:[#allocation2 + $0x5f8] sm:$0xff]  ;;  %6122 = vmatprep.subr.mxu1 %v5044_v50 }
 0x269   : > { %v4376_v13 = vpop.f32.mrf.mxu1  ;;  %4841 = vmatmul.mubr.bf16.gmra.mxu1 %v5624_v16  ;;  %v7734_v63 = vadd.f32 %v4372_v41, %v4180_v7  ;;  %v4184_v30 = vadd.f32 %v4183_v37, %v7474_v32  ;;  %4657 = vmatprep.mubr.bf16.mxu0 %v5639_v9  ;;  %v5042_v32 = vld [vmem:[%s6950_s11 + $0x18] sm:$0xff]  ;;  %v5638_v41 = vcombine.low %v7706_v47, %v7708_v6 }
 0x26a   : > { %4850 = vmatprep.mubr.bf16.mxu1 %v5641_v0  ;;  %v4185_v26 = vpop.f32.mrf.mxu0  ;;  %6053 = vmatpush3.msra.mxu0 %v5044_v50  ;;  %v5640_v7 = vcombine.low %v7711_v60, %v7713_v31  ;;  %v5655_v37 = vcombine.high %v7737_v54, %v7739_v45  ;;  %v5041_v31 = vld [vmem:[%s6950_s11 + $0x10] sm:$0xff] }
 0x26b   : > { %v4378_v33 = vpop.f32.mrf.mxu1  ;;  %v7746_v19 = vadd.f32 %v4376_v13, %v4184_v30  ;;  %v4186_v16 = vadd.f32 %v4185_v26, %v7477_v5  ;;  %6138 = vmatpush3.msra.mxu1 %v5044_v50  ;;  %6054 = vmatprep.subr.mxu0 %v5043_v17  ;;  %v5657_v50 = vcombine.high %v7742_v44, %v7744_v20 }
 0x26c   : > { %v4187_v9 = vpop.f32.mrf.mxu0  ;;  %6123 = vmatprep.subr.mxu1 %v5043_v17  ;;  %6055 = vmatpush3.msra.mxu0 %v5043_v17 }
 0x26d   : > { %v4380_v0 = vpop.f32.mrf.mxu1  ;;  %v7756_v13 = vadd.f32 %v4378_v33, %v4186_v16  ;;  %v4188_v5 = vadd.f32 %v4187_v9, %v7480_v21  ;;  %6139 = vmatpush3.msra.mxu1 %v5043_v17  ;;  %6056 = vmatprep.subr.mxu0 %v5042_v32  ;;  %v7768_v16 = vld [vmem:[#allocation2 + $0x630] sm:$0xff] }
 0x26e   : > { %v4189_v30 = vpop.f32.mrf.mxu0  ;;  %6124 = vmatprep.subr.mxu1 %v5042_v32  ;;  %6057 = vmatpush3.msra.mxu0 %v5042_v32  ;;  %v7770_v9 = vld [vmem:[#allocation2 + $0x670] sm:$0xff] }
 0x26f   : > { %v4382_v47 = vpop.f32.mrf.mxu1  ;;  %v7761_v60 = vadd.f32 %v4380_v0, %v4188_v5  ;;  %v4190_v6 = vadd.f32 %v4189_v30, %v7483_v46  ;;  %6140 = vmatpush3.msra.mxu1 %v5042_v32  ;;  %v5040_v0 = vld [vmem:[%s6950_s11 + $0x8] sm:$0xff]  ;;  %v494_v30 = vld [vmem:[#allocation2 + $0x638] sm:$0xff]  ;;  %6058 = vmatprep.subr.mxu0 %v5041_v31 }
 0x270   : > { %v4193_v26 = vpop.f32.mrf.mxu0  ;;  %4658 = vmatmul.mubr.bf16.gmra.mxu0 %v5638_v41  ;;  %v502_v32 = vld [vmem:[#allocation2 + $0x678] sm:$0xff]  ;;  %6125 = vmatprep.subr.mxu1 %v5041_v31 }
 0x271   : > { %v4386_v33 = vpop.f32.mrf.mxu1  ;;  %4851 = vmatmul.mubr.bf16.gmra.mxu1 %v5640_v7  ;;  %v7765_v21 = vadd.f32 %v4382_v47, %v4190_v6  ;;  %v4194_v17 = vadd.f32 %v4193_v26, %v7486_v36  ;;  %4667 = vmatprep.mubr.bf16.mxu0 %v5655_v37  ;;  %v5039_v47 = vld [vmem:[%s6950_s11] sm:$0xff]  ;;  %v5656_v6 = vcombine.low %v7742_v44, %v7744_v20 }
 0x272   : > { %4860 = vmatprep.mubr.bf16.mxu1 %v5657_v50  ;;  %v4195_v46 = vpop.f32.mrf.mxu0  ;;  %6059 = vmatpush3.msra.mxu0 %v5041_v31  ;;  %v5654_v50 = vcombine.low %v7737_v54, %v7739_v45  ;;  %v5671_v26 = vcombine.high %v7768_v16, %v7770_v9 }
 0x273   : > { %v4388_v5 = vpop.f32.mrf.mxu1  ;;  %v7773_v41 = vadd.f32 %v4386_v33, %v4194_v17  ;;  %v4196_v7 = vadd.f32 %v4195_v46, %v7489_v39  ;;  %6141 = vmatpush3.msra.mxu1 %v5041_v31  ;;  %6060 = vmatprep.subr.mxu0 %v5040_v0  ;;  %v5673_v17 = vcombine.high %v494_v30, %v502_v32 }
 0x274   : > { %v4197_v36 = vpop.f32.mrf.mxu0  ;;  %6126 = vmatprep.subr.mxu1 %v5040_v0  ;;  %6061 = vmatpush3.msra.mxu0 %v5040_v0 }
 0x275   : > { %v4390_v37 = vpop.f32.mrf.mxu1  ;;  %v7783_v33 = vadd.f32 %v4388_v5, %v4196_v7  ;;  %v4198_v39 = vadd.f32 %v4197_v36, %v7492_v14  ;;  %6142 = vmatpush3.msra.mxu1 %v5040_v0  ;;  %6062 = vmatprep.subr.mxu0 %v5039_v47  ;;  %v509_v0 = vld [vmem:[#allocation2 + $0x6b0] sm:$0xff] }
 0x276   : > { %v4199_v31 = vpop.f32.mrf.mxu0  ;;  %6127 = vmatprep.subr.mxu1 %v5039_v47  ;;  %6063 = vmatpush3.msra.mxu0 %v5039_v47 }
 0x277   : > { %8146 = vst [vmem:[#allocation25_spill] sm:$0xff] %v7783_v33  ;;  %v4392_v46 = vpop.f32.mrf.mxu1  ;;  %v7786_v54 = vadd.f32 %v4390_v37, %v4198_v39  ;;  %v4200_v45 = vadd.f32 %v4199_v31, %v7495_v2  ;;  %6143 = vmatpush3.msra.mxu1 %v5039_v47  ;;  %v517_v33 = vld [vmem:[#allocation2 + $0x6f0] sm:$0xff]  ;;  %v510_v37 = vld [vmem:[#allocation2 + $0x6b8] sm:$0xff] }
 0x278   : > { %v4203_v44 = vpop.f32.mrf.mxu0  ;;  %4668 = vmatmul.mubr.bf16.gmra.mxu0 %v5654_v50  ;;  %v518_v39 = vld [vmem:[#allocation2 + $0x6f8] sm:$0xff]  ;;  %v5670_v50 = vcombine.low %v7768_v16, %v7770_v9  ;;  %v525_v9 = vld [vmem:[#allocation2 + $0x730] sm:$0xff] }
 0x279   : > { %8147 = vst [vmem:[#allocation26_spill] sm:$0xff] %v7786_v54  ;;  %v4396_v20 = vpop.f32.mrf.mxu1  ;;  %4861 = vmatmul.mubr.bf16.gmra.mxu1 %v5656_v6  ;;  %v7789_v5 = vadd.f32 %v4392_v46, %v4200_v45  ;;  %v4204_v14 = vadd.f32 %v4203_v44, %v7498_v56  ;;  %4677 = vmatprep.mubr.bf16.mxu0 %v5671_v26 }
 0x27a   : > { %4870 = vmatprep.mubr.bf16.mxu1 %v5673_v17  ;;  %v4205_v7 = vpop.f32.mrf.mxu0  ;;  %v5672_v6 = vcombine.low %v494_v30, %v502_v32  ;;  %v5687_v26 = vcombine.high %v509_v0, %v517_v33  ;;  %v5689_v17 = vcombine.high %v510_v37, %v518_v39  ;;  %v533_v32 = vld [vmem:[#allocation2 + $0x770] sm:$0xff] }
 0x27b   : > { %8148 = vst [vmem:[#allocation27_spill] sm:$0xff] %v7789_v5  ;;  %v4398_v36 = vpop.f32.mrf.mxu1  ;;  %v7792_v54 = vadd.f32 %v4396_v20, %v4204_v14  ;;  %v4206_v2 = vadd.f32 %v4205_v7, %v7501_v59 }
 0x27c   : > { %v4207_v47 = vpop.f32.mrf.mxu0 }
 0x27d   : > { %v4400_v31 = vpop.f32.mrf.mxu1  ;;  %v7797_v46 = vadd.f32 %v4398_v36, %v4206_v2  ;;  %v4208_v56 = vadd.f32 %v4207_v47, %v7504_v3  ;;  %v526_v36 = vld [vmem:[#allocation2 + $0x738] sm:$0xff] }
 0x27e   : > { %v4209_v45 = vpop.f32.mrf.mxu0  ;;  %v534_v2 = vld [vmem:[#allocation2 + $0x778] sm:$0xff] }
 0x27f   : > { %v4402_v44 = vpop.f32.mrf.mxu1  ;;  %v7800_v5 = vadd.f32 %v4400_v31, %v4208_v56  ;;  %v4210_v20 = vadd.f32 %v4209_v45, %v7507_v23  ;;  %v5703_v45 = vcombine.high %v525_v9, %v533_v32 }
 0x280   : > { %v4213_v14 = vpop.f32.mrf.mxu0  ;;  %4678 = vmatmul.mubr.bf16.gmra.mxu0 %v5670_v50  ;;  %v5686_v50 = vcombine.low %v509_v0, %v517_v33  ;;  %v541_v33 = vld [vmem:[#allocation2 + $0x7b0] sm:$0xff] }
 0x281   : > { %v4406_v59 = vpop.f32.mrf.mxu1  ;;  %4871 = vmatmul.mubr.bf16.gmra.mxu1 %v5672_v6  ;;  %v7803_v7 = vadd.f32 %v4402_v44, %v4210_v20  ;;  %v4214_v16 = vadd.f32 %v4213_v14, %v7510_v12  ;;  %4687 = vmatprep.mubr.bf16.mxu0 %v5687_v26  ;;  %v5688_v6 = vcombine.low %v510_v37, %v518_v39  ;;  %v549_v37 = vld [vmem:[#allocation2 + $0x7f0] sm:$0xff]  ;;  %v542_v39 = vld [vmem:[#allocation2 + $0x7b8] sm:$0xff] }
 0x282   : > { %4880 = vmatprep.mubr.bf16.mxu1 %v5689_v17  ;;  %v7806_v3 = vpop.f32.mrf.mxu0  ;;  %v5705_v12 = vcombine.high %v526_v36, %v534_v2 }
 0x283   : > { %v7808_v30 = vpop.f32.mrf.mxu1  ;;  %v7810_v47 = vadd.f32 %v4406_v59, %v4214_v16  ;;  %v550_v16 = vld [vmem:[#allocation2 + $0x7f8] sm:$0xff] }
 0x284   : > { %v4217_v23 = vpop.f32.mrf.mxu0 }
 0x285   : > { %v4410_v31 = vpop.f32.mrf.mxu1  ;;  %v4218_v56 = vadd.f32 %v4217_v23, %v7516_v52 }
 0x286   : > { %v7813_v26 = vpop.f32.mrf.mxu0 }
 0x287   : > { %v7815_v17 = vpop.f32.mrf.mxu1  ;;  %v7817_v44 = vadd.f32 %v4410_v31, %v4218_v56 }
 0x288   : > { %8149 = vst [vmem:[#allocation28_spill] sm:$0xff] %v7815_v17  ;;  %v4223_v20 = vpop.f32.mrf.mxu0  ;;  %4688 = vmatmul.mubr.bf16.gmra.mxu0 %v5686_v50  ;;  %v5704_v17 = vcombine.low %v526_v36, %v534_v2 }
 0x289   : > { %8150 = vst [vmem:[#allocation29_spill] sm:$0xff] %v7817_v44  ;;  %v4416_v14 = vpop.f32.mrf.mxu1  ;;  %4881 = vmatmul.mubr.bf16.gmra.mxu1 %v5688_v6  ;;  %v4224_v59 = vadd.f32 %v4223_v20, %v7522_v35  ;;  %4697 = vmatprep.mubr.bf16.mxu0 %v5703_v45  ;;  %v5702_v44 = vcombine.low %v525_v9, %v533_v32 }
 0x28a   : > { %4890 = vmatprep.mubr.bf16.mxu1 %v5705_v12  ;;  %v7820_v0 = vpop.f32.mrf.mxu0  ;;  %v5719_v6 = vcombine.high %v541_v33, %v549_v37  ;;  %v5721_v35 = vcombine.high %v542_v39, %v550_v16 }
 0x28b   : > { %8151 = vst [vmem:[#allocation30_spill] sm:$0xff] %v7820_v0  ;;  %v7822_v52 = vpop.f32.mrf.mxu1  ;;  %v7824_v23 = vadd.f32 %v4416_v14, %v4224_v59  ;;  %v5718_v59 = vcombine.low %v541_v33, %v549_v37 }
 0x28c   : > { %8152 = vst [vmem:[#allocation31_spill] sm:$0xff] %v7822_v52  ;;  %v4227_v31 = vpop.f32.mrf.mxu0 }
 0x28d   : > { %v4420_v56 = vpop.f32.mrf.mxu1  ;;  %v4228_v50 = vadd.f32 %v4227_v31, %v7528_v42  ;;  %v5720_v31 = vcombine.low %v542_v39, %v550_v16 }
 0x28e   : > { %v7827_v45 = vpop.f32.mrf.mxu0 }
 0x28f   : > { %v7829_v12 = vpop.f32.mrf.mxu1  ;;  %v7831_v20 = vadd.f32 %v4420_v56, %v4228_v50 }
 0x290   : > { %v4233_v52 = vpop.f32.mrf.mxu0  ;;  %4698 = vmatmul.mubr.bf16.gmra.mxu0 %v5702_v44 }
 0x291   : > { %v4426_v0 = vpop.f32.mrf.mxu1  ;;  %4891 = vmatmul.mubr.bf16.gmra.mxu1 %v5704_v17  ;;  %v4234_v14 = vadd.f32 %v4233_v52, %v7534_v61  ;;  %4707 = vmatprep.mubr.bf16.mxu0 %v5719_v6 }
 0x292   : > { %4900 = vmatprep.mubr.bf16.mxu1 %v5721_v35  ;;  %v7834_v9 = vpop.f32.mrf.mxu0 }
 0x293   : > { %v7836_v32 = vpop.f32.mrf.mxu1  ;;  %v7838_v42 = vadd.f32 %v4426_v0, %v4234_v14 }
 0x294   : > { %v4237_v36 = vpop.f32.mrf.mxu0 }
 0x295   : > { %v4430_v2 = vpop.f32.mrf.mxu1  ;;  %v4238_v56 = vadd.f32 %v4237_v36, %v7540_v4 }
 0x296   : > { %v7841_v50 = vpop.f32.mrf.mxu0 }
 0x297   : > { %v7843_v44 = vpop.f32.mrf.mxu1  ;;  %v7845_v17 = vadd.f32 %v4430_v2, %v4238_v56 }
 0x298   : > { %v4243_v61 = vpop.f32.mrf.mxu0  ;;  %4708 = vmatmul.mubr.bf16.gmra.mxu0 %v5718_v59 }
 0x299   : > { %v4436_v52 = vpop.f32.mrf.mxu1  ;;  %4901 = vmatmul.mubr.bf16.gmra.mxu1 %v5720_v31  ;;  %v4244_v6 = vadd.f32 %v4243_v61, %v7546_v22 }
 0x29a   : > { %v7848_v0 = vpop.f32.mrf.mxu0 }
 0x29b   : > { %v7850_v35 = vpop.f32.mrf.mxu1  ;;  %v7852_v33 = vadd.f32 %v4436_v52, %v4244_v6 }
 0x29c   : > { %8153 = vst [vmem:[#allocation32_spill] sm:$0xff] %v7850_v35  ;;  %v4247_v37 = vpop.f32.mrf.mxu0 }
 0x29d   : > { %8154 = vst [vmem:[#allocation33_spill] sm:$0xff] %v7852_v33  ;;  %v4440_v4 = vpop.f32.mrf.mxu1  ;;  %v4248_v39 = vadd.f32 %v4247_v37, %v7552_v11 }
 0x29e   : > { %v7855_v16 = vpop.f32.mrf.mxu0 }
 0x29f   : > { %v7857_v14 = vpop.f32.mrf.mxu1  ;;  %v7859_v36 = vadd.f32 %v4440_v4, %v4248_v39 }
 0x2a0   : > { %8155 = vst [vmem:[#allocation34_spill] sm:$0xff] %v7857_v14  ;;  %v4253_v2 = vpop.f32.mrf.mxu0 }
 0x2a1   : > { %8156 = vst [vmem:[#allocation35_spill] sm:$0xff] %v7859_v36  ;;  %v4446_v59 = vpop.f32.mrf.mxu1  ;;  %v4254_v22 = vadd.f32 %v4253_v2, %v7558_v53 }
 0x2a2   : > { %v4255_v31 = vpop.f32.mrf.mxu0 }
 0x2a3   : > { %v4448_v56 = vpop.f32.mrf.mxu1  ;;  %v7862_v61 = vadd.f32 %v4446_v59, %v4254_v22  ;;  %v4256_v52 = vadd.f32 %v4255_v31, %v7561_v58 }
 0x2a4   : > { %v4257_v6 = vpop.f32.mrf.mxu0 }
 0x2a5   : > { %v4450_v33 = vpop.f32.mrf.mxu1  ;;  %v7865_v35 = vadd.f32 %v4448_v56, %v4256_v52  ;;  %v4258_v11 = vadd.f32 %v4257_v6, %v7564_v43 }
 0x2a6   : > { %v4259_v37 = vpop.f32.mrf.mxu0 }
 0x2a7   : > { %v4452_v14 = vpop.f32.mrf.mxu1  ;;  %v7868_v4 = vadd.f32 %v4450_v33, %v4258_v11  ;;  %v4260_v39 = vadd.f32 %v4259_v37, %v7567_v57 }
 0x2a8   : > { %v4263_v36 = vpop.f32.mrf.mxu0 }
 0x2a9   : > { %v4456_v53 = vpop.f32.mrf.mxu1  ;;  %v7871_v2 = vadd.f32 %v4452_v14, %v4260_v39  ;;  %v4264_v59 = vadd.f32 %v4263_v36, %v7570_v25 }
 0x2aa   : > { %v4265_v22 = vpop.f32.mrf.mxu0 }
 0x2ab   : > { %v4458_v58 = vpop.f32.mrf.mxu1  ;;  %v7874_v31 = vadd.f32 %v4456_v53, %v4264_v59  ;;  %v4266_v56 = vadd.f32 %v4265_v22, %v7573_v34 }
 0x2ac   : > { %v4267_v52 = vpop.f32.mrf.mxu0 }
 0x2ad   : > { %v4460_v43 = vpop.f32.mrf.mxu1  ;;  %v7877_v6 = vadd.f32 %v4458_v58, %v4266_v56  ;;  %v4268_v33 = vadd.f32 %v4267_v52, %v7576_v62 }
 0x2ae   : > { %v4269_v11 = vpop.f32.mrf.mxu0 }
 0x2af   : > { %v4462_v57 = vpop.f32.mrf.mxu1  ;;  %v7880_v37 = vadd.f32 %v4460_v43, %v4268_v33  ;;  %v4270_v14 = vadd.f32 %v4269_v11, %v7579_v55 }
 0x2b0   : > { %v4273_v39 = vpop.f32.mrf.mxu0 }
 0x2b1   : > { %v4466_v25 = vpop.f32.mrf.mxu1  ;;  %v7883_v36 = vadd.f32 %v4462_v57, %v4270_v14  ;;  %v4274_v53 = vadd.f32 %v4273_v39, %v7582_v8  ;;  %v8161_v57 = vld [vmem:[#allocation12_spill] sm:$0xff] }
 0x2b2   : > { %v4275_v59 = vpop.f32.mrf.mxu0 }
 0x2b3   : > { %8157 = vst [vmem:[#allocation36_spill] sm:$0xff] %v7883_v36  ;;  %v4468_v34 = vpop.f32.mrf.mxu1  ;;  %v7886_v22 = vadd.f32 %v4466_v25, %v4274_v53  ;;  %v4276_v58 = vadd.f32 %v4275_v59, %v7585_v1  ;;  %v8163_v25 = vld [vmem:[#allocation13_spill] sm:$0xff] }
 0x2b4   : > { %v4277_v56 = vpop.f32.mrf.mxu0 }
 0x2b5   : > { %8158 = vst [vmem:[#allocation45_spill] sm:$0xff] %v7886_v22  ;;  %v4470_v62 = vpop.f32.mrf.mxu1  ;;  %v7889_v52 = vadd.f32 %v4468_v34, %v4276_v58  ;;  %v4278_v43 = vadd.f32 %v4277_v56, %v7588_v38  ;;  %v8164_v34 = vld [vmem:[#allocation14_spill] sm:$0xff] }
 0x2b6   : > { %v4279_v33 = vpop.f32.mrf.mxu0 }
 0x2b7   : > { %8159 = vst [vmem:[#allocation46_spill] sm:$0xff] %v7889_v52  ;;  %v4472_v55 = vpop.f32.mrf.mxu1  ;;  %v7892_v11 = vadd.f32 %v4470_v62, %v4278_v43  ;;  %v4280_v14 = vadd.f32 %v4279_v33, %v8161_v57  ;;  %v8165_v62 = vld [vmem:[#allocation15_spill] sm:$0xff] }
 0x2b8   : > { %v4283_v36 = vpop.f32.mrf.mxu0 }
 0x2b9   : > { %8160 = vst [vmem:[#allocation47_spill] sm:$0xff] %v7892_v11  ;;  %v4476_v8 = vpop.f32.mrf.mxu1  ;;  %v7895_v39 = vadd.f32 %v4472_v55, %v4280_v14  ;;  %v4284_v53 = vadd.f32 %v4283_v36, %v8163_v25  ;;  %v8166_v55 = vld [vmem:[#allocation16_spill] sm:$0xff] }
 0x2ba   : > { %v4285_v22 = vpop.f32.mrf.mxu0 }
 0x2bb   : > { %8162 = vst [vmem:[#allocation12_spill] sm:$0xff] %v7895_v39  ;;  %v4478_v1 = vpop.f32.mrf.mxu1  ;;  %v7898_v59 = vadd.f32 %v4476_v8, %v4284_v53  ;;  %v4286_v58 = vadd.f32 %v4285_v22, %v8164_v34 }
 0x2bc   : > { %v4287_v52 = vpop.f32.mrf.mxu0 }
 0x2bd   : > { %v4480_v38 = vpop.f32.mrf.mxu1  ;;  %v7901_v56 = vadd.f32 %v4478_v1, %v4286_v58  ;;  %v4288_v43 = vadd.f32 %v4287_v52, %v8165_v62 }
 0x2be   : > { %v4289_v11 = vpop.f32.mrf.mxu0 }
 0x2bf   : > { %v4482_v33 = vpop.f32.mrf.mxu1  ;;  %v7904_v57 = vadd.f32 %v4480_v38, %v4288_v43  ;;  %v4290_v14 = vadd.f32 %v4289_v11, %v8166_v55 }
 0x2c0   : > { %v4293_v39 = vpop.f32.mrf.mxu0 }
 0x2c1   : > { %v4486_v36 = vpop.f32.mrf.mxu1  ;;  %v7907_v25 = vadd.f32 %v4482_v33, %v4290_v14  ;;  %v4294_v8 = vadd.f32 %v4293_v39, %v7606_v28 }
 0x2c2   : > { %v4295_v53 = vpop.f32.mrf.mxu0 }
 0x2c3   : > { %v4488_v22 = vpop.f32.mrf.mxu1  ;;  %v7910_v34 = vadd.f32 %v4486_v36, %v4294_v8  ;;  %v4296_v1 = vadd.f32 %v4295_v53, %v7609_v40 }
 0x2c4   : > { %v4297_v58 = vpop.f32.mrf.mxu0 }
 0x2c5   : > { %v4490_v52 = vpop.f32.mrf.mxu1  ;;  %v7913_v62 = vadd.f32 %v4488_v22, %v4296_v1  ;;  %v4298_v38 = vadd.f32 %v4297_v58, %v7612_v48 }
 0x2c6   : > { %v4299_v43 = vpop.f32.mrf.mxu0 }
 0x2c7   : > { %v4492_v11 = vpop.f32.mrf.mxu1  ;;  %v7916_v55 = vadd.f32 %v4490_v52, %v4298_v38  ;;  %v4300_v33 = vadd.f32 %v4299_v43, %v7615_v24  ;;  %v8171_v52 = vld [vmem:[#allocation17_spill] sm:$0xff] }
 0x2c8   : > { %v4303_v14 = vpop.f32.mrf.mxu0 }
 0x2c9   : > { %8167 = vst [vmem:[#allocation13_spill] sm:$0xff] %v7916_v55  ;;  %v4496_v28 = vpop.f32.mrf.mxu1  ;;  %v7919_v39 = vadd.f32 %v4492_v11, %v4300_v33  ;;  %v4304_v36 = vadd.f32 %v4303_v14, %v7626_v18  ;;  %v8173_v11 = vld [vmem:[#allocation18_spill] sm:$0xff] }
 0x2ca   : > { %v4305_v8 = vpop.f32.mrf.mxu0 }
 0x2cb   : > { %8168 = vst [vmem:[#allocation14_spill] sm:$0xff] %v7919_v39  ;;  %v4498_v40 = vpop.f32.mrf.mxu1  ;;  %v7922_v53 = vadd.f32 %v4496_v28, %v4304_v36  ;;  %v4306_v22 = vadd.f32 %v4305_v8, %v7629_v51  ;;  %v8175_v28 = vld [vmem:[#allocation19_spill] sm:$0xff] }
 0x2cc   : > { %v4307_v1 = vpop.f32.mrf.mxu0 }
 0x2cd   : > { %8169 = vst [vmem:[#allocation15_spill] sm:$0xff] %v7922_v53  ;;  %v4500_v48 = vpop.f32.mrf.mxu1  ;;  %v7925_v58 = vadd.f32 %v4498_v40, %v4306_v22  ;;  %v4308_v38 = vadd.f32 %v4307_v1, %v8171_v52  ;;  %v8177_v40 = vld [vmem:[#allocation20_spill] sm:$0xff] }
 0x2ce   : > { %v4309_v55 = vpop.f32.mrf.mxu0 }
 0x2cf   : > { %8170 = vst [vmem:[#allocation16_spill] sm:$0xff] %v7925_v58  ;;  %v4502_v24 = vpop.f32.mrf.mxu1  ;;  %v7928_v43 = vadd.f32 %v4500_v48, %v4308_v38  ;;  %v4310_v33 = vadd.f32 %v4309_v55, %v8173_v11  ;;  %v8178_v48 = vld [vmem:[#allocation21_spill] sm:$0xff] }
 0x2d0   : > { %v4313_v39 = vpop.f32.mrf.mxu0 }
 0x2d1   : > { %8172 = vst [vmem:[#allocation17_spill] sm:$0xff] %v7928_v43  ;;  %v4506_v18 = vpop.f32.mrf.mxu1  ;;  %v7931_v14 = vadd.f32 %v4502_v24, %v4310_v33  ;;  %v4314_v36 = vadd.f32 %v4313_v39, %v8175_v28  ;;  %v8180_v24 = vld [vmem:[#allocation22_spill] sm:$0xff] }
 0x2d2   : > { %v4315_v53 = vpop.f32.mrf.mxu0 }
 0x2d3   : > { %8174 = vst [vmem:[#allocation18_spill] sm:$0xff] %v7931_v14  ;;  %v4508_v51 = vpop.f32.mrf.mxu1  ;;  %v7934_v8 = vadd.f32 %v4506_v18, %v4314_v36  ;;  %v4316_v22 = vadd.f32 %v4315_v53, %v8177_v40  ;;  %v8181_v18 = vld [vmem:[#allocation23_spill] sm:$0xff] }
 0x2d4   : > { %v4317_v58 = vpop.f32.mrf.mxu0 }
 0x2d5   : > { %8176 = vst [vmem:[#allocation19_spill] sm:$0xff] %v7934_v8  ;;  %v4510_v1 = vpop.f32.mrf.mxu1  ;;  %v7937_v52 = vadd.f32 %v4508_v51, %v4316_v22  ;;  %v4318_v38 = vadd.f32 %v4317_v58, %v8178_v48 }
 0x2d6   : > { %v4319_v43 = vpop.f32.mrf.mxu0 }
 0x2d7   : > { %v4512_v55 = vpop.f32.mrf.mxu1  ;;  %v7940_v11 = vadd.f32 %v4510_v1, %v4318_v38  ;;  %v4320_v33 = vadd.f32 %v4319_v43, %v8180_v24  ;;  %v8184_v1 = vld [vmem:[#allocation24_spill] sm:$0xff] }
 0x2d8   : > { %v4323_v14 = vpop.f32.mrf.mxu0 }
 0x2d9   : > { %8179 = vst [vmem:[#allocation20_spill] sm:$0xff] %v7940_v11  ;;  %v4516_v39 = vpop.f32.mrf.mxu1  ;;  %v7943_v28 = vadd.f32 %v4512_v55, %v4320_v33  ;;  %v4324_v36 = vadd.f32 %v4323_v14, %v8181_v18 }
 0x2da   : > { %v4325_v8 = vpop.f32.mrf.mxu0 }
 0x2db   : > { %v4518_v53 = vpop.f32.mrf.mxu1  ;;  %v7946_v40 = vadd.f32 %v4516_v39, %v4324_v36  ;;  %v4326_v51 = vadd.f32 %v4325_v8, %v7694_v49 }
 0x2dc   : > { %v4327_v22 = vpop.f32.mrf.mxu0 }
 0x2dd   : > { %8182 = vst [vmem:[#allocation21_spill] sm:$0xff] %v7946_v40  ;;  %v4520_v58 = vpop.f32.mrf.mxu1  ;;  %v7949_v48 = vadd.f32 %v4518_v53, %v4326_v51  ;;  %v4328_v38 = vadd.f32 %v4327_v22, %v8184_v1 }
 0x2de   : > { %v4329_v11 = vpop.f32.mrf.mxu0 }
 0x2df   : > { %8183 = vst [vmem:[#allocation22_spill] sm:$0xff] %v7949_v48  ;;  %v4522_v43 = vpop.f32.mrf.mxu1  ;;  %v7952_v24 = vadd.f32 %v4520_v58, %v4328_v38  ;;  %v4330_v55 = vadd.f32 %v4329_v11, %v7703_v29 }
 0x2e0   : > { %v4559_v33 = vpop.f32.mrf.mxu0 }
 0x2e1   : > { %8185 = vst [vmem:[#allocation23_spill] sm:$0xff] %v7952_v24  ;;  %v4752_v14 = vpop.f32.mrf.mxu1  ;;  %v7955_v18 = vadd.f32 %v4522_v43, %v4330_v55  ;;  %v4560_v39 = vadd.f32 %v4559_v33, %v7715_v10 }
 0x2e2   : > { %v4561_v36 = vpop.f32.mrf.mxu0 }
 0x2e3   : > { %8186 = vst [vmem:[#allocation24_spill] sm:$0xff] %v7955_v18  ;;  %v4754_v49 = vpop.f32.mrf.mxu1  ;;  %v4753_v8 = vadd.f32 %v4752_v14, %v4560_v39  ;;  %v4562_v53 = vadd.f32 %v4561_v36, %v7725_v27 }
 0x2e4   : > { %v4563_v51 = vpop.f32.mrf.mxu0 }
 0x2e5   : > { %v4756_v48 = vpop.f32.mrf.mxu1  ;;  %v4755_v22 = vadd.f32 %v4754_v49, %v4562_v53  ;;  %v4564_v1 = vadd.f32 %v4563_v51, %v7730_v15  ;;  %v4911_v24 = vmul.f32 %v4753_v8, %v4753_v8 }
 0x2e6   : > { %v4565_v58 = vpop.f32.mrf.mxu0 }
 0x2e7   : > { %v4758_v38 = vpop.f32.mrf.mxu1  ;;  %v4943_v29 = vmul.f32 %v4755_v22, %v4755_v22  ;;  %v4757_v11 = vadd.f32 %v4756_v48, %v4564_v1  ;;  %v4566_v43 = vadd.f32 %v4565_v58, %v7734_v63 }
 0x2e8   : > { %v4569_v55 = vpop.f32.mrf.mxu0 }
 0x2e9   : > { %v4762_v18 = vpop.f32.mrf.mxu1  ;;  %v4975_v10 = vadd.f32 %v4943_v29, %v4911_v24  ;;  %v4759_v33 = vadd.f32 %v4758_v38, %v4566_v43  ;;  %v4570_v14 = vadd.f32 %v4569_v55, %v7746_v19  ;;  %v4912_v36 = vmul.f32 %v4757_v11, %v4757_v11 }
 0x2ea   : > { %v4571_v39 = vpop.f32.mrf.mxu0 }
 0x2eb   : > { %v4764_v27 = vpop.f32.mrf.mxu1  ;;  %v4944_v40 = vmul.f32 %v4759_v33, %v4759_v33  ;;  %v4763_v49 = vadd.f32 %v4762_v18, %v4570_v14  ;;  %v4572_v15 = vadd.f32 %v4571_v39, %v7756_v13  ;;  %6064 = vmatprep.mubr.f32.mxu0 %v4975_v10 }
 0x2ec   : > { %v4573_v53 = vpop.f32.mrf.mxu0 }
 0x2ed   : > { %v4766_v8 = vpop.f32.mrf.mxu1  ;;  %v4976_v51 = vadd.f32 %v4944_v40, %v4912_v36  ;;  %v4765_v48 = vadd.f32 %v4764_v27, %v4572_v15  ;;  %v4574_v63 = vadd.f32 %v4573_v53, %v7761_v60  ;;  %v4913_v24 = vmul.f32 %v4763_v49, %v4763_v49  ;;  %v8187_v60 = vld [vmem:[#allocation25_spill] sm:$0xff] }
 0x2ee   : > { %v4575_v22 = vpop.f32.mrf.mxu0 }
 0x2ef   : > { %v4768_v1 = vpop.f32.mrf.mxu1  ;;  %v4945_v58 = vmul.f32 %v4765_v48, %v4765_v48  ;;  %v4767_v38 = vadd.f32 %v4766_v8, %v4574_v63  ;;  %v4576_v19 = vadd.f32 %v4575_v22, %v7765_v21  ;;  %6065 = vmatmul.mubr.f32.vlgmr.msra.gmra.mxu0 %v4976_v51  ;;  %v8188_v21 = vld [vmem:[#allocation26_spill] sm:$0xff] }
 0x2f0   : > { %v4579_v29 = vpop.f32.mrf.mxu0 }
 0x2f1   : > { %v4772_v11 = vpop.f32.mrf.mxu1  ;;  %v4977_v18 = vadd.f32 %v4945_v58, %v4913_v24  ;;  %v4769_v43 = vadd.f32 %v4768_v1, %v4576_v19  ;;  %v4580_v13 = vadd.f32 %v4579_v29, %v7773_v41  ;;  %v4914_v40 = vmul.f32 %v4767_v38, %v4767_v38  ;;  %v8189_v41 = vld [vmem:[#allocation27_spill] sm:$0xff] }
 0x2f2   : > { %v4581_v55 = vpop.f32.mrf.mxu0 }
 0x2f3   : > { %v4774_v10 = vpop.f32.mrf.mxu1  ;;  %v4946_v33 = vmul.f32 %v4769_v43, %v4769_v43  ;;  %v4773_v14 = vadd.f32 %v4772_v11, %v4580_v13  ;;  %v4582_v39 = vadd.f32 %v4581_v55, %v8187_v60  ;;  %6067 = vmatprep.mubr.f32.mxu0 %v4977_v18 }
 0x2f4   : > { %v4583_v27 = vpop.f32.mrf.mxu0 }
 0x2f5   : > { %v4776_v36 = vpop.f32.mrf.mxu1  ;;  %v4978_v49 = vadd.f32 %v4946_v33, %v4914_v40  ;;  %v4775_v15 = vadd.f32 %v4774_v10, %v4582_v39  ;;  %v4584_v53 = vadd.f32 %v4583_v27, %v8188_v21  ;;  %v4915_v48 = vmul.f32 %v4773_v14, %v4773_v14  ;;  %v8190_v40 = vld [vmem:[#allocation37_spill] sm:$0xff] }
 0x2f6   : > { %v4585_v8 = vpop.f32.mrf.mxu0  ;;  %v4216_v33 = vadd.f32 %v7806_v3, %v8190_v40  ;;  %v8195_v40 = vld [vmem:[#allocation29_spill] sm:$0xff] }
 0x2f7   : > { %v4778_v51 = vpop.f32.mrf.mxu1  ;;  %v4947_v63 = vmul.f32 %v4775_v15, %v4775_v15  ;;  %v4777_v22 = vadd.f32 %v4776_v36, %v4584_v53  ;;  %v4586_v1 = vadd.f32 %v4585_v8, %v8189_v41  ;;  %6068 = vmatmul.mubr.f32.gmra.mxu0 %v4978_v49 }
 0x2f8   : > { %v4589_v24 = vpop.f32.mrf.mxu0 }
 0x2f9   : > { %v4782_v58 = vpop.f32.mrf.mxu1  ;;  %v4979_v38 = vadd.f32 %v4947_v63, %v4915_v48  ;;  %v4779_v19 = vadd.f32 %v4778_v51, %v4586_v1  ;;  %v4590_v29 = vadd.f32 %v4589_v24, %v7792_v54  ;;  %v4916_v43 = vmul.f32 %v4777_v22, %v4777_v22  ;;  %v8191_v63 = vld [vmem:[#allocation38_spill] sm:$0xff] }
 0x2fa   : > { %v4591_v11 = vpop.f32.mrf.mxu0  ;;  %v4220_v3 = vadd.f32 %v7813_v26, %v8191_v63 }
 0x2fb   : > { %v4784_v18 = vpop.f32.mrf.mxu1  ;;  %v4948_v13 = vmul.f32 %v4779_v19, %v4779_v19  ;;  %v4783_v55 = vadd.f32 %v4782_v58, %v4590_v29  ;;  %v4592_v10 = vadd.f32 %v4591_v11, %v7797_v46  ;;  %6070 = vmatprep.mubr.f32.mxu0 %v4979_v38  ;;  %v4409_v46 = vadd.f32 %v7808_v30, %v4216_v33  ;;  %v8193_v11 = vld [vmem:[#allocation30_spill] sm:$0xff] }
 0x2fc   : > { %v4593_v14 = vpop.f32.mrf.mxu0 }
 0x2fd   : > { %v4786_v60 = vpop.f32.mrf.mxu1  ;;  %v4980_v39 = vadd.f32 %v4948_v13, %v4916_v43  ;;  %v4785_v27 = vadd.f32 %v4784_v18, %v4592_v10  ;;  %v4594_v36 = vadd.f32 %v4593_v14, %v7800_v5  ;;  %v4917_v54 = vmul.f32 %v4783_v55, %v4783_v55  ;;  %v8194_v13 = vld [vmem:[#allocation28_spill] sm:$0xff] }
 0x2fe   : > { %v4595_v49 = vpop.f32.mrf.mxu0  ;;  %v4413_v55 = vadd.f32 %v8194_v13, %v4220_v3 }
 0x2ff   : > { %v4788_v15 = vpop.f32.mrf.mxu1  ;;  %v4949_v21 = vmul.f32 %v4785_v27, %v4785_v27  ;;  %v4787_v53 = vadd.f32 %v4786_v60, %v4594_v36  ;;  %v4596_v8 = vadd.f32 %v4595_v49, %v7803_v7  ;;  %6071 = vmatmul.mubr.f32.gmra.mxu0 %v4980_v39  ;;  %v8192_v7 = vld [vmem:[#allocation39_spill] sm:$0xff] }
 0x300   : > { %v4599_v51 = vpop.f32.mrf.mxu0  ;;  %v4226_v18 = vadd.f32 %v8193_v11, %v8192_v7  ;;  %v8196_v49 = vld [vmem:[#allocation31_spill] sm:$0xff] }
 0x301   : > { %v4792_v48 = vpop.f32.mrf.mxu1  ;;  %v4981_v22 = vadd.f32 %v4949_v21, %v4917_v54  ;;  %v4789_v41 = vadd.f32 %v4788_v15, %v4596_v8  ;;  %v4600_v1 = vadd.f32 %v4599_v51, %v7810_v47  ;;  %v4918_v58 = vmul.f32 %v4787_v53, %v4787_v53  ;;  %v8197_v53 = vld [vmem:[#allocation40_spill] sm:$0xff] }
 0x302   : > { %v4601_v5 = vpop.f32.mrf.mxu0  ;;  %v4419_v15 = vadd.f32 %v8196_v49, %v4226_v18  ;;  %v4230_v8 = vadd.f32 %v7827_v45, %v8197_v53 }
 0x303   : > { %v4794_v24 = vpop.f32.mrf.mxu1  ;;  %v4950_v38 = vmul.f32 %v4789_v41, %v4789_v41  ;;  %v4793_v19 = vadd.f32 %v4792_v48, %v4600_v1  ;;  %v4602_v29 = vadd.f32 %v4601_v5, %v4409_v46  ;;  %6073 = vmatprep.mubr.f32.mxu0 %v4981_v22 }
 0x304   : > { %v4603_v30 = vpop.f32.mrf.mxu0 }
 0x305   : > { %v4796_v43 = vpop.f32.mrf.mxu1  ;;  %v4982_v10 = vadd.f32 %v4950_v38, %v4918_v58  ;;  %v4795_v26 = vadd.f32 %v4794_v24, %v4602_v29  ;;  %v4604_v33 = vadd.f32 %v4603_v30, %v8195_v40  ;;  %v4919_v60 = vmul.f32 %v4793_v19, %v4793_v19  ;;  %v8198_v24 = vld [vmem:[#allocation41_spill] sm:$0xff] }
 0x306   : > { %v4605_v14 = vpop.f32.mrf.mxu0  ;;  %v4236_v58 = vadd.f32 %v7834_v9, %v8198_v24  ;;  %v4423_v29 = vadd.f32 %v7829_v12, %v4230_v8  ;;  %v8199_v9 = vld [vmem:[#allocation42_spill] sm:$0xff] }
 0x307   : > { %v4798_v47 = vpop.f32.mrf.mxu1  ;;  %v4951_v39 = vmul.f32 %v4795_v26, %v4795_v26  ;;  %v4797_v27 = vadd.f32 %v4796_v43, %v4604_v33  ;;  %v4606_v36 = vadd.f32 %v4605_v14, %v4413_v55  ;;  %6074 = vmatmul.mubr.f32.gmra.mxu0 %v4982_v10  ;;  %v4240_v33 = vadd.f32 %v7841_v50, %v8199_v9 }
 0x308   : > { %v4609_v54 = vpop.f32.mrf.mxu0  ;;  %v4429_v10 = vadd.f32 %v7836_v32, %v4236_v58 }
 0x309   : > { %v4802_v21 = vpop.f32.mrf.mxu1  ;;  %v4983_v46 = vadd.f32 %v4951_v39, %v4919_v60  ;;  %v4799_v51 = vadd.f32 %v4798_v47, %v4606_v36  ;;  %v4610_v48 = vadd.f32 %v4609_v54, %v7824_v23  ;;  %v4920_v22 = vmul.f32 %v4797_v27, %v4797_v27 }
 0x30a   : > { %v4611_v63 = vpop.f32.mrf.mxu0  ;;  %v4433_v53 = vadd.f32 %v7843_v44, %v4240_v33 }
 0x30b   : > { %v4804_v3 = vpop.f32.mrf.mxu1  ;;  %v4952_v41 = vmul.f32 %v4799_v51, %v4799_v51  ;;  %v4803_v1 = vadd.f32 %v4802_v21, %v4610_v48  ;;  %v4612_v5 = vadd.f32 %v4611_v63, %v4419_v15  ;;  %6076 = vmatprep.mubr.f32.mxu0 %v4983_v46  ;;  %v8200_v15 = vld [vmem:[#allocation43_spill] sm:$0xff] }
 0x30c   : > { %v4613_v38 = vpop.f32.mrf.mxu0  ;;  %v4246_v54 = vadd.f32 %v7848_v0, %v8200_v15  ;;  %v8202_v0 = vld [vmem:[#allocation44_spill] sm:$0xff] }
 0x30d   : > { %v4806_v19 = vpop.f32.mrf.mxu1  ;;  %v4984_v7 = vadd.f32 %v4952_v41, %v4920_v22  ;;  %v4805_v45 = vadd.f32 %v4804_v3, %v4612_v5  ;;  %v4614_v11 = vadd.f32 %v4613_v38, %v7831_v20  ;;  %v4921_v30 = vmul.f32 %v4803_v1, %v4803_v1  ;;  %v8201_v41 = vld [vmem:[#allocation32_spill] sm:$0xff] }
 0x30e   : > { %v4615_v18 = vpop.f32.mrf.mxu0  ;;  %v4439_v1 = vadd.f32 %v8201_v41, %v4246_v54  ;;  %v4250_v58 = vadd.f32 %v7855_v16, %v8202_v0 }
 0x30f   : > { %v4808_v23 = vpop.f32.mrf.mxu1  ;;  %v4953_v43 = vmul.f32 %v4805_v45, %v4805_v45  ;;  %v4807_v13 = vadd.f32 %v4806_v19, %v4614_v11  ;;  %v4616_v55 = vadd.f32 %v4615_v18, %v4423_v29  ;;  %6077 = vmatmul.mubr.f32.gmra.mxu0 %v4984_v7  ;;  %v8203_v19 = vld [vmem:[#allocation33_spill] sm:$0xff] }
 0x310   : > { %v4619_v26 = vpop.f32.mrf.mxu0 }
 0x311   : > { %v4812_v40 = vpop.f32.mrf.mxu1  ;;  %v4985_v14 = vadd.f32 %v4953_v43, %v4921_v30  ;;  %v4809_v12 = vadd.f32 %v4808_v23, %v4616_v55  ;;  %v4620_v47 = vadd.f32 %v4619_v26, %v7838_v42  ;;  %v4922_v39 = vmul.f32 %v4807_v13, %v4807_v13  ;;  %v8204_v13 = vld [vmem:[#allocation34_spill] sm:$0xff] }
 0x312   : > { %v4621_v60 = vpop.f32.mrf.mxu0  ;;  %v4443_v55 = vadd.f32 %v8204_v13, %v4250_v58 }
 0x313   : > { %v4814_v20 = vpop.f32.mrf.mxu1  ;;  %v4954_v27 = vmul.f32 %v4809_v12, %v4809_v12  ;;  %v4813_v36 = vadd.f32 %v4812_v40, %v4620_v47  ;;  %v4622_v49 = vadd.f32 %v4621_v60, %v4429_v10  ;;  %6079 = vmatprep.mubr.f32.mxu0 %v4985_v14  ;;  %v8205_v40 = vld [vmem:[#allocation35_spill] sm:$0xff] }
 0x314   : > { %v4623_v32 = vpop.f32.mrf.mxu0 }
 0x315   : > { %v4816_v21 = vpop.f32.mrf.mxu1  ;;  %v4986_v8 = vadd.f32 %v4954_v27, %v4922_v39  ;;  %v4815_v50 = vadd.f32 %v4814_v20, %v4622_v49  ;;  %v4624_v46 = vadd.f32 %v4623_v32, %v7845_v17  ;;  %v4923_v48 = vmul.f32 %v4813_v36, %v4813_v36 }
 0x316   : > { %v4625_v51 = vpop.f32.mrf.mxu0 }
 0x317   : > { %v4818_v42 = vpop.f32.mrf.mxu1  ;;  %v4955_v63 = vmul.f32 %v4815_v50, %v4815_v50  ;;  %v4817_v3 = vadd.f32 %v4816_v21, %v4624_v46  ;;  %v4626_v22 = vadd.f32 %v4625_v51, %v4433_v53  ;;  %6080 = vmatmul.mubr.f32.gmra.mxu0 %v4986_v8 }
 0x318   : > { %v4629_v5 = vpop.f32.mrf.mxu0 }
 0x319   : > { %v4822_v24 = vpop.f32.mrf.mxu1  ;;  %v4987_v38 = vadd.f32 %v4955_v63, %v4923_v48  ;;  %v4819_v44 = vadd.f32 %v4818_v42, %v4626_v22  ;;  %v4630_v29 = vadd.f32 %v4629_v5, %v8203_v19  ;;  %v4924_v45 = vmul.f32 %v4817_v3, %v4817_v3 }
 0x31a   : > { %v4631_v7 = vpop.f32.mrf.mxu0 }
 0x31b   : > { %v4824_v17 = vpop.f32.mrf.mxu1  ;;  %v4956_v11 = vmul.f32 %v4819_v44, %v4819_v44  ;;  %v4823_v18 = vadd.f32 %v4822_v24, %v4630_v29  ;;  %v4632_v23 = vadd.f32 %v4631_v7, %v4439_v1  ;;  %6082 = vmatprep.mubr.f32.mxu0 %v4987_v38 }
 0x31c   : > { %v4633_v30 = vpop.f32.mrf.mxu0 }
 0x31d   : > { %v4826_v43 = vpop.f32.mrf.mxu1  ;;  %v4988_v10 = vadd.f32 %v4956_v11, %v4924_v45  ;;  %v4825_v26 = vadd.f32 %v4824_v17, %v4632_v23  ;;  %v4634_v9 = vadd.f32 %v4633_v30, %v8205_v40  ;;  %v4925_v14 = vmul.f32 %v4823_v18, %v4823_v18 }
 0x31e   : > { %v4635_v16 = vpop.f32.mrf.mxu0 }
 0x31f   : > { %v4828_v33 = vpop.f32.mrf.mxu1  ;;  %v4957_v12 = vmul.f32 %v4825_v26, %v4825_v26  ;;  %v4827_v47 = vadd.f32 %v4826_v43, %v4634_v9  ;;  %v4636_v60 = vadd.f32 %v4635_v16, %v4443_v55  ;;  %6083 = vmatmul.mubr.f32.gmra.mxu0 %v4988_v10 }
 0x320   : > { %v4639_v20 = vpop.f32.mrf.mxu0 }
 0x321   : > { %v4832_v39 = vpop.f32.mrf.mxu1  ;;  %v4989_v27 = vadd.f32 %v4957_v12, %v4925_v14  ;;  %v4829_v36 = vadd.f32 %v4828_v33, %v4636_v60  ;;  %v4640_v49 = vadd.f32 %v4639_v20, %v7862_v61  ;;  %v4926_v32 = vmul.f32 %v4827_v47, %v4827_v47 }
 0x322   : > { %v4641_v15 = vpop.f32.mrf.mxu0 }
 0x323   : > { %v4834_v54 = vpop.f32.mrf.mxu1  ;;  %v4958_v21 = vmul.f32 %v4829_v36, %v4829_v36  ;;  %v4833_v53 = vadd.f32 %v4832_v39, %v4640_v49  ;;  %v4642_v8 = vadd.f32 %v4641_v15, %v7865_v35  ;;  %6085 = vmatprep.mubr.f32.mxu0 %v4989_v27 }
 0x324   : > { %v4643_v50 = vpop.f32.mrf.mxu0 }
 0x325   : > { %v4836_v46 = vpop.f32.mrf.mxu1  ;;  %v4990_v51 = vadd.f32 %v4958_v21, %v4926_v32  ;;  %v4835_v42 = vadd.f32 %v4834_v54, %v4642_v8  ;;  %v4644_v48 = vadd.f32 %v4643_v50, %v7868_v4  ;;  %v4927_v22 = vmul.f32 %v4833_v53, %v4833_v53  ;;  %v8209_v54 = vld [vmem:[#allocation47_spill] sm:$0xff] }
 0x326   : > { %v4645_v63 = vpop.f32.mrf.mxu0 }
 0x327   : > { %v4838_v3 = vpop.f32.mrf.mxu1  ;;  %v4959_v41 = vmul.f32 %v4835_v42, %v4835_v42  ;;  %v4837_v1 = vadd.f32 %v4836_v46, %v4644_v48  ;;  %v4646_v61 = vadd.f32 %v4645_v63, %v7871_v2  ;;  %6086 = vmatmul.mubr.f32.gmra.mxu0 %v4990_v51  ;;  %v8210_v51 = vld [vmem:[#allocation12_spill] sm:$0xff] }
 0x328   : > { %v4649_v5 = vpop.f32.mrf.mxu0 }
 0x329   : > { %v4842_v24 = vpop.f32.mrf.mxu1  ;;  %v4991_v0 = vadd.f32 %v4959_v41, %v4927_v22  ;;  %v4839_v58 = vadd.f32 %v4838_v3, %v4646_v61  ;;  %v4650_v35 = vadd.f32 %v4649_v5, %v7874_v31  ;;  %v4928_v19 = vmul.f32 %v4837_v1, %v4837_v1  ;;  %v8206_v31 = vld [vmem:[#allocation36_spill] sm:$0xff] }
 0x32a   : > { %v4651_v38 = vpop.f32.mrf.mxu0 }
 0x32b   : > { %v4844_v44 = vpop.f32.mrf.mxu1  ;;  %v4960_v29 = vmul.f32 %v4839_v58, %v4839_v58  ;;  %v4843_v7 = vadd.f32 %v4842_v24, %v4650_v35  ;;  %v4652_v4 = vadd.f32 %v4651_v38, %v7877_v6  ;;  %6088 = vmatprep.mubr.f32.mxu1 %v4991_v0  ;;  %v8207_v6 = vld [vmem:[#allocation45_spill] sm:$0xff] }
 0x32c   : > { %v4653_v17 = vpop.f32.mrf.mxu0 }
 0x32d   : > { %v4846_v45 = vpop.f32.mrf.mxu1  ;;  %v4992_v11 = vadd.f32 %v4960_v29, %v4928_v19  ;;  %v4845_v18 = vadd.f32 %v4844_v44, %v4652_v4  ;;  %v4654_v2 = vadd.f32 %v4653_v17, %v7880_v37  ;;  %v4929_v43 = vmul.f32 %v4843_v7, %v4843_v7  ;;  %v8208_v37 = vld [vmem:[#allocation46_spill] sm:$0xff] }
 0x32e   : > { %v4655_v23 = vpop.f32.mrf.mxu0 }
 0x32f   : > { %v4848_v30 = vpop.f32.mrf.mxu1  ;;  %v4961_v13 = vmul.f32 %v4845_v18, %v4845_v18  ;;  %v4847_v55 = vadd.f32 %v4846_v45, %v4654_v2  ;;  %v4656_v10 = vadd.f32 %v4655_v23, %v8206_v31  ;;  %6089 = vmatmul.mubr.f32.vlgmr.msra.gmra.mxu1 %v4992_v11 }
 0x330   : > { %v4659_v26 = vpop.f32.mrf.mxu0 }
 0x331   : > { %v4852_v40 = vpop.f32.mrf.mxu1  ;;  %v4993_v9 = vadd.f32 %v4961_v13, %v4929_v43  ;;  %v4849_v16 = vadd.f32 %v4848_v30, %v4656_v10  ;;  %v4660_v33 = vadd.f32 %v4659_v26, %v8207_v6  ;;  %v4930_v47 = vmul.f32 %v4847_v55, %v4847_v55 }
 0x332   : > { %v4661_v14 = vpop.f32.mrf.mxu0 }
 0x333   : > { %v4854_v12 = vpop.f32.mrf.mxu1  ;;  %v4962_v60 = vmul.f32 %v4849_v16, %v4849_v16  ;;  %v4853_v20 = vadd.f32 %v4852_v40, %v4660_v33  ;;  %v4662_v39 = vadd.f32 %v4661_v14, %v8208_v37  ;;  %6091 = vmatprep.mubr.f32.mxu1 %v4993_v9 }
 0x334   : > { %v4663_v27 = vpop.f32.mrf.mxu0 }
 0x335   : > { %v4856_v36 = vpop.f32.mrf.mxu1  ;;  %v4994_v49 = vadd.f32 %v4962_v60, %v4930_v47  ;;  %v4855_v15 = vadd.f32 %v4854_v12, %v4662_v39  ;;  %v4664_v32 = vadd.f32 %v4663_v27, %v8209_v54  ;;  %v4931_v8 = vmul.f32 %v4853_v20, %v4853_v20 }
 0x336   : > { %v4665_v21 = vpop.f32.mrf.mxu0 }
 0x337   : > { %v4858_v53 = vpop.f32.mrf.mxu1  ;;  %v4963_v50 = vmul.f32 %v4855_v15, %v4855_v15  ;;  %v4857_v46 = vadd.f32 %v4856_v36, %v4664_v32  ;;  %v4666_v42 = vadd.f32 %v4665_v21, %v8210_v51  ;;  %6092 = vmatmul.mubr.f32.gmra.mxu1 %v4994_v49 }
 0x338   : > { %v4669_v48 = vpop.f32.mrf.mxu0 }
 0x339   : > { %v4862_v63 = vpop.f32.mrf.mxu1  ;;  %v4995_v3 = vadd.f32 %v4963_v50, %v4931_v8  ;;  %v4859_v22 = vadd.f32 %v4858_v53, %v4666_v42  ;;  %v4670_v41 = vadd.f32 %v4669_v48, %v7898_v59  ;;  %v4932_v5 = vmul.f32 %v4857_v46, %v4857_v46  ;;  %v8214_v8 = vld [vmem:[#allocation16_spill] sm:$0xff] }
 0x33a   : > { %v4671_v1 = vpop.f32.mrf.mxu0 }
 0x33b   : > { %v4864_v61 = vpop.f32.mrf.mxu1  ;;  %v4964_v24 = vmul.f32 %v4859_v22, %v4859_v22  ;;  %v4863_v0 = vadd.f32 %v4862_v63, %v4670_v41  ;;  %v4672_v58 = vadd.f32 %v4671_v1, %v7901_v56  ;;  %6094 = vmatprep.mubr.f32.mxu1 %v4995_v3  ;;  %v8215_v63 = vld [vmem:[#allocation17_spill] sm:$0xff] }
 0x33c   : > { %v4673_v35 = vpop.f32.mrf.mxu0 }
 0x33d   : > { %v4866_v38 = vpop.f32.mrf.mxu1  ;;  %v4996_v44 = vadd.f32 %v4964_v24, %v4932_v5  ;;  %v4865_v19 = vadd.f32 %v4864_v61, %v4672_v58  ;;  %v4674_v29 = vadd.f32 %v4673_v35, %v7904_v57  ;;  %v4933_v17 = vmul.f32 %v4863_v0, %v4863_v0  ;;  %v8216_v24 = vld [vmem:[#allocation18_spill] sm:$0xff] }
 0x33e   : > { %v4675_v7 = vpop.f32.mrf.mxu0 }
 0x33f   : > { %v4868_v4 = vpop.f32.mrf.mxu1  ;;  %v4965_v45 = vmul.f32 %v4865_v19, %v4865_v19  ;;  %v4867_v11 = vadd.f32 %v4866_v38, %v4674_v29  ;;  %v4676_v59 = vadd.f32 %v4675_v7, %v7907_v25  ;;  %6095 = vmatmul.mubr.f32.gmra.mxu1 %v4996_v44  ;;  %v8211_v25 = vld [vmem:[#allocation13_spill] sm:$0xff]  ;;  %v8217_v19 = vld [vmem:[#allocation19_spill] sm:$0xff] }
 0x340   : > { %v4679_v18 = vpop.f32.mrf.mxu0 }
 0x341   : > { %v4872_v2 = vpop.f32.mrf.mxu1  ;;  %v4997_v23 = vadd.f32 %v4965_v45, %v4933_v17  ;;  %v4869_v30 = vadd.f32 %v4868_v4, %v4676_v59  ;;  %v4680_v56 = vadd.f32 %v4679_v18, %v7910_v34  ;;  %v4934_v55 = vmul.f32 %v4867_v11, %v4867_v11  ;;  %v8212_v34 = vld [vmem:[#allocation14_spill] sm:$0xff] }
 0x342   : > { %v4681_v43 = vpop.f32.mrf.mxu0 }
 0x343   : > { %v4874_v13 = vpop.f32.mrf.mxu1  ;;  %v4966_v31 = vmul.f32 %v4869_v30, %v4869_v30  ;;  %v4873_v10 = vadd.f32 %v4872_v2, %v4680_v56  ;;  %v4682_v57 = vadd.f32 %v4681_v43, %v7913_v62  ;;  %6097 = vmatprep.mubr.f32.mxu1 %v4997_v23  ;;  %v8213_v62 = vld [vmem:[#allocation15_spill] sm:$0xff]  ;;  %v8218_v56 = vld [vmem:[#allocation20_spill] sm:$0xff] }
 0x344   : > { %v4683_v26 = vpop.f32.mrf.mxu0 }
 0x345   : > { %v4876_v40 = vpop.f32.mrf.mxu1  ;;  %v4998_v9 = vadd.f32 %v4966_v31, %v4934_v55  ;;  %v4875_v16 = vadd.f32 %v4874_v13, %v4682_v57  ;;  %v4684_v6 = vadd.f32 %v4683_v26, %v8211_v25  ;;  %v4935_v12 = vmul.f32 %v4873_v10, %v4873_v10 }
 0x346   : > { %v4685_v33 = vpop.f32.mrf.mxu0 }
 0x347   : > { %v4878_v14 = vpop.f32.mrf.mxu1  ;;  %v4967_v47 = vmul.f32 %v4875_v16, %v4875_v16  ;;  %v4877_v60 = vadd.f32 %v4876_v40, %v4684_v6  ;;  %v4686_v20 = vadd.f32 %v4685_v33, %v8212_v34  ;;  %6098 = vmatmul.mubr.f32.gmra.mxu1 %v4998_v9  ;;  %v8220_v34 = vld [vmem:[#allocation22_spill] sm:$0xff] }
 0x348   : > { %v4689_v37 = vpop.f32.mrf.mxu0 }
 0x349   : > { %v4882_v39 = vpop.f32.mrf.mxu1  ;;  %v4999_v27 = vadd.f32 %v4967_v47, %v4935_v12  ;;  %v4879_v36 = vadd.f32 %v4878_v14, %v4686_v20  ;;  %v4690_v49 = vadd.f32 %v4689_v37, %v8213_v62  ;;  %v4936_v32 = vmul.f32 %v4877_v60, %v4877_v60 }
 0x34a   : > { %v4691_v15 = vpop.f32.mrf.mxu0 }
 0x34b   : > { %v4884_v54 = vpop.f32.mrf.mxu1  ;;  %v4968_v21 = vmul.f32 %v4879_v36, %v4879_v36  ;;  %v4883_v53 = vadd.f32 %v4882_v39, %v4690_v49  ;;  %v4692_v50 = vadd.f32 %v4691_v15, %v8214_v8  ;;  %6100 = vmatprep.mubr.f32.mxu1 %v4999_v27 }
 0x34c   : > { %v4693_v46 = vpop.f32.mrf.mxu0 }
 0x34d   : > { %v4886_v51 = vpop.f32.mrf.mxu1  ;;  %v5000_v42 = vadd.f32 %v4968_v21, %v4936_v32  ;;  %v4885_v48 = vadd.f32 %v4884_v54, %v4692_v50  ;;  %v4694_v3 = vadd.f32 %v4693_v46, %v8215_v63  ;;  %v4937_v1 = vmul.f32 %v4883_v53, %v4883_v53  ;;  %v8222_v21 = vld [vmem:[#allocation24_spill] sm:$0xff]  ;;  %v5008_v63 = vld [vmem:[#allocation8 + $0x8] sm:$0xff] }
 0x34e   : > { %v4695_v22 = vpop.f32.mrf.mxu0 }
 0x34f   : > { %v4888_v41 = vpop.f32.mrf.mxu1  ;;  %v4969_v61 = vmul.f32 %v4885_v48, %v4885_v48  ;;  %v4887_v5 = vadd.f32 %v4886_v51, %v4694_v3  ;;  %v4696_v0 = vadd.f32 %v4695_v22, %v8216_v24  ;;  %6101 = vmatmul.mubr.f32.gmra.mxu1 %v5000_v42  ;;  %v5007_v22 = vld [vmem:[#allocation8] sm:$0xff] }
 0x350   : > { %v4699_v58 = vpop.f32.mrf.mxu0 }
 0x351   : > { %v4892_v35 = vpop.f32.mrf.mxu1  ;;  %v5001_v38 = vadd.f32 %v4969_v61, %v4937_v1  ;;  %v4889_v44 = vadd.f32 %v4888_v41, %v4696_v0  ;;  %v4700_v29 = vadd.f32 %v4699_v58, %v8217_v19  ;;  %v4938_v17 = vmul.f32 %v4887_v5, %v4887_v5  ;;  %v5010_v5 = vld [vmem:[#allocation8 + $0x18] sm:$0xff]  ;;  %v5009_v0 = vld [vmem:[#allocation8 + $0x10] sm:$0xff] }
 0x352   : > { %v4701_v7 = vpop.f32.mrf.mxu0 }
 0x353   : > { %v4894_v4 = vpop.f32.mrf.mxu1  ;;  %v4970_v45 = vmul.f32 %v4889_v44, %v4889_v44  ;;  %v4893_v11 = vadd.f32 %v4892_v35, %v4700_v29  ;;  %v4702_v59 = vadd.f32 %v4701_v7, %v7937_v52  ;;  %6103 = vmatprep.mubr.f32.mxu1 %v5001_v38  ;;  %v8219_v52 = vld [vmem:[#allocation21_spill] sm:$0xff]  ;;  %v5011_v29 = vld [vmem:[#allocation8 + $0x20] sm:$0xff] }
 0x354   : > { %v4703_v18 = vpop.f32.mrf.mxu0  ;;  %v5012_v44 = vld [vmem:[#allocation8 + $0x28] sm:$0xff] }
 0x355   : > { %v4896_v2 = vpop.f32.mrf.mxu1  ;;  %v5002_v23 = vadd.f32 %v4970_v45, %v4938_v17  ;;  %v4895_v30 = vadd.f32 %v4894_v4, %v4702_v59  ;;  %v4704_v43 = vadd.f32 %v4703_v18, %v8218_v56  ;;  %v4939_v31 = vmul.f32 %v4893_v11, %v4893_v11  ;;  %v5014_v45 = vld [vmem:[#allocation8 + $0x38] sm:$0xff]  ;;  %v5013_v59 = vld [vmem:[#allocation8 + $0x30] sm:$0xff] }
 0x356   : > { %v4705_v13 = vpop.f32.mrf.mxu0 }
 0x357   : > { %v4898_v55 = vpop.f32.mrf.mxu1  ;;  %v4971_v10 = vmul.f32 %v4895_v30, %v4895_v30  ;;  %v4897_v57 = vadd.f32 %v4896_v2, %v4704_v43  ;;  %v4706_v26 = vadd.f32 %v4705_v13, %v7943_v28  ;;  %6104 = vmatmul.mubr.f32.gmra.mxu1 %v5002_v23  ;;  %v8221_v28 = vld [vmem:[#allocation23_spill] sm:$0xff]  ;;  %v5016_v30 = vld [vmem:[#allocation8 + $0x48] sm:$0xff]  ;;  %v5015_v43 = vld [vmem:[#allocation8 + $0x40] sm:$0xff] }
 0x358   : > { %v4709_v40 = vpop.f32.mrf.mxu0 }
 0x359   : > { %v4902_v9 = vpop.f32.mrf.mxu1  ;;  %v5003_v16 = vadd.f32 %v4971_v10, %v4939_v31  ;;  %v4899_v25 = vadd.f32 %v4898_v55, %v4706_v26  ;;  %v4710_v6 = vadd.f32 %v4709_v40, %v8219_v52  ;;  %v4940_v12 = vmul.f32 %v4897_v57, %v4897_v57  ;;  %v5018_v10 = vld [vmem:[#allocation8 + $0x58] sm:$0xff]  ;;  %v5017_v26 = vld [vmem:[#allocation8 + $0x50] sm:$0xff] }
 0x35a   : > { %v4711_v33 = vpop.f32.mrf.mxu0 }
 0x35b   : > { %v4904_v14 = vpop.f32.mrf.mxu1  ;;  %v4972_v47 = vmul.f32 %v4899_v25, %v4899_v25  ;;  %v4903_v60 = vadd.f32 %v4902_v9, %v4710_v6  ;;  %v4712_v20 = vadd.f32 %v4711_v33, %v8220_v34  ;;  %6106 = vmatprep.mubr.f32.mxu1 %v5003_v16  ;;  %v5020_v25 = vld [vmem:[#allocation8 + $0x68] sm:$0xff]  ;;  %v5019_v6 = vld [vmem:[#allocation8 + $0x60] sm:$0xff]  ;;  %v5021_v34 = vld [vmem:[#allocation8 + $0x70] sm:$0xff] }
 0x35c   : > { %v4713_v37 = vpop.f32.mrf.mxu0 }
 0x35d   : > { %v4906_v39 = vpop.f32.mrf.mxu1  ;;  %v5004_v27 = vadd.f32 %v4972_v47, %v4940_v12  ;;  %v4905_v36 = vadd.f32 %v4904_v14, %v4712_v20  ;;  %v4714_v62 = vadd.f32 %v4713_v37, %v8221_v28  ;;  %v4941_v15 = vmul.f32 %v4903_v60, %v4903_v60  ;;  %v5022_v47 = vld [vmem:[#allocation8 + $0x78] sm:$0xff]  ;;  %v5023_v28 = vld [vmem:[#allocation8 + $0x80] sm:$0xff] }
 0x35e   : > { %v4715_v49 = vpop.f32.mrf.mxu0 }
 0x35f   : > { %v4973_v54 = vmul.f32 %v4905_v36, %v4905_v36  ;;  %v4907_v32 = vadd.f32 %v4906_v39, %v4714_v62  ;;  %v4716_v53 = vadd.f32 %v4715_v49, %v8222_v21  ;;  %6107 = vmatmul.mubr.f32.gmra.mxu1 %v5004_v27  ;;  %v4908_v8 = vpop.f32.mrf.mxu1  ;;  %v5024_v27 = vld [vmem:[#allocation8 + $0x88] sm:$0xff]  ;;  %v5025_v21 = vld [vmem:[#allocation8 + $0x90] sm:$0xff] }
 0x361   : > { %v5005_v50 = vadd.f32 %v4973_v54, %v4941_v15  ;;  %v4909_v46 = vadd.f32 %v4908_v8, %v4716_v53  ;;  %v4942_v51 = vmul.f32 %v4907_v32, %v4907_v32  ;;  %v5026_v54 = vld [vmem:[#allocation8 + $0x98] sm:$0xff] }
 0x363   : > { %v4974_v42 = vmul.f32 %v4909_v46, %v4909_v46  ;;  %6109 = vmatprep.mubr.f32.mxu1 %v5005_v50  ;;  %v5028_v46 = vld [vmem:[#allocation8 + $0xa8] sm:$0xff] }
 0x365   : > { %v5006_v48 = vadd.f32 %v4974_v42, %v4942_v51  ;;  %v5027_v42 = vld [vmem:[#allocation8 + $0xa0] sm:$0xff] }
 0x367   : > { %6110 = vmatmul.mubr.f32.gmra.mxu1 %v5006_v48 }
 0x3af   : > { %v6066_v3 = vpop.f32.mrf.mxu0 }
 0x3b0   : > { %v5281_v41 = vadd.f32 %v6066_v3, %v5008_v63 }
 0x3b1   : > { %v5121_v1 = vpop.f32.mrf.mxu0 }
 0x3b2   : > { %5313 = vst [vmem:[#allocation8 + $0x8] sm:$0xff] %v5281_v41  ;;  %v5280_v61 = vadd.f32 %v5121_v1, %v5007_v22  ;;  %v5030_v22 = vld [vmem:[#allocation8 + $0xb8] sm:$0xff]  ;;  %v5029_v1 = vld [vmem:[#allocation8 + $0xb0] sm:$0xff] }
 0x3b4   : > { %5312 = vst [vmem:[#allocation8] sm:$0xff] %v5280_v61 }
 0x3b7   : > { %v6069_v24 = vpop.f32.mrf.mxu0 }
 0x3b8   : > { %v5283_v58 = vadd.f32 %v6069_v24, %v5010_v5 }
 0x3b9   : > { %v5131_v35 = vpop.f32.mrf.mxu0 }
 0x3ba   : > { %5315 = vst [vmem:[#allocation8 + $0x18] sm:$0xff] %v5283_v58  ;;  %v5282_v38 = vadd.f32 %v5131_v35, %v5009_v0  ;;  %v5032_v0 = vld [vmem:[#allocation8 + $0xc8] sm:$0xff]  ;;  %v5031_v35 = vld [vmem:[#allocation8 + $0xc0] sm:$0xff] }
 0x3bc   : > { %5314 = vst [vmem:[#allocation8 + $0x10] sm:$0xff] %v5282_v38 }
 0x3bf   : > { %v6072_v19 = vpop.f32.mrf.mxu0 }
 0x3c0   : > { %v5285_v7 = vadd.f32 %v6072_v19, %v5012_v44 }
 0x3c1   : > { %v5141_v4 = vpop.f32.mrf.mxu0 }
 0x3c2   : > { %5317 = vst [vmem:[#allocation8 + $0x28] sm:$0xff] %v5285_v7  ;;  %v5284_v17 = vadd.f32 %v5141_v4, %v5011_v29  ;;  %v5034_v29 = vld [vmem:[#allocation8 + $0xd8] sm:$0xff]  ;;  %v5033_v4 = vld [vmem:[#allocation8 + $0xd0] sm:$0xff] }
 0x3c4   : > { %5316 = vst [vmem:[#allocation8 + $0x20] sm:$0xff] %v5284_v17 }
 0x3c7   : > { %v6075_v11 = vpop.f32.mrf.mxu0 }
 0x3c8   : > { %v5287_v18 = vadd.f32 %v6075_v11, %v5014_v45 }
 0x3c9   : > { %v5151_v2 = vpop.f32.mrf.mxu0 }
 0x3ca   : > { %5319 = vst [vmem:[#allocation8 + $0x38] sm:$0xff] %v5287_v18  ;;  %v5286_v23 = vadd.f32 %v5151_v2, %v5013_v59  ;;  %v5036_v59 = vld [vmem:[#allocation8 + $0xe8] sm:$0xff]  ;;  %v5035_v2 = vld [vmem:[#allocation8 + $0xe0] sm:$0xff] }
 0x3cc   : > { %5318 = vst [vmem:[#allocation8 + $0x30] sm:$0xff] %v5286_v23 }
 0x3cf   : > { %v6078_v56 = vpop.f32.mrf.mxu0 }
 0x3d0   : > { %v5289_v13 = vadd.f32 %v6078_v56, %v5016_v30 }
 0x3d1   : > { %v5161_v55 = vpop.f32.mrf.mxu0 }
 0x3d2   : > { %5321 = vst [vmem:[#allocation8 + $0x48] sm:$0xff] %v5289_v13  ;;  %v5288_v31 = vadd.f32 %v5161_v55, %v5015_v43  ;;  %v5038_v43 = vld [vmem:[#allocation8 + $0xf8] sm:$0xff]  ;;  %v5037_v55 = vld [vmem:[#allocation8 + $0xf0] sm:$0xff] }
 0x3d4   : > { %5320 = vst [vmem:[#allocation8 + $0x40] sm:$0xff] %v5288_v31 }
 0x3d7   : > { %v6081_v57 = vpop.f32.mrf.mxu0 }
 0x3d8   : > { %v5291_v40 = vadd.f32 %v6081_v57, %v5018_v10 }
 0x3d9   : > { %v5171_v9 = vpop.f32.mrf.mxu0 }
 0x3da   : > { %5323 = vst [vmem:[#allocation8 + $0x58] sm:$0xff] %v5291_v40  ;;  %v5290_v16 = vadd.f32 %v5171_v9, %v5017_v26 }
 0x3dc   : > { %5322 = vst [vmem:[#allocation8 + $0x50] sm:$0xff] %v5290_v16 }
 0x3df   : > { %v6084_v52 = vpop.f32.mrf.mxu0 }
 0x3e0   : > { %v5293_v33 = vadd.f32 %v6084_v52, %v5020_v25 }
 0x3e1   : > { %v5181_v14 = vpop.f32.mrf.mxu0 }
 0x3e2   : > { %5325 = vst [vmem:[#allocation8 + $0x68] sm:$0xff] %v5293_v33  ;;  %v5292_v12 = vadd.f32 %v5181_v14, %v5019_v6 }
 0x3e4   : > { %5324 = vst [vmem:[#allocation8 + $0x60] sm:$0xff] %v5292_v12 }
 0x3e7   : > { %v6087_v60 = vpop.f32.mrf.mxu0 }
 0x3e8   : > { %v5295_v20 = vadd.f32 %v6087_v60, %v5022_v47 }
 0x3e9   : > { %v5191_v37 = vpop.f32.mrf.mxu0 }
 0x3ea   : > { %5327 = vst [vmem:[#allocation8 + $0x78] sm:$0xff] %v5295_v20  ;;  %v5294_v39 = vadd.f32 %v5191_v37, %v5021_v34 }
 0x3ec   : > { %5326 = vst [vmem:[#allocation8 + $0x70] sm:$0xff] %v5294_v39 }
 0x3ef   : > { %v6090_v36 = vpop.f32.mrf.mxu1 }
 0x3f0   : > { %v5297_v62 = vadd.f32 %v6090_v36, %v5024_v27 }
 0x3f1   : > { %v5201_v49 = vpop.f32.mrf.mxu1 }
 0x3f2   : > { %5329 = vst [vmem:[#allocation8 + $0x88] sm:$0xff] %v5297_v62  ;;  %v5296_v15 = vadd.f32 %v5201_v49, %v5023_v28 }
 0x3f4   : > { %5328 = vst [vmem:[#allocation8 + $0x80] sm:$0xff] %v5296_v15 }
 0x3f7   : > { %v6093_v32 = vpop.f32.mrf.mxu1 }
 0x3f8   : > { %v5299_v53 = vadd.f32 %v6093_v32, %v5026_v54 }
 0x3f9   : > { %v5211_v8 = vpop.f32.mrf.mxu1 }
 0x3fa   : > { %5331 = vst [vmem:[#allocation8 + $0x98] sm:$0xff] %v5299_v53  ;;  %v5298_v50 = vadd.f32 %v5211_v8, %v5025_v21 }
 0x3fc   : > { %5330 = vst [vmem:[#allocation8 + $0x90] sm:$0xff] %v5298_v50 }
 0x3ff   : > { %v6096_v51 = vpop.f32.mrf.mxu1 }
 0x400   : > { %v5301_v48 = vadd.f32 %v6096_v51, %v5028_v46 }
 0x401   : > { %v5221_v63 = vpop.f32.mrf.mxu1 }
 0x402   : > { %5333 = vst [vmem:[#allocation8 + $0xa8] sm:$0xff] %v5301_v48  ;;  %v5300_v3 = vadd.f32 %v5221_v63, %v5027_v42 }
 0x404   : > { %5332 = vst [vmem:[#allocation8 + $0xa0] sm:$0xff] %v5300_v3 }
 0x407   : > { %v6099_v41 = vpop.f32.mrf.mxu1 }
 0x408   : > { %v5303_v61 = vadd.f32 %v6099_v41, %v5030_v22 }
 0x409   : > { %v5231_v5 = vpop.f32.mrf.mxu1 }
 0x40a   : > { %5335 = vst [vmem:[#allocation8 + $0xb8] sm:$0xff] %v5303_v61  ;;  %v5302_v24 = vadd.f32 %v5231_v5, %v5029_v1 }
 0x40c   : > { %5334 = vst [vmem:[#allocation8 + $0xb0] sm:$0xff] %v5302_v24 }
 0x40f   : > { %v6102_v58 = vpop.f32.mrf.mxu1 }
 0x410   : > { %v5305_v38 = vadd.f32 %v6102_v58, %v5032_v0 }
 0x411   : > { %v5241_v44 = vpop.f32.mrf.mxu1 }
 0x412   : > { %5337 = vst [vmem:[#allocation8 + $0xc8] sm:$0xff] %v5305_v38  ;;  %v5304_v19 = vadd.f32 %v5241_v44, %v5031_v35 }
 0x414   : > { %5336 = vst [vmem:[#allocation8 + $0xc0] sm:$0xff] %v5304_v19 }
 0x417   : > { %v6105_v7 = vpop.f32.mrf.mxu1 }
 0x418   : > { %v5307_v17 = vadd.f32 %v6105_v7, %v5034_v29 }
 0x419   : > { %v5251_v45 = vpop.f32.mrf.mxu1 }
 0x41a   : > { %5339 = vst [vmem:[#allocation8 + $0xd8] sm:$0xff] %v5307_v17  ;;  %v5306_v11 = vadd.f32 %v5251_v45, %v5033_v4 }
 0x41c   : > { %5338 = vst [vmem:[#allocation8 + $0xd0] sm:$0xff] %v5306_v11 }
 0x41f   : > { %v6108_v18 = vpop.f32.mrf.mxu1 }
 0x420   : > { %v5309_v23 = vadd.f32 %v6108_v18, %v5036_v59 }
 0x421   : > { %v5261_v30 = vpop.f32.mrf.mxu1 }
 0x422   : > { %5341 = vst [vmem:[#allocation8 + $0xe8] sm:$0xff] %v5309_v23  ;;  %v5308_v56 = vadd.f32 %v5261_v30, %v5035_v2 }
 0x424   : > { %5340 = vst [vmem:[#allocation8 + $0xe0] sm:$0xff] %v5308_v56 }
 0x427   : > { %v6111_v13 = vpop.f32.mrf.mxu1 }
 0x428   : > { %v5311_v31 = vadd.f32 %v6111_v13, %v5038_v43 }
 0x429   : > { %v5271_v10 = vpop.f32.mrf.mxu1 }
 0x42a   : > { %5343 = vst [vmem:[#allocation8 + $0xf8] sm:$0xff] %v5311_v31  ;;  %v5310_v57 = vadd.f32 %v5271_v10, %v5037_v55 }
 0x42c   : > { %5342 = vst [vmem:[#allocation8 + $0xf0] sm:$0xff] %v5310_v57 }
 0x42d   : > { %6709 = shalt.err (!%p6706_p12)
}
 0x42e   : > { %s6790_s23 = smov 128   ;;  %s6791_s6 = smov 8  }
 0x42f   : > { %6153 = dma.vmem_to_hbm [thread:$0]  (%p6170_p7), %s5354_s19, 4096, %s8070_s3, [#allocation4], %s6790_s23, %s6790_s23, %s6791_s6  }
 0x430   : > { %6753 = dma.done.wait (%p6170_p7), [#allocation4], 4096  }
 0x431   : > { %6755 = vsyncadd (%p6170_p7), [#allocation4], 4294963200 }
 0x432 PF: > { %s18_s17 = sadd.s32 1, %s6778_s17   ;;  %s8223_s12 = smov %s6762_s13 }
 0x433   : > { %p15_p13 = scmp.ge.s32.totalorder %s18_s17, 11   ;;  %s8224_s13 = smov %s6766_s14 }
 0x434   : > { %s8225_s14 = smov %s6856_s24  ;;  %s8226_s15 = smov %s6774_s16 }
 0x435   : > { %s8227_s16 = smov %s8229_s18  ;;  %17 = sbr.rel (!%p15_p13) target bundleno = 6 (0x6), region = 91 }
 0x43a   :  { %5369 = vsyncpa [#allocation3], 1 }
 0x43b   :  { %5371 = vsyncpa [#allocation3 + $0x1], 1 }
 0x43c   :  { %5372 = vsyncpa [#allocation6], 1 }
 0x43d   :  { %5374 = vsyncpa [#allocation6 + $0x1], 1 }
 0x43e   :  { %5375 = vsyncpa [#allocation4], 1 }
 0x43f   :  { %5377 = vsyncpa [#allocation4 + $0x1], 1 }

</bundles_post_ra>
